<compile_context>
chip_gen: v7x
topology: tpu7x:2x2x1
jax: 0.10.0
libtpu: 0.0.40
codegen_flags: <defaults>
</compile_context>

<pallas_src>
import jax
import jax.numpy as jnp
import numpy as np
from jax.experimental import pallas as pl
from jax.experimental.pallas import tpu as pltpu

# ----------------------------- config (small) -----------------------------
B = 2          # batch
IN_CH = 4      # in_channels
HIDDEN = 8     # hidden
OUT_CH = 4     # out_channels
KSIZE = 3      # conv kernel_size
HZ = 8         # template (z_f) spatial
HX = 16        # search spatial
BN_EPS = 1e-5

HK = HZ - KSIZE + 1        # 6   kernel-feature spatial (make_kernel output)
HS = HX - KSIZE + 1        # 14  conv_search output spatial
HO = HS - HK + 1           # 9   correlation / final output spatial


# ----------------------------- Pallas kernels -----------------------------
def _make_kernel_body(z_ref, wk_ref, o_ref):
    """3x3 valid conv IN_CH -> 2*HIDDEN.  Weight columns are pre-permuted to
    blocked channel order (j*HIDDEN + c), so the output is already blocked."""
    b, hz, wz, cin = z_ref.shape
    oh, ow = hz - KSIZE + 1, wz - KSIZE + 1
    acc = None
    for dy in range(KSIZE):
        for dx in range(KSIZE):
            win = z_ref[:, dy:dy + oh, dx:dx + ow, :]          # (B, oh, ow, cin)
            for c in range(cin):
                row = (dy * KSIZE + dx) * cin + c
                term = win[:, :, :, c:c + 1] * wk_ref[row:row + 1, :]
                acc = term if acc is None else acc + term
    o_ref[...] = acc.astype(o_ref.dtype)


def _forward_body(x_ref, kz_ref, ws2_ref, w1_ref, b1_ref, w2_ref, b2_ref,
                  o_ref, sf_ref):
    """Fused conv_search + conv2d_dw_group + head; whole batch in one block.

    x_ref:   (B, HX, HX, IN_CH)        search features, NHWC
    kz_ref:  (B, HK, HK, 2*HIDDEN)     self.kernel, blocked channel order
    ws2_ref: (K*K*IN_CH, 2*HIDDEN)     conv_search weights, columns duplicated
    w1_ref:  (2*HIDDEN, HIDDEN)        head conv1 (BN folded, rows blocked)
    b1_ref:  (1, HIDDEN)               folded BN bias
    w2_ref:  (HIDDEN, OUT_CH), b2_ref: (1, OUT_CH)
    o_ref:   (B, HO, HO, OUT_CH)       output, NHWC
    sf_ref:  VMEM scratch (B, HS, HS, 2*HIDDEN)
    """
    b, hx, wx, cin = x_ref.shape
    _, kh, kw, c2 = kz_ref.shape                 # c2 = 2*HIDDEN, blocked order
    sh, sw = hx - KSIZE + 1, wx - KSIZE + 1      # conv_search output spatial
    oh, ow = sh - kh + 1, sw - kw + 1            # correlation output spatial
    hidden = w1_ref.shape[1]
    cout = w2_ref.shape[1]

    # --- conv_search: unrolled 3x3 tap-MACs, output channels pre-duplicated ---
    sf2 = None
    for dy in range(KSIZE):
        for dx in range(KSIZE):
            win = x_ref[:, dy:dy + sh, dx:dx + sw, :]          # (B, sh, sw, cin)
            for c in range(cin):
                row = (dy * KSIZE + dx) * cin + c
                term = win[:, :, :, c:c + 1] * ws2_ref[row:row + 1, :]
                sf2 = term if sf2 is None else sf2 + term
    sf_ref[...] = sf2        # park in VMEM scratch so window reads are plain loads

    # --- depthwise-group correlation: both outputs per channel in one MAC ---
    feat = None
    for dy in range(kh):
        for dx in range(kw):
            term = (sf_ref[:, dy:dy + oh, dx:dx + ow, :]
                    * kz_ref[:, dy:dy + 1, dx:dx + 1, :])
            feat = term if feat is None else feat + term

    # --- head: 1x1 conv (eval-BN folded) -> ReLU -> 1x1 conv + bias ---
    hid = jnp.broadcast_to(b1_ref[...], (b, oh, ow, hidden)).astype(jnp.float32)
    for c in range(c2):
        hid = hid + feat[:, :, :, c:c + 1] * w1_ref[c:c + 1, :]
    hid = jnp.maximum(hid, 0.0)

    out = jnp.broadcast_to(b2_ref[...], (b, oh, ow, cout)).astype(jnp.float32)
    for h in range(hidden):
        out = out + hid[:, :, :, h:h + 1] * w2_ref[h:h + 1, :]
    o_ref[...] = out.astype(o_ref.dtype)


# -------------------------------- params --------------------------------
def init_params(key):
    ks = jax.random.split(key, 8)
    wk = 0.1 * jax.random.normal(ks[0], (KSIZE, KSIZE, IN_CH, 2 * HIDDEN), jnp.float32)
    ws = 0.1 * jax.random.normal(ks[1], (KSIZE, KSIZE, IN_CH, HIDDEN), jnp.float32)
    # head conv1 (1x1, no bias): input channels in PyTorch's interleaved order (2c+j)
    w1 = 0.1 * jax.random.normal(ks[2], (2 * HIDDEN, HIDDEN), jnp.float32)
    gamma = 1.0 + 0.1 * jax.random.normal(ks[3], (HIDDEN,), jnp.float32)
    beta = 0.1 * jax.random.normal(ks[4], (HIDDEN,), jnp.float32)
    run_mean = 0.1 * jax.random.normal(ks[5], (HIDDEN,), jnp.float32)
    run_var = jnp.abs(jax.random.normal(ks[6], (HIDDEN,), jnp.float32)) + 0.5
    w2 = 0.1 * jax.random.normal(ks[7], (HIDDEN, OUT_CH), jnp.float32)
    b2 = 0.05 * jnp.arange(OUT_CH, dtype=jnp.float32)
    return dict(wk=wk, ws=ws, w1=w1, gamma=gamma, beta=beta,
                run_mean=run_mean, run_var=run_var, w2=w2, b2=b2)


def prepare(params):
    """Weight preprocessing (one-time, zero runtime cost):
       * flatten 3x3 conv weights to tap-major (dy, dx, c) rows,
       * permute conv_kernel output columns interleaved(2c+j) -> blocked(j*H+c),
       * duplicate conv_search columns so the correlation does both halves at once,
       * fold eval-mode BatchNorm into head conv1 and permute its input rows to
         the same blocked order."""
    # TODO(synk): BatchNorm2d is folded in eval mode; training-mode batch statistics not implemented.
    wkp = params["wk"].reshape(KSIZE, KSIZE, IN_CH, HIDDEN, 2)
    wkp = wkp.transpose(0, 1, 2, 4, 3).reshape(KSIZE * KSIZE * IN_CH, 2 * HIDDEN)
    ws_mat = params["ws"].reshape(KSIZE * KSIZE * IN_CH, HIDDEN)
    ws2 = jnp.concatenate([ws_mat, ws_mat], axis=1)            # (K*K*C, 2*HIDDEN)
    scale = params["gamma"] / jnp.sqrt(params["run_var"] + BN_EPS)
    w1_folded = params["w1"] * scale[None, :]
    b1_folded = (params["beta"] - params["run_mean"] * scale)[None, :]
    w1p = w1_folded.reshape(HIDDEN, 2, HIDDEN).transpose(1, 0, 2).reshape(
        2 * HIDDEN, HIDDEN)
    return dict(wkp=wkp, ws2=ws2, w1p=w1p, b1=b1_folded,
                w2=params["w2"], b2=params["b2"][None, :])


# -------------------------------- wrappers --------------------------------
@jax.jit
def make_kernel(prep, z_f_nchw):
    """== self.conv_kernel(z_f).  Returns NHWC kernel features in BLOCKED
    channel order (j*HIDDEN + c); the permutation lives in the weights."""
    z = jnp.transpose(z_f_nchw, (0, 2, 3, 1)).astype(jnp.float32)
    b, hz, wz, _ = z.shape
    oh, ow = hz - KSIZE + 1, wz - KSIZE + 1
    macs = b * oh * ow * (KSIZE * KSIZE * IN_CH) * (2 * HIDDEN)
    byts = 4 * (z.size + prep["wkp"].size + b * oh * ow * 2 * HIDDEN)
    return pl.pallas_call(
        _make_kernel_body,
        out_shape=jax.ShapeDtypeStruct((b, oh, ow, 2 * HIDDEN), jnp.float32),
        cost_estimate=pl.CostEstimate(flops=2 * macs, transcendentals=0,
                                      bytes_accessed=byts),
    )(z, prep["wkp"])


@jax.jit
def forward(prep, self_kernel_nhwc, search_nchw):
    """== L_DepthCorr.forward(kernel, search); uses self.kernel from make_kernel."""
    x = jnp.transpose(search_nchw, (0, 2, 3, 1)).astype(jnp.float32)
    b, hx, wx, _ = x.shape
    kh = self_kernel_nhwc.shape[1]
    sh, sw = hx - KSIZE + 1, wx - KSIZE + 1
    oh, ow = sh - kh + 1, sw - kh + 1
    macs = (b * sh * sw * (KSIZE * KSIZE * IN_CH) * (2 * HIDDEN)     # conv_search
            + b * oh * ow * (kh * kh) * (2 * HIDDEN)                 # correlation
            + b * oh * ow * (2 * HIDDEN) * HIDDEN                    # head conv1
            + b * oh * ow * HIDDEN * OUT_CH)                         # head conv2
    byts = 4 * (x.size + self_kernel_nhwc.size + prep["ws2"].size
                + prep["w1p"].size + prep["b1"].size + prep["w2"].size
                + prep["b2"].size + b * oh * ow * OUT_CH)
    out_nhwc = pl.pallas_call(
        _forward_body,
        out_shape=jax.ShapeDtypeStruct((b, oh, ow, OUT_CH), jnp.float32),
        scratch_shapes=[pltpu.VMEM((b, sh, sw, 2 * HIDDEN), jnp.float32)],
        cost_estimate=pl.CostEstimate(flops=2 * macs, transcendentals=0,
                                      bytes_accessed=byts),
    )(x, self_kernel_nhwc, prep["ws2"], prep["w1p"], prep["b1"],
      prep["w2"], prep["b2"])
    return jnp.transpose(out_nhwc, (0, 3, 1, 2))               # back to NCHW


# ---------------------- pure-JAX reference (for check) ----------------------
def reference_forward(params, z_nchw, x_nchw):
    z = jnp.transpose(z_nchw, (0, 2, 3, 1)).astype(jnp.float32)
    x = jnp.transpose(x_nchw, (0, 2, 3, 1)).astype(jnp.float32)

    def conv3x3(inp, w_hwio):
        _, hh, ww, _ = inp.shape
        oh, ow = hh - 2, ww - 2
        out = 0.0
        for dy in range(3):
            for dx in range(3):
                out = out + jnp.einsum("bhwc,co->bhwo",
                                       inp[:, dy:dy + oh, dx:dx + ow, :],
                                       w_hwio[dy, dx])
        return out

    kz = conv3x3(z, params["wk"])      # (B, 6, 6, 2*HIDDEN), PyTorch channel order 2c+j
    sx = conv3x3(x, params["ws"])      # (B, 14, 14, HIDDEN)
    srep = jnp.repeat(sx, 2, axis=-1)  # channel 2c+j <- c
    kh = kz.shape[1]
    oh = sx.shape[1] - kh + 1
    feat = jnp.zeros((sx.shape[0], oh, oh, 2 * HIDDEN), jnp.float32)
    for dy in range(kh):
        for dx in range(kh):
            feat = feat + srep[:, dy:dy + oh, dx:dx + oh, :] * kz[:, dy:dy + 1, dx:dx + 1, :]
    scale = params["gamma"] / jnp.sqrt(params["run_var"] + BN_EPS)
    w1s = params["w1"] * scale[None, :]
    b1 = params["beta"] - params["run_mean"] * scale
    h = jnp.maximum(jnp.einsum("bhwc,cd->bhwd", feat, w1s) + b1, 0.0)
    out = jnp.einsum("bhwd,do->bhwo", h, params["w2"]) + params["b2"]
    return jnp.transpose(out, (0, 3, 1, 2))


# --------------------------------- main ---------------------------------
if __name__ == "__main__":
    key = jax.random.PRNGKey(0)
    kp, kz_key, kx_key = jax.random.split(key, 3)
    params = init_params(kp)
    prep = prepare(params)

    z_f = jax.random.normal(kz_key, (B, IN_CH, HZ, HZ), jnp.float32)      # template (NCHW)
    search = jax.random.normal(kx_key, (B, IN_CH, HX, HX), jnp.float32)   # search   (NCHW)

    self_kernel = make_kernel(prep, z_f)          # == self.kernel = make_kernel(z_f)
    out = forward(prep, self_kernel, search)      # == forward(kernel, search)
    out = jax.block_until_ready(out)

    ref = reference_forward(params, z_f, search)
    assert out.shape == (B, OUT_CH, HO, HO), out.shape
    np.testing.assert_allclose(np.asarray(out), np.asarray(ref), rtol=3e-4, atol=3e-4)
    print("KERNEL_OK")
</pallas_src>

<mosaic_0001>
module attributes {stable_mosaic.version = 11 : i64} {
  func.func @_make_kernel_body(%arg0: memref<2x8x8x4xf32, #tpu.memory_space<vmem>>, %arg1: memref<36x16xf32, #tpu.memory_space<vmem>>, %arg2: memref<2x6x6x16xf32, #tpu.memory_space<vmem>>) attributes {dimension_semantics = [], scalar_prefetch = 0 : i64, scratch_operands = 0 : i64, tpu.core_type = #tpu.core_type<tc>} {
    %c0 = arith.constant 0 : index
    %c0_0 = arith.constant 0 : index
    %c0_1 = arith.constant 0 : index
    %c0_2 = arith.constant 0 : index
    %0 = vector.load %arg0[%c0, %c0_0, %c0_1, %c0_2] : memref<2x8x8x4xf32, #tpu.memory_space<vmem>>, vector<2x6x6x4xf32>
    %1 = vector.extract_strided_slice %0 {offsets = [0, 0, 0, 0], sizes = [2, 6, 6, 1], strides = [1, 1, 1, 1]} : vector<2x6x6x4xf32> to vector<2x6x6x1xf32>
    %c0_3 = arith.constant 0 : index
    %c0_4 = arith.constant 0 : index
    %2 = vector.load %arg1[%c0_3, %c0_4] : memref<36x16xf32, #tpu.memory_space<vmem>>, vector<1x16xf32>
    %3 = vector.shape_cast %2 : vector<1x16xf32> to vector<1x1x1x16xf32>
    %4 = vector.broadcast %1 : vector<2x6x6x1xf32> to vector<2x6x6x16xf32>
    %5 = vector.broadcast %3 : vector<1x1x1x16xf32> to vector<2x6x6x16xf32>
    %6 = arith.mulf %4, %5 : vector<2x6x6x16xf32>
    %7 = vector.extract_strided_slice %0 {offsets = [0, 0, 0, 1], sizes = [2, 6, 6, 1], strides = [1, 1, 1, 1]} : vector<2x6x6x4xf32> to vector<2x6x6x1xf32>
    %c1 = arith.constant 1 : index
    %c0_5 = arith.constant 0 : index
    %8 = vector.load %arg1[%c1, %c0_5] : memref<36x16xf32, #tpu.memory_space<vmem>>, vector<1x16xf32>
    %9 = vector.shape_cast %8 : vector<1x16xf32> to vector<1x1x1x16xf32>
    %10 = vector.broadcast %7 : vector<2x6x6x1xf32> to vector<2x6x6x16xf32>
    %11 = vector.broadcast %9 : vector<1x1x1x16xf32> to vector<2x6x6x16xf32>
    %12 = arith.mulf %10, %11 : vector<2x6x6x16xf32>
    %13 = arith.addf %6, %12 : vector<2x6x6x16xf32>
    %14 = vector.extract_strided_slice %0 {offsets = [0, 0, 0, 2], sizes = [2, 6, 6, 1], strides = [1, 1, 1, 1]} : vector<2x6x6x4xf32> to vector<2x6x6x1xf32>
    %c2 = arith.constant 2 : index
    %c0_6 = arith.constant 0 : index
    %15 = vector.load %arg1[%c2, %c0_6] : memref<36x16xf32, #tpu.memory_space<vmem>>, vector<1x16xf32>
    %16 = vector.shape_cast %15 : vector<1x16xf32> to vector<1x1x1x16xf32>
    %17 = vector.broadcast %14 : vector<2x6x6x1xf32> to vector<2x6x6x16xf32>
    %18 = vector.broadcast %16 : vector<1x1x1x16xf32> to vector<2x6x6x16xf32>
    %19 = arith.mulf %17, %18 : vector<2x6x6x16xf32>
    %20 = arith.addf %13, %19 : vector<2x6x6x16xf32>
    %21 = vector.extract_strided_slice %0 {offsets = [0, 0, 0, 3], sizes = [2, 6, 6, 1], strides = [1, 1, 1, 1]} : vector<2x6x6x4xf32> to vector<2x6x6x1xf32>
    %c3 = arith.constant 3 : index
    %c0_7 = arith.constant 0 : index
    %22 = vector.load %arg1[%c3, %c0_7] : memref<36x16xf32, #tpu.memory_space<vmem>>, vector<1x16xf32>
    %23 = vector.shape_cast %22 : vector<1x16xf32> to vector<1x1x1x16xf32>
    %24 = vector.broadcast %21 : vector<2x6x6x1xf32> to vector<2x6x6x16xf32>
    %25 = vector.broadcast %23 : vector<1x1x1x16xf32> to vector<2x6x6x16xf32>
    %26 = arith.mulf %24, %25 : vector<2x6x6x16xf32>
    %27 = arith.addf %20, %26 : vector<2x6x6x16xf32>
    %c0_8 = arith.constant 0 : index
    %c0_9 = arith.constant 0 : index
    %c1_10 = arith.constant 1 : index
    %c0_11 = arith.constant 0 : index
    %28 = vector.load %arg0[%c0_8, %c0_9, %c1_10, %c0_11] : memref<2x8x8x4xf32, #tpu.memory_space<vmem>>, vector<2x6x6x4xf32>
    %29 = vector.extract_strided_slice %28 {offsets = [0, 0, 0, 0], sizes = [2, 6, 6, 1], strides = [1, 1, 1, 1]} : vector<2x6x6x4xf32> to vector<2x6x6x1xf32>
    %c4 = arith.constant 4 : index
    %c0_12 = arith.constant 0 : index
    %30 = vector.load %arg1[%c4, %c0_12] : memref<36x16xf32, #tpu.memory_space<vmem>>, vector<1x16xf32>
    %31 = vector.shape_cast %30 : vector<1x16xf32> to vector<1x1x1x16xf32>
    %32 = vector.broadcast %29 : vector<2x6x6x1xf32> to vector<2x6x6x16xf32>
    %33 = vector.broadcast %31 : vector<1x1x1x16xf32> to vector<2x6x6x16xf32>
    %34 = arith.mulf %32, %33 : vector<2x6x6x16xf32>
    %35 = arith.addf %27, %34 : vector<2x6x6x16xf32>
    %36 = vector.extract_strided_slice %28 {offsets = [0, 0, 0, 1], sizes = [2, 6, 6, 1], strides = [1, 1, 1, 1]} : vector<2x6x6x4xf32> to vector<2x6x6x1xf32>
    %c5 = arith.constant 5 : index
    %c0_13 = arith.constant 0 : index
    %37 = vector.load %arg1[%c5, %c0_13] : memref<36x16xf32, #tpu.memory_space<vmem>>, vector<1x16xf32>
    %38 = vector.shape_cast %37 : vector<1x16xf32> to vector<1x1x1x16xf32>
    %39 = vector.broadcast %36 : vector<2x6x6x1xf32> to vector<2x6x6x16xf32>
    %40 = vector.broadcast %38 : vector<1x1x1x16xf32> to vector<2x6x6x16xf32>
    %41 = arith.mulf %39, %40 : vector<2x6x6x16xf32>
    %42 = arith.addf %35, %41 : vector<2x6x6x16xf32>
    %43 = vector.extract_strided_slice %28 {offsets = [0, 0, 0, 2], sizes = [2, 6, 6, 1], strides = [1, 1, 1, 1]} : vector<2x6x6x4xf32> to vector<2x6x6x1xf32>
    %c6 = arith.constant 6 : index
    %c0_14 = arith.constant 0 : index
    %44 = vector.load %arg1[%c6, %c0_14] : memref<36x16xf32, #tpu.memory_space<vmem>>, vector<1x16xf32>
    %45 = vector.shape_cast %44 : vector<1x16xf32> to vector<1x1x1x16xf32>
    %46 = vector.broadcast %43 : vector<2x6x6x1xf32> to vector<2x6x6x16xf32>
    %47 = vector.broadcast %45 : vector<1x1x1x16xf32> to vector<2x6x6x16xf32>
    %48 = arith.mulf %46, %47 : vector<2x6x6x16xf32>
    %49 = arith.addf %42, %48 : vector<2x6x6x16xf32>
    %50 = vector.extract_strided_slice %28 {offsets = [0, 0, 0, 3], sizes = [2, 6, 6, 1], strides = [1, 1, 1, 1]} : vector<2x6x6x4xf32> to vector<2x6x6x1xf32>
    %c7 = arith.constant 7 : index
    %c0_15 = arith.constant 0 : index
    %51 = vector.load %arg1[%c7, %c0_15] : memref<36x16xf32, #tpu.memory_space<vmem>>, vector<1x16xf32>
    %52 = vector.shape_cast %51 : vector<1x16xf32> to vector<1x1x1x16xf32>
    %53 = vector.broadcast %50 : vector<2x6x6x1xf32> to vector<2x6x6x16xf32>
    %54 = vector.broadcast %52 : vector<1x1x1x16xf32> to vector<2x6x6x16xf32>
    %55 = arith.mulf %53, %54 : vector<2x6x6x16xf32>
    %56 = arith.addf %49, %55 : vector<2x6x6x16xf32>
    %c0_16 = arith.constant 0 : index
    %c0_17 = arith.constant 0 : index
    %c2_18 = arith.constant 2 : index
    %c0_19 = arith.constant 0 : index
    %57 = vector.load %arg0[%c0_16, %c0_17, %c2_18, %c0_19] : memref<2x8x8x4xf32, #tpu.memory_space<vmem>>, vector<2x6x6x4xf32>
    %58 = vector.extract_strided_slice %57 {offsets = [0, 0, 0, 0], sizes = [2, 6, 6, 1], strides = [1, 1, 1, 1]} : vector<2x6x6x4xf32> to vector<2x6x6x1xf32>
    %c8 = arith.constant 8 : index
    %c0_20 = arith.constant 0 : index
    %59 = vector.load %arg1[%c8, %c0_20] : memref<36x16xf32, #tpu.memory_space<vmem>>, vector<1x16xf32>
    %60 = vector.shape_cast %59 : vector<1x16xf32> to vector<1x1x1x16xf32>
    %61 = vector.broadcast %58 : vector<2x6x6x1xf32> to vector<2x6x6x16xf32>
    %62 = vector.broadcast %60 : vector<1x1x1x16xf32> to vector<2x6x6x16xf32>
    %63 = arith.mulf %61, %62 : vector<2x6x6x16xf32>
    %64 = arith.addf %56, %63 : vector<2x6x6x16xf32>
    %65 = vector.extract_strided_slice %57 {offsets = [0, 0, 0, 1], sizes = [2, 6, 6, 1], strides = [1, 1, 1, 1]} : vector<2x6x6x4xf32> to vector<2x6x6x1xf32>
    %c9 = arith.constant 9 : index
    %c0_21 = arith.constant 0 : index
    %66 = vector.load %arg1[%c9, %c0_21] : memref<36x16xf32, #tpu.memory_space<vmem>>, vector<1x16xf32>
    %67 = vector.shape_cast %66 : vector<1x16xf32> to vector<1x1x1x16xf32>
    %68 = vector.broadcast %65 : vector<2x6x6x1xf32> to vector<2x6x6x16xf32>
    %69 = vector.broadcast %67 : vector<1x1x1x16xf32> to vector<2x6x6x16xf32>
    %70 = arith.mulf %68, %69 : vector<2x6x6x16xf32>
    %71 = arith.addf %64, %70 : vector<2x6x6x16xf32>
    %72 = vector.extract_strided_slice %57 {offsets = [0, 0, 0, 2], sizes = [2, 6, 6, 1], strides = [1, 1, 1, 1]} : vector<2x6x6x4xf32> to vector<2x6x6x1xf32>
    %c10 = arith.constant 10 : index
    %c0_22 = arith.constant 0 : index
    %73 = vector.load %arg1[%c10, %c0_22] : memref<36x16xf32, #tpu.memory_space<vmem>>, vector<1x16xf32>
    %74 = vector.shape_cast %73 : vector<1x16xf32> to vector<1x1x1x16xf32>
    %75 = vector.broadcast %72 : vector<2x6x6x1xf32> to vector<2x6x6x16xf32>
    %76 = vector.broadcast %74 : vector<1x1x1x16xf32> to vector<2x6x6x16xf32>
    %77 = arith.mulf %75, %76 : vector<2x6x6x16xf32>
    %78 = arith.addf %71, %77 : vector<2x6x6x16xf32>
    %79 = vector.extract_strided_slice %57 {offsets = [0, 0, 0, 3], sizes = [2, 6, 6, 1], strides = [1, 1, 1, 1]} : vector<2x6x6x4xf32> to vector<2x6x6x1xf32>
    %c11 = arith.constant 11 : index
    %c0_23 = arith.constant 0 : index
    %80 = vector.load %arg1[%c11, %c0_23] : memref<36x16xf32, #tpu.memory_space<vmem>>, vector<1x16xf32>
    %81 = vector.shape_cast %80 : vector<1x16xf32> to vector<1x1x1x16xf32>
    %82 = vector.broadcast %79 : vector<2x6x6x1xf32> to vector<2x6x6x16xf32>
    %83 = vector.broadcast %81 : vector<1x1x1x16xf32> to vector<2x6x6x16xf32>
    %84 = arith.mulf %82, %83 : vector<2x6x6x16xf32>
    %85 = arith.addf %78, %84 : vector<2x6x6x16xf32>
    %c0_24 = arith.constant 0 : index
    %c1_25 = arith.constant 1 : index
    %c0_26 = arith.constant 0 : index
    %c0_27 = arith.constant 0 : index
    %86 = vector.load %arg0[%c0_24, %c1_25, %c0_26, %c0_27] : memref<2x8x8x4xf32, #tpu.memory_space<vmem>>, vector<2x6x6x4xf32>
    %87 = vector.extract_strided_slice %86 {offsets = [0, 0, 0, 0], sizes = [2, 6, 6, 1], strides = [1, 1, 1, 1]} : vector<2x6x6x4xf32> to vector<2x6x6x1xf32>
    %c12 = arith.constant 12 : index
    %c0_28 = arith.constant 0 : index
    %88 = vector.load %arg1[%c12, %c0_28] : memref<36x16xf32, #tpu.memory_space<vmem>>, vector<1x16xf32>
    %89 = vector.shape_cast %88 : vector<1x16xf32> to vector<1x1x1x16xf32>
    %90 = vector.broadcast %87 : vector<2x6x6x1xf32> to vector<2x6x6x16xf32>
    %91 = vector.broadcast %89 : vector<1x1x1x16xf32> to vector<2x6x6x16xf32>
    %92 = arith.mulf %90, %91 : vector<2x6x6x16xf32>
    %93 = arith.addf %85, %92 : vector<2x6x6x16xf32>
    %94 = vector.extract_strided_slice %86 {offsets = [0, 0, 0, 1], sizes = [2, 6, 6, 1], strides = [1, 1, 1, 1]} : vector<2x6x6x4xf32> to vector<2x6x6x1xf32>
    %c13 = arith.constant 13 : index
    %c0_29 = arith.constant 0 : index
    %95 = vector.load %arg1[%c13, %c0_29] : memref<36x16xf32, #tpu.memory_space<vmem>>, vector<1x16xf32>
    %96 = vector.shape_cast %95 : vector<1x16xf32> to vector<1x1x1x16xf32>
    %97 = vector.broadcast %94 : vector<2x6x6x1xf32> to vector<2x6x6x16xf32>
    %98 = vector.broadcast %96 : vector<1x1x1x16xf32> to vector<2x6x6x16xf32>
    %99 = arith.mulf %97, %98 : vector<2x6x6x16xf32>
    %100 = arith.addf %93, %99 : vector<2x6x6x16xf32>
    %101 = vector.extract_strided_slice %86 {offsets = [0, 0, 0, 2], sizes = [2, 6, 6, 1], strides = [1, 1, 1, 1]} : vector<2x6x6x4xf32> to vector<2x6x6x1xf32>
    %c14 = arith.constant 14 : index
    %c0_30 = arith.constant 0 : index
    %102 = vector.load %arg1[%c14, %c0_30] : memref<36x16xf32, #tpu.memory_space<vmem>>, vector<1x16xf32>
    %103 = vector.shape_cast %102 : vector<1x16xf32> to vector<1x1x1x16xf32>
    %104 = vector.broadcast %101 : vector<2x6x6x1xf32> to vector<2x6x6x16xf32>
    %105 = vector.broadcast %103 : vector<1x1x1x16xf32> to vector<2x6x6x16xf32>
    %106 = arith.mulf %104, %105 : vector<2x6x6x16xf32>
    %107 = arith.addf %100, %106 : vector<2x6x6x16xf32>
    %108 = vector.extract_strided_slice %86 {offsets = [0, 0, 0, 3], sizes = [2, 6, 6, 1], strides = [1, 1, 1, 1]} : vector<2x6x6x4xf32> to vector<2x6x6x1xf32>
    %c15 = arith.constant 15 : index
    %c0_31 = arith.constant 0 : index
    %109 = vector.load %arg1[%c15, %c0_31] : memref<36x16xf32, #tpu.memory_space<vmem>>, vector<1x16xf32>
    %110 = vector.shape_cast %109 : vector<1x16xf32> to vector<1x1x1x16xf32>
    %111 = vector.broadcast %108 : vector<2x6x6x1xf32> to vector<2x6x6x16xf32>
    %112 = vector.broadcast %110 : vector<1x1x1x16xf32> to vector<2x6x6x16xf32>
    %113 = arith.mulf %111, %112 : vector<2x6x6x16xf32>
    %114 = arith.addf %107, %113 : vector<2x6x6x16xf32>
    %c0_32 = arith.constant 0 : index
    %c1_33 = arith.constant 1 : index
    %c1_34 = arith.constant 1 : index
    %c0_35 = arith.constant 0 : index
    %115 = vector.load %arg0[%c0_32, %c1_33, %c1_34, %c0_35] : memref<2x8x8x4xf32, #tpu.memory_space<vmem>>, vector<2x6x6x4xf32>
    %116 = vector.extract_strided_slice %115 {offsets = [0, 0, 0, 0], sizes = [2, 6, 6, 1], strides = [1, 1, 1, 1]} : vector<2x6x6x4xf32> to vector<2x6x6x1xf32>
    %c16 = arith.constant 16 : index
    %c0_36 = arith.constant 0 : index
    %117 = vector.load %arg1[%c16, %c0_36] : memref<36x16xf32, #tpu.memory_space<vmem>>, vector<1x16xf32>
    %118 = vector.shape_cast %117 : vector<1x16xf32> to vector<1x1x1x16xf32>
    %119 = vector.broadcast %116 : vector<2x6x6x1xf32> to vector<2x6x6x16xf32>
    %120 = vector.broadcast %118 : vector<1x1x1x16xf32> to vector<2x6x6x16xf32>
    %121 = arith.mulf %119, %120 : vector<2x6x6x16xf32>
    %122 = arith.addf %114, %121 : vector<2x6x6x16xf32>
    %123 = vector.extract_strided_slice %115 {offsets = [0, 0, 0, 1], sizes = [2, 6, 6, 1], strides = [1, 1, 1, 1]} : vector<2x6x6x4xf32> to vector<2x6x6x1xf32>
    %c17 = arith.constant 17 : index
    %c0_37 = arith.constant 0 : index
    %124 = vector.load %arg1[%c17, %c0_37] : memref<36x16xf32, #tpu.memory_space<vmem>>, vector<1x16xf32>
    %125 = vector.shape_cast %124 : vector<1x16xf32> to vector<1x1x1x16xf32>
    %126 = vector.broadcast %123 : vector<2x6x6x1xf32> to vector<2x6x6x16xf32>
    %127 = vector.broadcast %125 : vector<1x1x1x16xf32> to vector<2x6x6x16xf32>
    %128 = arith.mulf %126, %127 : vector<2x6x6x16xf32>
    %129 = arith.addf %122, %128 : vector<2x6x6x16xf32>
    %130 = vector.extract_strided_slice %115 {offsets = [0, 0, 0, 2], sizes = [2, 6, 6, 1], strides = [1, 1, 1, 1]} : vector<2x6x6x4xf32> to vector<2x6x6x1xf32>
    %c18 = arith.constant 18 : index
    %c0_38 = arith.constant 0 : index
    %131 = vector.load %arg1[%c18, %c0_38] : memref<36x16xf32, #tpu.memory_space<vmem>>, vector<1x16xf32>
    %132 = vector.shape_cast %131 : vector<1x16xf32> to vector<1x1x1x16xf32>
    %133 = vector.broadcast %130 : vector<2x6x6x1xf32> to vector<2x6x6x16xf32>
    %134 = vector.broadcast %132 : vector<1x1x1x16xf32> to vector<2x6x6x16xf32>
    %135 = arith.mulf %133, %134 : vector<2x6x6x16xf32>
    %136 = arith.addf %129, %135 : vector<2x6x6x16xf32>
    %137 = vector.extract_strided_slice %115 {offsets = [0, 0, 0, 3], sizes = [2, 6, 6, 1], strides = [1, 1, 1, 1]} : vector<2x6x6x4xf32> to vector<2x6x6x1xf32>
    %c19 = arith.constant 19 : index
    %c0_39 = arith.constant 0 : index
    %138 = vector.load %arg1[%c19, %c0_39] : memref<36x16xf32, #tpu.memory_space<vmem>>, vector<1x16xf32>
    %139 = vector.shape_cast %138 : vector<1x16xf32> to vector<1x1x1x16xf32>
    %140 = vector.broadcast %137 : vector<2x6x6x1xf32> to vector<2x6x6x16xf32>
    %141 = vector.broadcast %139 : vector<1x1x1x16xf32> to vector<2x6x6x16xf32>
    %142 = arith.mulf %140, %141 : vector<2x6x6x16xf32>
    %143 = arith.addf %136, %142 : vector<2x6x6x16xf32>
    %c0_40 = arith.constant 0 : index
    %c1_41 = arith.constant 1 : index
    %c2_42 = arith.constant 2 : index
    %c0_43 = arith.constant 0 : index
    %144 = vector.load %arg0[%c0_40, %c1_41, %c2_42, %c0_43] : memref<2x8x8x4xf32, #tpu.memory_space<vmem>>, vector<2x6x6x4xf32>
    %145 = vector.extract_strided_slice %144 {offsets = [0, 0, 0, 0], sizes = [2, 6, 6, 1], strides = [1, 1, 1, 1]} : vector<2x6x6x4xf32> to vector<2x6x6x1xf32>
    %c20 = arith.constant 20 : index
    %c0_44 = arith.constant 0 : index
    %146 = vector.load %arg1[%c20, %c0_44] : memref<36x16xf32, #tpu.memory_space<vmem>>, vector<1x16xf32>
    %147 = vector.shape_cast %146 : vector<1x16xf32> to vector<1x1x1x16xf32>
    %148 = vector.broadcast %145 : vector<2x6x6x1xf32> to vector<2x6x6x16xf32>
    %149 = vector.broadcast %147 : vector<1x1x1x16xf32> to vector<2x6x6x16xf32>
    %150 = arith.mulf %148, %149 : vector<2x6x6x16xf32>
    %151 = arith.addf %143, %150 : vector<2x6x6x16xf32>
    %152 = vector.extract_strided_slice %144 {offsets = [0, 0, 0, 1], sizes = [2, 6, 6, 1], strides = [1, 1, 1, 1]} : vector<2x6x6x4xf32> to vector<2x6x6x1xf32>
    %c21 = arith.constant 21 : index
    %c0_45 = arith.constant 0 : index
    %153 = vector.load %arg1[%c21, %c0_45] : memref<36x16xf32, #tpu.memory_space<vmem>>, vector<1x16xf32>
    %154 = vector.shape_cast %153 : vector<1x16xf32> to vector<1x1x1x16xf32>
    %155 = vector.broadcast %152 : vector<2x6x6x1xf32> to vector<2x6x6x16xf32>
    %156 = vector.broadcast %154 : vector<1x1x1x16xf32> to vector<2x6x6x16xf32>
    %157 = arith.mulf %155, %156 : vector<2x6x6x16xf32>
    %158 = arith.addf %151, %157 : vector<2x6x6x16xf32>
    %159 = vector.extract_strided_slice %144 {offsets = [0, 0, 0, 2], sizes = [2, 6, 6, 1], strides = [1, 1, 1, 1]} : vector<2x6x6x4xf32> to vector<2x6x6x1xf32>
    %c22 = arith.constant 22 : index
    %c0_46 = arith.constant 0 : index
    %160 = vector.load %arg1[%c22, %c0_46] : memref<36x16xf32, #tpu.memory_space<vmem>>, vector<1x16xf32>
    %161 = vector.shape_cast %160 : vector<1x16xf32> to vector<1x1x1x16xf32>
    %162 = vector.broadcast %159 : vector<2x6x6x1xf32> to vector<2x6x6x16xf32>
    %163 = vector.broadcast %161 : vector<1x1x1x16xf32> to vector<2x6x6x16xf32>
    %164 = arith.mulf %162, %163 : vector<2x6x6x16xf32>
    %165 = arith.addf %158, %164 : vector<2x6x6x16xf32>
    %166 = vector.extract_strided_slice %144 {offsets = [0, 0, 0, 3], sizes = [2, 6, 6, 1], strides = [1, 1, 1, 1]} : vector<2x6x6x4xf32> to vector<2x6x6x1xf32>
    %c23 = arith.constant 23 : index
    %c0_47 = arith.constant 0 : index
    %167 = vector.load %arg1[%c23, %c0_47] : memref<36x16xf32, #tpu.memory_space<vmem>>, vector<1x16xf32>
    %168 = vector.shape_cast %167 : vector<1x16xf32> to vector<1x1x1x16xf32>
    %169 = vector.broadcast %166 : vector<2x6x6x1xf32> to vector<2x6x6x16xf32>
    %170 = vector.broadcast %168 : vector<1x1x1x16xf32> to vector<2x6x6x16xf32>
    %171 = arith.mulf %169, %170 : vector<2x6x6x16xf32>
    %172 = arith.addf %165, %171 : vector<2x6x6x16xf32>
    %c0_48 = arith.constant 0 : index
    %c2_49 = arith.constant 2 : index
    %c0_50 = arith.constant 0 : index
    %c0_51 = arith.constant 0 : index
    %173 = vector.load %arg0[%c0_48, %c2_49, %c0_50, %c0_51] : memref<2x8x8x4xf32, #tpu.memory_space<vmem>>, vector<2x6x6x4xf32>
    %174 = vector.extract_strided_slice %173 {offsets = [0, 0, 0, 0], sizes = [2, 6, 6, 1], strides = [1, 1, 1, 1]} : vector<2x6x6x4xf32> to vector<2x6x6x1xf32>
    %c24 = arith.constant 24 : index
    %c0_52 = arith.constant 0 : index
    %175 = vector.load %arg1[%c24, %c0_52] : memref<36x16xf32, #tpu.memory_space<vmem>>, vector<1x16xf32>
    %176 = vector.shape_cast %175 : vector<1x16xf32> to vector<1x1x1x16xf32>
    %177 = vector.broadcast %174 : vector<2x6x6x1xf32> to vector<2x6x6x16xf32>
    %178 = vector.broadcast %176 : vector<1x1x1x16xf32> to vector<2x6x6x16xf32>
    %179 = arith.mulf %177, %178 : vector<2x6x6x16xf32>
    %180 = arith.addf %172, %179 : vector<2x6x6x16xf32>
    %181 = vector.extract_strided_slice %173 {offsets = [0, 0, 0, 1], sizes = [2, 6, 6, 1], strides = [1, 1, 1, 1]} : vector<2x6x6x4xf32> to vector<2x6x6x1xf32>
    %c25 = arith.constant 25 : index
    %c0_53 = arith.constant 0 : index
    %182 = vector.load %arg1[%c25, %c0_53] : memref<36x16xf32, #tpu.memory_space<vmem>>, vector<1x16xf32>
    %183 = vector.shape_cast %182 : vector<1x16xf32> to vector<1x1x1x16xf32>
    %184 = vector.broadcast %181 : vector<2x6x6x1xf32> to vector<2x6x6x16xf32>
    %185 = vector.broadcast %183 : vector<1x1x1x16xf32> to vector<2x6x6x16xf32>
    %186 = arith.mulf %184, %185 : vector<2x6x6x16xf32>
    %187 = arith.addf %180, %186 : vector<2x6x6x16xf32>
    %188 = vector.extract_strided_slice %173 {offsets = [0, 0, 0, 2], sizes = [2, 6, 6, 1], strides = [1, 1, 1, 1]} : vector<2x6x6x4xf32> to vector<2x6x6x1xf32>
    %c26 = arith.constant 26 : index
    %c0_54 = arith.constant 0 : index
    %189 = vector.load %arg1[%c26, %c0_54] : memref<36x16xf32, #tpu.memory_space<vmem>>, vector<1x16xf32>
    %190 = vector.shape_cast %189 : vector<1x16xf32> to vector<1x1x1x16xf32>
    %191 = vector.broadcast %188 : vector<2x6x6x1xf32> to vector<2x6x6x16xf32>
    %192 = vector.broadcast %190 : vector<1x1x1x16xf32> to vector<2x6x6x16xf32>
    %193 = arith.mulf %191, %192 : vector<2x6x6x16xf32>
    %194 = arith.addf %187, %193 : vector<2x6x6x16xf32>
    %195 = vector.extract_strided_slice %173 {offsets = [0, 0, 0, 3], sizes = [2, 6, 6, 1], strides = [1, 1, 1, 1]} : vector<2x6x6x4xf32> to vector<2x6x6x1xf32>
    %c27 = arith.constant 27 : index
    %c0_55 = arith.constant 0 : index
    %196 = vector.load %arg1[%c27, %c0_55] : memref<36x16xf32, #tpu.memory_space<vmem>>, vector<1x16xf32>
    %197 = vector.shape_cast %196 : vector<1x16xf32> to vector<1x1x1x16xf32>
    %198 = vector.broadcast %195 : vector<2x6x6x1xf32> to vector<2x6x6x16xf32>
    %199 = vector.broadcast %197 : vector<1x1x1x16xf32> to vector<2x6x6x16xf32>
    %200 = arith.mulf %198, %199 : vector<2x6x6x16xf32>
    %201 = arith.addf %194, %200 : vector<2x6x6x16xf32>
    %c0_56 = arith.constant 0 : index
    %c2_57 = arith.constant 2 : index
    %c1_58 = arith.constant 1 : index
    %c0_59 = arith.constant 0 : index
    %202 = vector.load %arg0[%c0_56, %c2_57, %c1_58, %c0_59] : memref<2x8x8x4xf32, #tpu.memory_space<vmem>>, vector<2x6x6x4xf32>
    %203 = vector.extract_strided_slice %202 {offsets = [0, 0, 0, 0], sizes = [2, 6, 6, 1], strides = [1, 1, 1, 1]} : vector<2x6x6x4xf32> to vector<2x6x6x1xf32>
    %c28 = arith.constant 28 : index
    %c0_60 = arith.constant 0 : index
    %204 = vector.load %arg1[%c28, %c0_60] : memref<36x16xf32, #tpu.memory_space<vmem>>, vector<1x16xf32>
    %205 = vector.shape_cast %204 : vector<1x16xf32> to vector<1x1x1x16xf32>
    %206 = vector.broadcast %203 : vector<2x6x6x1xf32> to vector<2x6x6x16xf32>
    %207 = vector.broadcast %205 : vector<1x1x1x16xf32> to vector<2x6x6x16xf32>
    %208 = arith.mulf %206, %207 : vector<2x6x6x16xf32>
    %209 = arith.addf %201, %208 : vector<2x6x6x16xf32>
    %210 = vector.extract_strided_slice %202 {offsets = [0, 0, 0, 1], sizes = [2, 6, 6, 1], strides = [1, 1, 1, 1]} : vector<2x6x6x4xf32> to vector<2x6x6x1xf32>
    %c29 = arith.constant 29 : index
    %c0_61 = arith.constant 0 : index
    %211 = vector.load %arg1[%c29, %c0_61] : memref<36x16xf32, #tpu.memory_space<vmem>>, vector<1x16xf32>
    %212 = vector.shape_cast %211 : vector<1x16xf32> to vector<1x1x1x16xf32>
    %213 = vector.broadcast %210 : vector<2x6x6x1xf32> to vector<2x6x6x16xf32>
    %214 = vector.broadcast %212 : vector<1x1x1x16xf32> to vector<2x6x6x16xf32>
    %215 = arith.mulf %213, %214 : vector<2x6x6x16xf32>
    %216 = arith.addf %209, %215 : vector<2x6x6x16xf32>
    %217 = vector.extract_strided_slice %202 {offsets = [0, 0, 0, 2], sizes = [2, 6, 6, 1], strides = [1, 1, 1, 1]} : vector<2x6x6x4xf32> to vector<2x6x6x1xf32>
    %c30 = arith.constant 30 : index
    %c0_62 = arith.constant 0 : index
    %218 = vector.load %arg1[%c30, %c0_62] : memref<36x16xf32, #tpu.memory_space<vmem>>, vector<1x16xf32>
    %219 = vector.shape_cast %218 : vector<1x16xf32> to vector<1x1x1x16xf32>
    %220 = vector.broadcast %217 : vector<2x6x6x1xf32> to vector<2x6x6x16xf32>
    %221 = vector.broadcast %219 : vector<1x1x1x16xf32> to vector<2x6x6x16xf32>
    %222 = arith.mulf %220, %221 : vector<2x6x6x16xf32>
    %223 = arith.addf %216, %222 : vector<2x6x6x16xf32>
    %224 = vector.extract_strided_slice %202 {offsets = [0, 0, 0, 3], sizes = [2, 6, 6, 1], strides = [1, 1, 1, 1]} : vector<2x6x6x4xf32> to vector<2x6x6x1xf32>
    %c31 = arith.constant 31 : index
    %c0_63 = arith.constant 0 : index
    %225 = vector.load %arg1[%c31, %c0_63] : memref<36x16xf32, #tpu.memory_space<vmem>>, vector<1x16xf32>
    %226 = vector.shape_cast %225 : vector<1x16xf32> to vector<1x1x1x16xf32>
    %227 = vector.broadcast %224 : vector<2x6x6x1xf32> to vector<2x6x6x16xf32>
    %228 = vector.broadcast %226 : vector<1x1x1x16xf32> to vector<2x6x6x16xf32>
    %229 = arith.mulf %227, %228 : vector<2x6x6x16xf32>
    %230 = arith.addf %223, %229 : vector<2x6x6x16xf32>
    %c0_64 = arith.constant 0 : index
    %c2_65 = arith.constant 2 : index
    %c2_66 = arith.constant 2 : index
    %c0_67 = arith.constant 0 : index
    %231 = vector.load %arg0[%c0_64, %c2_65, %c2_66, %c0_67] : memref<2x8x8x4xf32, #tpu.memory_space<vmem>>, vector<2x6x6x4xf32>
    %232 = vector.extract_strided_slice %231 {offsets = [0, 0, 0, 0], sizes = [2, 6, 6, 1], strides = [1, 1, 1, 1]} : vector<2x6x6x4xf32> to vector<2x6x6x1xf32>
    %c32 = arith.constant 32 : index
    %c0_68 = arith.constant 0 : index
    %233 = vector.load %arg1[%c32, %c0_68] : memref<36x16xf32, #tpu.memory_space<vmem>>, vector<1x16xf32>
    %234 = vector.shape_cast %233 : vector<1x16xf32> to vector<1x1x1x16xf32>
    %235 = vector.broadcast %232 : vector<2x6x6x1xf32> to vector<2x6x6x16xf32>
    %236 = vector.broadcast %234 : vector<1x1x1x16xf32> to vector<2x6x6x16xf32>
    %237 = arith.mulf %235, %236 : vector<2x6x6x16xf32>
    %238 = arith.addf %230, %237 : vector<2x6x6x16xf32>
    %239 = vector.extract_strided_slice %231 {offsets = [0, 0, 0, 1], sizes = [2, 6, 6, 1], strides = [1, 1, 1, 1]} : vector<2x6x6x4xf32> to vector<2x6x6x1xf32>
    %c33 = arith.constant 33 : index
    %c0_69 = arith.constant 0 : index
    %240 = vector.load %arg1[%c33, %c0_69] : memref<36x16xf32, #tpu.memory_space<vmem>>, vector<1x16xf32>
    %241 = vector.shape_cast %240 : vector<1x16xf32> to vector<1x1x1x16xf32>
    %242 = vector.broadcast %239 : vector<2x6x6x1xf32> to vector<2x6x6x16xf32>
    %243 = vector.broadcast %241 : vector<1x1x1x16xf32> to vector<2x6x6x16xf32>
    %244 = arith.mulf %242, %243 : vector<2x6x6x16xf32>
    %245 = arith.addf %238, %244 : vector<2x6x6x16xf32>
    %246 = vector.extract_strided_slice %231 {offsets = [0, 0, 0, 2], sizes = [2, 6, 6, 1], strides = [1, 1, 1, 1]} : vector<2x6x6x4xf32> to vector<2x6x6x1xf32>
    %c34 = arith.constant 34 : index
    %c0_70 = arith.constant 0 : index
    %247 = vector.load %arg1[%c34, %c0_70] : memref<36x16xf32, #tpu.memory_space<vmem>>, vector<1x16xf32>
    %248 = vector.shape_cast %247 : vector<1x16xf32> to vector<1x1x1x16xf32>
    %249 = vector.broadcast %246 : vector<2x6x6x1xf32> to vector<2x6x6x16xf32>
    %250 = vector.broadcast %248 : vector<1x1x1x16xf32> to vector<2x6x6x16xf32>
    %251 = arith.mulf %249, %250 : vector<2x6x6x16xf32>
    %252 = arith.addf %245, %251 : vector<2x6x6x16xf32>
    %253 = vector.extract_strided_slice %231 {offsets = [0, 0, 0, 3], sizes = [2, 6, 6, 1], strides = [1, 1, 1, 1]} : vector<2x6x6x4xf32> to vector<2x6x6x1xf32>
    %c35 = arith.constant 35 : index
    %c0_71 = arith.constant 0 : index
    %254 = vector.load %arg1[%c35, %c0_71] : memref<36x16xf32, #tpu.memory_space<vmem>>, vector<1x16xf32>
    %255 = vector.shape_cast %254 : vector<1x16xf32> to vector<1x1x1x16xf32>
    %256 = vector.broadcast %253 : vector<2x6x6x1xf32> to vector<2x6x6x16xf32>
    %257 = vector.broadcast %255 : vector<1x1x1x16xf32> to vector<2x6x6x16xf32>
    %258 = arith.mulf %256, %257 : vector<2x6x6x16xf32>
    %259 = arith.addf %252, %258 : vector<2x6x6x16xf32>
    %c0_72 = arith.constant 0 : index
    %c0_73 = arith.constant 0 : index
    %c0_74 = arith.constant 0 : index
    %c0_75 = arith.constant 0 : index
    %260 = vector.load %arg2[%c0_72, %c0_73, %c0_74, %c0_75] : memref<2x6x6x16xf32, #tpu.memory_space<vmem>>, vector<2x6x6x16xf32>
    tpu.vector_store %arg2[%c0_72, %c0_73, %c0_74, %c0_75], %259 {strides = array<i32>} : memref<2x6x6x16xf32, #tpu.memory_space<vmem>>, vector<2x6x6x16xf32>,
    return
  }
}

</mosaic_0001>

<bundles_post_ra>
// kernel: make_kernel.1
= control target key start
LH: loop header
LB: loop body
LE: loop exit
PB: predicated region body
PF: predicated region fallthrough
CT: control target
= control target key end

     0   :  { %v6408_v0 = vmov 0   ;;  %v6412_v14 = vmov 1   ;;  %v6414_v21 = vmov 2   ;;  %v6410_v30 = vmov 3   ;;  %s6405_s0 = inlined_call_operand.vmem [shape: f32[2,8,8,4], index: 0, kind: input, shape index: {}]   ;;  %s6406_s1 = inlined_call_operand.vmem [shape: f32[36,16], index: 1, kind: input, shape index: {}]   ;;  %s6407_s2 = inlined_call_operand.vmem [shape: f32[2,6,6,16], index: 2, kind: output, shape index: {}]  }
   0x1   :  { %3119 = vset.pattern.permute.xlu1 %v6408_v0  ;;  %3118 = vset.pattern.permute.xlu0 %v6408_v0  ;;  %v3238_v1 = vld [vmem:[%s6405_s0 + $0x10] sm:$0x3f]  ;;  %v3243_v2 = vld [vmem:[%s6405_s0] sm:$0x3f]  ;;  %v3250_v3 = vld [vmem:[%s6405_s0 + $0x18] sm:$0x3f] }
   0x2   :  { %36 = vperm.xlu1 %3119, %v3238_v1   ;;  %26 = vperm.xlu0 %3118, %v3243_v2   ;;  %v3255_v4 = vld [vmem:[%s6405_s0 + $0x8] sm:$0x3f]  ;;  %v3267_v6 = vld [vmem:[%s6405_s0 + $0x20] sm:$0x3f]  ;;  %v3286_v9 = vld [vmem:[%s6405_s0 + $0x58] sm:$0x3f] }
   0x3   :  { %v3262_v5 = vld [vmem:[%s6405_s0 + $0x28] sm:$0x3f]  ;;  %v3279_v8 = vld [vmem:[%s6405_s0 + $0x40] sm:$0x3f]  ;;  %v3291_v10 = vld [vmem:[%s6405_s0 + $0x50] sm:$0x3f] }
   0x4   :  { %v3274_v7 = vld [vmem:[%s6405_s0 + $0x48] sm:$0x3f]  ;;  %v3303_v12 = vld [vmem:[%s6405_s0 + $0x60] sm:$0x3f]  ;;  %v3332_v17 = vld [vmem:[%s6405_s0 + $0x51] sm:$0x3f] }
   0x5   :  { %v3298_v11 = vld [vmem:[%s6405_s0 + $0x68] sm:$0x3f]  ;;  %v3318_v15 = vld [vmem:[%s6405_s0 + $0x21] sm:$0x3f]  ;;  %v3367_v23 = vld [vmem:[%s6405_s0 + $0x52] sm:$0x3f] }
   0x6   :  { %41 = vperm.xlu1 %3119, %v3250_v3   ;;  %31 = vperm.xlu0 %3118, %v3255_v4   ;;  %v3310_v13 = vld [vmem:[%s6405_s0 + $0x9] sm:$0x3f]  ;;  %v3325_v16 = vld [vmem:[%s6405_s0 + $0x41] sm:$0x3f]  ;;  %v3381_v25 = vld [vmem:[%s6405_s0 + $0x10] sm:$0x3f] }
   0x7   :  { %v3339_v18 = vld [vmem:[%s6405_s0 + $0x61] sm:$0x3f]  ;;  %v3346_v19 = vld [vmem:[%s6405_s0 + $0xa] sm:$0x3f]  ;;  %v3402_v28 = vld [vmem:[%s6405_s0 + $0x58] sm:$0x3f] }
   0x8   :  { %v3353_v20 = vld [vmem:[%s6405_s0 + $0x22] sm:$0x3f]  ;;  %v3388_v26 = vld [vmem:[%s6405_s0 + $0x28] sm:$0x3f]  ;;  %v3417_v31 = vld [vmem:[%s6405_s0 + $0x11] sm:$0x3f] }
   0x9   :  { %v3360_v22 = vld [vmem:[%s6405_s0 + $0x42] sm:$0x3f]  ;;  %v3395_v27 = vld [vmem:[%s6405_s0 + $0x48] sm:$0x3f]  ;;  %v3438_v34 = vld [vmem:[%s6405_s0 + $0x59] sm:$0x3f] }
   0xa   :  { %51 = vperm.xlu1 %3119, %v3262_v5   ;;  %46 = vperm.xlu0 %3118, %v3267_v6   ;;  %v3374_v24 = vld [vmem:[%s6405_s0 + $0x62] sm:$0x3f]  ;;  %v3409_v29 = vld [vmem:[%s6405_s0 + $0x68] sm:$0x3f]  ;;  %v3457_v37 = vld [vmem:[%s6405_s0 + $0x12] sm:$0x3f] }
   0xb   :  { %v3424_v32 = vld [vmem:[%s6405_s0 + $0x29] sm:$0x3f]  ;;  %v3452_v36 = vld [vmem:[%s6405_s0 + $0x1] sm:$0x3f]  ;;  %v3465_v38 = vld [vmem:[%s6405_s0 + $0x11] sm:$0x3f] }
   0xc   :  { %v3431_v33 = vld [vmem:[%s6405_s0 + $0x49] sm:$0x3f]  ;;  %v3477_v40 = vld [vmem:[%s6405_s0 + $0x19] sm:$0x3f]  ;;  %v3530_v49 = vld [vmem:[%s6405_s0 + $0x30] sm:$0x3f] }
   0xd   :  { %v3445_v35 = vld [vmem:[%s6405_s0 + $0x69] sm:$0x3f]  ;;  %v3494_v43 = vld [vmem:[%s6405_s0 + $0x5a] sm:$0x3f]  ;;  %v3541_v52 = vld [vmem:[%s6405_s0 + $0x50] sm:$0x3f] }
   0xe   :  { %61 = vperm.xlu1 %3119, %v3274_v7   ;;  %56 = vperm.xlu0 %3118, %v3279_v8   ;;  %v3470_v39 = vld [vmem:[%s6405_s0 + $0x2a] sm:$0x3f]  ;;  %v3513_v46 = vld [vmem:[%s6405_s0 + $0x59] sm:$0x3f]  ;;  %v3553_v55 = vld [vmem:[%s6405_s0 + $0x60] sm:$0x3f] }
   0xf   :  { %v3482_v41 = vld [vmem:[%s6405_s0 + $0x4a] sm:$0x3f]  ;;  %v3518_v47 = vld [vmem:[%s6405_s0 + $0x18] sm:$0x3f]  ;;  %v3564_v58 = vld [vmem:[%s6405_s0 + $0x70] sm:$0x3f] }
  0x10   :  { %v3489_v42 = vld [vmem:[%s6405_s0 + $0x29] sm:$0x3f]  ;;  %v3575_v61 = vld [vmem:[%s6405_s0 + $0x19] sm:$0x3f]  ;;  %vm2989_vm0 = vcmask 128000  }
  0x11   :  { %v3501_v44 = vld [vmem:[%s6405_s0 + $0x49] sm:$0x3f] }
  0x12   :  { %71 = vperm.xlu1 %3119, %v3286_v9   ;;  %66 = vperm.xlu0 %3118, %v3291_v10   ;;  %v3506_v45 = vld [vmem:[%s6405_s0 + $0x6a] sm:$0x3f] }
  0x13   :  { %v3525_v48 = vld [vmem:[%s6405_s0 + $0x69] sm:$0x3f] }
  0x16   :  { %81 = vperm.xlu1 %3119, %v3298_v11   ;;  %76 = vperm.xlu0 %3118, %v3303_v12  }
  0x1a   :  { %3120 = vset.pattern.permute.xlu1 %v6412_v14  ;;  %351 = vperm.xlu0 %3118, %v3310_v13  }
  0x1b   :  { %106 = vperm.xlu1 %3120, %v3255_v4  }
  0x1e   :  { %366 = vperm.xlu0 %3118, %v3318_v15  }
  0x1f   :  { %110 = vperm.xlu1 %3120, %v3238_v1  }
  0x22   :  { %376 = vperm.xlu0 %3118, %v3325_v16  }
  0x23   :  { %118 = vperm.xlu1 %3120, %v3267_v6  }
  0x26   :  { %386 = vperm.xlu0 %3118, %v3332_v17  }
  0x27   :  { %126 = vperm.xlu1 %3120, %v3279_v8  }
  0x2a   :  { %396 = vperm.xlu0 %3118, %v3339_v18  }
  0x2b   :  { %134 = vperm.xlu1 %3120, %v3291_v10  }
  0x2e   :  { %683 = vperm.xlu0 %3118, %v3346_v19  }
  0x2f   :  { %142 = vperm.xlu1 %3120, %v3303_v12  }
  0x32   :  { %698 = vperm.xlu0 %3118, %v3353_v20  }
  0x33   :  { %3121 = vset.pattern.permute.xlu1 %v6414_v21 }
  0x34   :  { %179 = vperm.xlu1 %3121, %v3243_v2  }
  0x36   :  { %708 = vperm.xlu0 %3118, %v3360_v22  }
  0x38   :  { %187 = vperm.xlu1 %3121, %v3238_v1  }
  0x3a   :  { %718 = vperm.xlu0 %3118, %v3367_v23  }
  0x3c   :  { %191 = vperm.xlu1 %3121, %v3250_v3  }
  0x3e   :  { %728 = vperm.xlu0 %3118, %v3374_v24  }
  0x40   :  { %199 = vperm.xlu1 %3121, %v3262_v5  }
  0x42   :  { %1016 = vperm.xlu0 %3118, %v3381_v25  }
  0x44   :  { %207 = vperm.xlu1 %3121, %v3274_v7  }
  0x46   :  { %1031 = vperm.xlu0 %3118, %v3388_v26  }
  0x48   :  { %215 = vperm.xlu1 %3121, %v3286_v9  }
  0x4a   :  { %1041 = vperm.xlu0 %3118, %v3395_v27  }
  0x4c   :  { %223 = vperm.xlu1 %3121, %v3298_v11  }
  0x4e   :  { %1051 = vperm.xlu0 %3118, %v3402_v28  }
  0x50   :  { %3122 = vset.pattern.permute.xlu1 %v6410_v30 }
  0x51   :  { %260 = vperm.xlu1 %3122, %v3255_v4  }
  0x52   :  { %1061 = vperm.xlu0 %3118, %v3409_v29  }
  0x55   :  { %264 = vperm.xlu1 %3122, %v3238_v1   ;;  %v3586_v1 = vld [vmem:[%s6405_s0 + $0x31] sm:$0x3f] }
  0x56   :  { %1348 = vperm.xlu0 %3118, %v3417_v31  }
  0x59   :  { %272 = vperm.xlu1 %3122, %v3267_v6  }
  0x5a   :  { %1363 = vperm.xlu0 %3118, %v3424_v32  }
  0x5d   :  { %280 = vperm.xlu1 %3122, %v3279_v8  }
  0x5e   :  { %1373 = vperm.xlu0 %3118, %v3431_v33  }
  0x61   :  { %288 = vperm.xlu1 %3122, %v3291_v10  }
  0x62   :  { %1383 = vperm.xlu0 %3118, %v3438_v34  }
  0x65   :  { %296 = vperm.xlu1 %3122, %v3303_v12  }
  0x66   :  { %1393 = vperm.xlu0 %3118, %v3445_v35  }
  0x69   :  { %3123 = vset.pattern.permute.xlu1 %v6408_v0 }
  0x6a   :  { %346 = vperm.xlu1 %3123, %v3452_v36   ;;  %1680 = vperm.xlu0 %3118, %v3457_v37  }
  0x6e   :  { %356 = vperm.xlu1 %3123, %v3465_v38   ;;  %1695 = vperm.xlu0 %3118, %v3470_v39  }
  0x72   :  { %361 = vperm.xlu1 %3123, %v3477_v40   ;;  %1705 = vperm.xlu0 %3118, %v3482_v41  }
  0x76   :  { %371 = vperm.xlu1 %3123, %v3489_v42   ;;  %1715 = vperm.xlu0 %3118, %v3494_v43  }
  0x7a   :  { %381 = vperm.xlu1 %3123, %v3501_v44   ;;  %1725 = vperm.xlu0 %3118, %v3506_v45  }
  0x7e   :  { %391 = vperm.xlu1 %3123, %v3513_v46   ;;  %2013 = vperm.xlu0 %3118, %v3518_v47  }
  0x81   :  { %v3532_v50 = vpop.permute.xlu1 %36  ;;  %v3534_v51 = vpop.permute.xlu0 %26 }
  0x82   :  { %6475 = vst [vmem:[#allocation2_spill] sm:$0xff] %v3532_v50  ;;  %6476 = vst [vmem:[#allocation3_spill] sm:$0xff] %v3534_v51  ;;  %401 = vperm.xlu1 %3123, %v3525_v48   ;;  %2028 = vperm.xlu0 %3118, %v3530_v49   ;;  %v6493_v50 = vmov 2   ;;  %v6513_v51 = vmov 1  }
  0x85   :  { %v3543_v53 = vpop.permute.xlu1 %41  ;;  %v3545_v54 = vpop.permute.xlu0 %31 }
  0x86   :  { %6477 = vst [vmem:[#allocation4_spill] sm:$0xff] %v3543_v53  ;;  %6478 = vst [vmem:[#allocation5_spill] sm:$0xff] %v3545_v54  ;;  %3124 = vset.pattern.permute.xlu1 %v6412_v14  ;;  %2038 = vperm.xlu0 %3118, %v3541_v52   ;;  %v3597_v14 = vld [vmem:[%s6405_s0 + $0x51] sm:$0x3f] }
  0x87   :  { %438 = vperm.xlu1 %3124, %v3310_v13   ;;  %6487 = vst [vmem:[#allocation14_spill] sm:$0xff] %v3597_v14 }
  0x89   :  { %v3555_v56 = vpop.permute.xlu1 %51  ;;  %v3557_v57 = vpop.permute.xlu0 %46 }
  0x8a   :  { %6479 = vst [vmem:[#allocation6_spill] sm:$0xff] %v3555_v56  ;;  %6480 = vst [vmem:[#allocation7_spill] sm:$0xff] %v3557_v57  ;;  %2048 = vperm.xlu0 %3118, %v3553_v55  }
  0x8b   :  { %442 = vperm.xlu1 %3124, %v3465_v38  }
  0x8d   :  { %v3566_v59 = vpop.permute.xlu1 %61  ;;  %v3568_v60 = vpop.permute.xlu0 %56 }
  0x8e   :  { %6481 = vst [vmem:[#allocation8_spill] sm:$0xff] %v3566_v59  ;;  %6482 = vst [vmem:[#allocation9_spill] sm:$0xff] %v3568_v60  ;;  %2058 = vperm.xlu0 %3118, %v3564_v58  }
  0x8f   :  { %450 = vperm.xlu1 %3124, %v3318_v15  }
  0x91   :  { %v3577_v62 = vpop.permute.xlu1 %71  ;;  %v3579_v63 = vpop.permute.xlu0 %66 }
  0x92   :  { %6483 = vst [vmem:[#allocation10_spill] sm:$0xff] %v3577_v62  ;;  %6484 = vst [vmem:[#allocation11_spill] sm:$0xff] %v3579_v63  ;;  %2345 = vperm.xlu0 %3118, %v3575_v61  }
  0x93   :  { %458 = vperm.xlu1 %3124, %v3325_v16  }
  0x95   :  { %v3588_v0 = vpop.permute.xlu1 %81  ;;  %v3590_v30 = vpop.permute.xlu0 %76 }
  0x96   :  { %6485 = vst [vmem:[#allocation12_spill] sm:$0xff] %v3588_v0  ;;  %6486 = vst [vmem:[#allocation13_spill] sm:$0xff] %v3590_v30  ;;  %2360 = vperm.xlu0 %3118, %v3586_v1   ;;  %v3608_v30 = vld [vmem:[%s6405_s0 + $0x61] sm:$0x3f] }
  0x97   :  { %466 = vperm.xlu1 %3124, %v3332_v17   ;;  %6490 = vst [vmem:[#allocation17_spill] sm:$0xff] %v3608_v30 }
  0x99   :  { %v3599_v21 = vpop.permute.xlu0 %351 }
  0x9a   :  { %6488 = vst [vmem:[#allocation15_spill] sm:$0xff] %v3599_v21  ;;  %v3601_v63 = vpop.permute.xlu1 %106  ;;  %2370 = vperm.xlu0 %3118, %v3597_v14   ;;  %v3619_v21 = vld [vmem:[%s6405_s0 + $0x71] sm:$0x3f] }
  0x9b   :  { %6489 = vst [vmem:[#allocation16_spill] sm:$0xff] %v3601_v63  ;;  %474 = vperm.xlu1 %3124, %v3339_v18   ;;  %6494 = vst [vmem:[#allocation20_spill] sm:$0xff] %v3619_v21 }
  0x9d   :  { %v3610_v60 = vpop.permute.xlu0 %366 }
  0x9e   :  { %6491 = vst [vmem:[#allocation18_spill] sm:$0xff] %v3610_v60  ;;  %v3612_v57 = vpop.permute.xlu1 %110  ;;  %2380 = vperm.xlu0 %3118, %v3608_v30   ;;  %v3630_v60 = vld [vmem:[%s6405_s0 + $0x1a] sm:$0x3f] }
  0x9f   :  { %6492 = vst [vmem:[#allocation19_spill] sm:$0xff] %v3612_v57  ;;  %3125 = vset.pattern.permute.xlu1 %v6493_v50  ;;  %6497 = vst [vmem:[#allocation23_spill] sm:$0xff] %v3630_v60 }
  0xa0   :  { %511 = vperm.xlu1 %3125, %v3452_v36  }
  0xa1   :  { %v3622_v63 = vpop.permute.xlu0 %376 }
  0xa2   :  { %6495 = vst [vmem:[#allocation21_spill] sm:$0xff] %v3622_v63  ;;  %v3624_v54 = vpop.permute.xlu1 %118  ;;  %2390 = vperm.xlu0 %3118, %v3619_v21   ;;  %v3641_v63 = vld [vmem:[%s6405_s0 + $0x32] sm:$0x3f] }
  0xa3   :  { %6496 = vst [vmem:[#allocation22_spill] sm:$0xff] %v3624_v54  ;;  %6500 = vst [vmem:[#allocation26_spill] sm:$0xff] %v3641_v63 }
  0xa4   :  { %519 = vperm.xlu1 %3125, %v3465_v38  }
  0xa5   :  { %v3633_v57 = vpop.permute.xlu0 %386 }
  0xa6   :  { %6498 = vst [vmem:[#allocation24_spill] sm:$0xff] %v3633_v57  ;;  %v3635_v62 = vpop.permute.xlu1 %126  ;;  %2677 = vperm.xlu0 %3118, %v3630_v60   ;;  %v3652_v57 = vld [vmem:[%s6405_s0 + $0x52] sm:$0x3f] }
  0xa7   :  { %6499 = vst [vmem:[#allocation25_spill] sm:$0xff] %v3635_v62  ;;  %6503 = vst [vmem:[#allocation29_spill] sm:$0xff] %v3652_v57 }
  0xa8   :  { %523 = vperm.xlu1 %3125, %v3477_v40  }
  0xa9   :  { %v3644_v54 = vpop.permute.xlu0 %396 }
  0xaa   :  { %6501 = vst [vmem:[#allocation27_spill] sm:$0xff] %v3644_v54  ;;  %v3646_v59 = vpop.permute.xlu1 %134  ;;  %2692 = vperm.xlu0 %3118, %v3641_v63   ;;  %v3663_v54 = vld [vmem:[%s6405_s0 + $0x62] sm:$0x3f] }
  0xab   :  { %6502 = vst [vmem:[#allocation28_spill] sm:$0xff] %v3646_v59  ;;  %6506 = vst [vmem:[#allocation32_spill] sm:$0xff] %v3663_v54 }
  0xac   :  { %531 = vperm.xlu1 %3125, %v3489_v42  }
  0xad   :  { %v3655_v62 = vpop.permute.xlu0 %683 }
  0xae   :  { %6504 = vst [vmem:[#allocation30_spill] sm:$0xff] %v3655_v62  ;;  %v3657_v0 = vpop.permute.xlu1 %142  ;;  %2702 = vperm.xlu0 %3118, %v3652_v57   ;;  %v3674_v62 = vld [vmem:[%s6405_s0 + $0x72] sm:$0x3f] }
  0xaf   :  { %6505 = vst [vmem:[#allocation31_spill] sm:$0xff] %v3657_v0  ;;  %6509 = vst [vmem:[#allocation35_spill] sm:$0xff] %v3674_v62 }
  0xb0   :  { %539 = vperm.xlu1 %3125, %v3501_v44  }
  0xb1   :  { %v3666_v59 = vpop.permute.xlu0 %698 }
  0xb2   :  { %6507 = vst [vmem:[#allocation33_spill] sm:$0xff] %v3666_v59  ;;  %2712 = vperm.xlu0 %3118, %v3663_v54   ;;  %v6515_v54 = vmov 3  }
  0xb3   :  { %v3669_v56 = vpop.permute.xlu1 %179 }
  0xb4   :  { %6508 = vst [vmem:[#allocation34_spill] sm:$0xff] %v3669_v56  ;;  %547 = vperm.xlu1 %3125, %v3513_v46  }
  0xb5   :  { %v3677_v0 = vpop.permute.xlu0 %708 }
  0xb6   :  { %6510 = vst [vmem:[#allocation36_spill] sm:$0xff] %v3677_v0  ;;  %2722 = vperm.xlu0 %3118, %v3674_v62  }
  0xb7   :  { %v3680_v53 = vpop.permute.xlu1 %187 }
  0xb8   :  { %6511 = vst [vmem:[#allocation37_spill] sm:$0xff] %v3680_v53  ;;  %555 = vperm.xlu1 %3125, %v3525_v48  }
  0xb9   :  { %v3683_v59 = vpop.permute.xlu0 %718 }
  0xba   :  { %6512 = vst [vmem:[#allocation38_spill] sm:$0xff] %v3683_v59  ;;  %3152 = vset.pattern.permute.xlu0 %v6513_v51 }
  0xbb   :  { %v3686_v56 = vpop.permute.xlu1 %191  ;;  %102 = vperm.xlu0 %3152, %v3243_v2  }
  0xbc   :  { %6514 = vst [vmem:[#allocation39_spill] sm:$0xff] %v3686_v56  ;;  %3126 = vset.pattern.permute.xlu1 %v6515_v54 }
  0xbd   :  { %592 = vperm.xlu1 %3126, %v3310_v13   ;;  %v3691_v57 = vpop.permute.xlu0 %728 }
  0xbe   :  { %6516 = vst [vmem:[#allocation40_spill] sm:$0xff] %v3691_v57 }
  0xbf   :  { %v3693_v0 = vpop.permute.xlu1 %199  ;;  %114 = vperm.xlu0 %3152, %v3250_v3  }
  0xc0   :  { %6517 = vst [vmem:[#allocation41_spill] sm:$0xff] %v3693_v0 }
  0xc1   :  { %596 = vperm.xlu1 %3126, %v3465_v38   ;;  %v3697_v53 = vpop.permute.xlu0 %1016 }
  0xc2   :  { %6518 = vst [vmem:[#allocation42_spill] sm:$0xff] %v3697_v53 }
  0xc3   :  { %v3699_v59 = vpop.permute.xlu1 %207  ;;  %122 = vperm.xlu0 %3152, %v3262_v5  }
  0xc4   :  { %6519 = vst [vmem:[#allocation43_spill] sm:$0xff] %v3699_v59 }
  0xc5   :  { %604 = vperm.xlu1 %3126, %v3318_v15   ;;  %v3703_v2 = vpop.permute.xlu0 %1031 }
  0xc6   :  { %6520 = vst [vmem:[#allocation44_spill] sm:$0xff] %v3703_v2 }
  0xc7   :  { %v3705_v56 = vpop.permute.xlu1 %215  ;;  %130 = vperm.xlu0 %3152, %v3274_v7   ;;  %v3727_v7 = vld [vmem:[%s6405_s0 + $0x2] sm:$0x3f] }
  0xc8   :  { %6521 = vst [vmem:[#allocation45_spill] sm:$0xff] %v3705_v56  ;;  %6527 = vst [vmem:[#allocation51_spill] sm:$0xff] %v3727_v7 }
  0xc9   :  { %612 = vperm.xlu1 %3126, %v3325_v16   ;;  %v3709_v57 = vpop.permute.xlu0 %1041 }
  0xca   :  { %6522 = vst [vmem:[#allocation46_spill] sm:$0xff] %v3709_v57  ;;  %v6529_v57 = vmov 0  }
  0xcb   :  { %v3711_v3 = vpop.permute.xlu1 %223  ;;  %138 = vperm.xlu0 %3152, %v3286_v9  }
  0xcc   :  { %6523 = vst [vmem:[#allocation47_spill] sm:$0xff] %v3711_v3 }
  0xcd   :  { %620 = vperm.xlu1 %3126, %v3332_v17   ;;  %v3715_v38 = vpop.permute.xlu0 %1051 }
  0xce   :  { %6524 = vst [vmem:[#allocation48_spill] sm:$0xff] %v3715_v38 }
  0xcf   :  { %146 = vperm.xlu0 %3152, %v3298_v11   ;;  %v3739_v11 = vld [vmem:[%s6405_s0 + $0x12] sm:$0x3f] }
  0xd0   :  { %v3718_v5 = vpop.permute.xlu1 %260 }
  0xd1   :  { %6525 = vst [vmem:[#allocation49_spill] sm:$0xff] %v3718_v5  ;;  %628 = vperm.xlu1 %3126, %v3339_v18   ;;  %v3721_v2 = vpop.permute.xlu0 %1061 }
  0xd2   :  { %6526 = vst [vmem:[#allocation50_spill] sm:$0xff] %v3721_v2 }
  0xd3   :  { %434 = vperm.xlu0 %3152, %v3452_v36  }
  0xd4   :  { %v3729_v9 = vpop.permute.xlu1 %264 }
  0xd5   :  { %6528 = vst [vmem:[#allocation52_spill] sm:$0xff] %v3729_v9  ;;  %3127 = vset.pattern.permute.xlu1 %v6529_v57  ;;  %v3732_v38 = vpop.permute.xlu0 %1348 }
  0xd6   :  { %6530 = vst [vmem:[#allocation53_spill] sm:$0xff] %v3732_v38  ;;  %678 = vperm.xlu1 %3127, %v3727_v7   ;;  %v3750_v38 = vld [vmem:[%s6405_s0 + $0x1a] sm:$0x3f] }
  0xd7   :  { %446 = vperm.xlu0 %3152, %v3477_v40   ;;  %6533 = vst [vmem:[#allocation56_spill] sm:$0xff] %v3750_v38 }
  0xd8   :  { %v3741_v36 = vpop.permute.xlu1 %272 }
  0xd9   :  { %6531 = vst [vmem:[#allocation54_spill] sm:$0xff] %v3741_v36  ;;  %v3743_v2 = vpop.permute.xlu0 %1363 }
  0xda   :  { %6532 = vst [vmem:[#allocation55_spill] sm:$0xff] %v3743_v2  ;;  %688 = vperm.xlu1 %3127, %v3739_v11   ;;  %v3761_v2 = vld [vmem:[%s6405_s0 + $0x2a] sm:$0x3f] }
  0xdb   :  { %454 = vperm.xlu0 %3152, %v3489_v42   ;;  %6536 = vst [vmem:[#allocation59_spill] sm:$0xff] %v3761_v2 }
  0xdc   :  { %v3752_v5 = vpop.permute.xlu1 %280 }
  0xdd   :  { %6534 = vst [vmem:[#allocation57_spill] sm:$0xff] %v3752_v5  ;;  %v3754_v40 = vpop.permute.xlu0 %1373 }
  0xde   :  { %6535 = vst [vmem:[#allocation58_spill] sm:$0xff] %v3754_v40  ;;  %693 = vperm.xlu1 %3127, %v3750_v38   ;;  %v3772_v40 = vld [vmem:[%s6405_s0 + $0x4a] sm:$0x3f] }
  0xdf   :  { %462 = vperm.xlu0 %3152, %v3501_v44   ;;  %6539 = vst [vmem:[#allocation62_spill] sm:$0xff] %v3772_v40 }
  0xe0   :  { %v3763_v36 = vpop.permute.xlu1 %288 }
  0xe1   :  { %6537 = vst [vmem:[#allocation60_spill] sm:$0xff] %v3763_v36  ;;  %v3765_v42 = vpop.permute.xlu0 %1383 }
  0xe2   :  { %6538 = vst [vmem:[#allocation61_spill] sm:$0xff] %v3765_v42  ;;  %703 = vperm.xlu1 %3127, %v3761_v2   ;;  %v3783_v42 = vld [vmem:[%s6405_s0 + $0x5a] sm:$0x3f] }
  0xe3   :  { %470 = vperm.xlu0 %3152, %v3513_v46   ;;  %6542 = vst [vmem:[#allocation65_spill] sm:$0xff] %v3783_v42 }
  0xe4   :  { %v3774_v5 = vpop.permute.xlu1 %296 }
  0xe5   :  { %6540 = vst [vmem:[#allocation63_spill] sm:$0xff] %v3774_v5  ;;  %v3776_v44 = vpop.permute.xlu0 %1393 }
  0xe6   :  { %6541 = vst [vmem:[#allocation64_spill] sm:$0xff] %v3776_v44  ;;  %713 = vperm.xlu1 %3127, %v3772_v40   ;;  %v3794_v44 = vld [vmem:[%s6405_s0 + $0x6a] sm:$0x3f] }
  0xe7   :  { %478 = vperm.xlu0 %3152, %v3525_v48   ;;  %6545 = vst [vmem:[#allocation68_spill] sm:$0xff] %v3794_v44 }
  0xe9   :  { %v3785_v36 = vpop.permute.xlu1 %346  ;;  %v3787_v46 = vpop.permute.xlu0 %1680 }
  0xea   :  { %6543 = vst [vmem:[#allocation66_spill] sm:$0xff] %v3785_v36  ;;  %6544 = vst [vmem:[#allocation67_spill] sm:$0xff] %v3787_v46  ;;  %723 = vperm.xlu1 %3127, %v3783_v42  }
  0xeb   :  { %766 = vperm.xlu0 %3152, %v3727_v7  }
  0xed   :  { %v3796_v5 = vpop.permute.xlu1 %356  ;;  %v3798_v48 = vpop.permute.xlu0 %1695 }
  0xee   :  { %6546 = vst [vmem:[#allocation69_spill] sm:$0xff] %v3796_v5  ;;  %6547 = vst [vmem:[#allocation70_spill] sm:$0xff] %v3798_v48  ;;  %733 = vperm.xlu1 %3127, %v3794_v44  }
  0xef   :  { %778 = vperm.xlu0 %3152, %v3750_v38  }
  0xf1   :  { %v3802_v53 = vpop.permute.xlu1 %361  ;;  %v3804_v46 = vpop.permute.xlu0 %1705 }
  0xf2   :  { %6548 = vst [vmem:[#allocation71_spill] sm:$0xff] %v3802_v53  ;;  %6549 = vst [vmem:[#allocation72_spill] sm:$0xff] %v3804_v46  ;;  %3128 = vset.pattern.permute.xlu1 %v6513_v51 }
  0xf3   :  { %770 = vperm.xlu1 %3128, %v3346_v19   ;;  %786 = vperm.xlu0 %3152, %v3761_v2  }
  0xf5   :  { %v3809_v9 = vpop.permute.xlu1 %371  ;;  %v3811_v56 = vpop.permute.xlu0 %1715 }
  0xf6   :  { %6550 = vst [vmem:[#allocation73_spill] sm:$0xff] %v3809_v9  ;;  %6551 = vst [vmem:[#allocation74_spill] sm:$0xff] %v3811_v56  ;;  %v3830_v56 = vld [vmem:[%s6405_s0 + $0x8] sm:$0x3f] }
  0xf7   :  { %774 = vperm.xlu1 %3128, %v3739_v11   ;;  %794 = vperm.xlu0 %3152, %v3772_v40  }
  0xf9   :  { %v3815_v48 = vpop.permute.xlu1 %381  ;;  %v3817_v5 = vpop.permute.xlu0 %1725 }
  0xfa   :  { %6552 = vst [vmem:[#allocation75_spill] sm:$0xff] %v3815_v48  ;;  %6553 = vst [vmem:[#allocation76_spill] sm:$0xff] %v3817_v5 }
  0xfb   :  { %782 = vperm.xlu1 %3128, %v3353_v20   ;;  %802 = vperm.xlu0 %3152, %v3783_v42  }
  0xfd   :  { %v3821_v46 = vpop.permute.xlu1 %391  ;;  %v3823_v59 = vpop.permute.xlu0 %2013 }
  0xfe   :  { %6554 = vst [vmem:[#allocation77_spill] sm:$0xff] %v3821_v46  ;;  %6555 = vst [vmem:[#allocation78_spill] sm:$0xff] %v3823_v59  ;;  %v3841_v59 = vld [vmem:[%s6405_s0 + $0x20] sm:$0x3f] }
  0xff   :  { %790 = vperm.xlu1 %3128, %v3360_v22   ;;  %810 = vperm.xlu0 %3152, %v3794_v44  }
 0x101   :  { %v3832_v48 = vpop.permute.xlu1 %401  ;;  %v3834_v5 = vpop.permute.xlu0 %2028 }
 0x102   :  { %6556 = vst [vmem:[#allocation79_spill] sm:$0xff] %v3832_v48  ;;  %6557 = vst [vmem:[#allocation80_spill] sm:$0xff] %v3834_v5  ;;  %v3852_v5 = vld [vmem:[%s6405_s0 + $0x30] sm:$0x3f] }
 0x103   :  { %798 = vperm.xlu1 %3128, %v3367_v23   ;;  %1099 = vperm.xlu0 %3152, %v3830_v56  }
 0x105   :  { %v3843_v46 = vpop.permute.xlu0 %2038 }
 0x106   :  { %6558 = vst [vmem:[#allocation81_spill] sm:$0xff] %v3843_v46  ;;  %v3845_v9 = vpop.permute.xlu1 %438 }
 0x107   :  { %6559 = vst [vmem:[#allocation82_spill] sm:$0xff] %v3845_v9  ;;  %806 = vperm.xlu1 %3128, %v3374_v24   ;;  %1111 = vperm.xlu0 %3152, %v3841_v59   ;;  %v3864_v9 = vld [vmem:[%s6405_s0 + $0x50] sm:$0x3f] }
 0x108   :  { %6562 = vst [vmem:[#allocation85_spill] sm:$0xff] %v3864_v9 }
 0x109   :  { %v3854_v48 = vpop.permute.xlu0 %2048 }
 0x10a   :  { %6560 = vst [vmem:[#allocation83_spill] sm:$0xff] %v3854_v48  ;;  %v3856_v53 = vpop.permute.xlu1 %442  ;;  %v3875_v48 = vld [vmem:[%s6405_s0 + $0x60] sm:$0x3f] }
 0x10b   :  { %6561 = vst [vmem:[#allocation84_spill] sm:$0xff] %v3856_v53  ;;  %3129 = vset.pattern.permute.xlu1 %v6493_v50  ;;  %1119 = vperm.xlu0 %3152, %v3852_v5  }
 0x10c   :  { %843 = vperm.xlu1 %3129, %v3727_v7  }
 0x10d   :  { %v3866_v46 = vpop.permute.xlu0 %2058 }
 0x10e   :  { %6563 = vst [vmem:[#allocation86_spill] sm:$0xff] %v3866_v46  ;;  %v3868_v3 = vpop.permute.xlu1 %450  ;;  %v3886_v46 = vld [vmem:[%s6405_s0 + $0x70] sm:$0x3f] }
 0x10f   :  { %6564 = vst [vmem:[#allocation87_spill] sm:$0xff] %v3868_v3  ;;  %1127 = vperm.xlu0 %3152, %v3864_v9  }
 0x110   :  { %851 = vperm.xlu1 %3129, %v3739_v11  }
 0x111   :  { %v3877_v53 = vpop.permute.xlu0 %2345 }
 0x112   :  { %6565 = vst [vmem:[#allocation88_spill] sm:$0xff] %v3877_v53  ;;  %v3879_v0 = vpop.permute.xlu1 %458  ;;  %v3897_v53 = vld [vmem:[%s6405_s0 + $0x9] sm:$0x3f] }
 0x113   :  { %6566 = vst [vmem:[#allocation89_spill] sm:$0xff] %v3879_v0  ;;  %1135 = vperm.xlu0 %3152, %v3875_v48  }
 0x114   :  { %855 = vperm.xlu1 %3129, %v3750_v38  }
 0x115   :  { %v3888_v3 = vpop.permute.xlu0 %2360 }
 0x116   :  { %6567 = vst [vmem:[#allocation90_spill] sm:$0xff] %v3888_v3  ;;  %v3890_v36 = vpop.permute.xlu1 %466  ;;  %v3908_v3 = vld [vmem:[%s6405_s0 + $0x21] sm:$0x3f] }
 0x117   :  { %6568 = vst [vmem:[#allocation91_spill] sm:$0xff] %v3890_v36  ;;  %1143 = vperm.xlu0 %3152, %v3886_v46  }
 0x118   :  { %863 = vperm.xlu1 %3129, %v3761_v2  }
 0x119   :  { %v3899_v0 = vpop.permute.xlu0 %2370 }
 0x11a   :  { %6569 = vst [vmem:[#allocation92_spill] sm:$0xff] %v3899_v0  ;;  %v3901_v38 = vpop.permute.xlu1 %474  ;;  %v3919_v0 = vld [vmem:[%s6405_s0 + $0x31] sm:$0x3f] }
 0x11b   :  { %6570 = vst [vmem:[#allocation93_spill] sm:$0xff] %v3901_v38  ;;  %1431 = vperm.xlu0 %3152, %v3897_v53  }
 0x11c   :  { %871 = vperm.xlu1 %3129, %v3772_v40  }
 0x11d   :  { %v3910_v36 = vpop.permute.xlu0 %2380 }
 0x11e   :  { %6571 = vst [vmem:[#allocation94_spill] sm:$0xff] %v3910_v36  ;;  %v3930_v36 = vld [vmem:[%s6405_s0 + $0x51] sm:$0x3f] }
 0x11f   :  { %v3912_v2 = vpop.permute.xlu1 %511  ;;  %1443 = vperm.xlu0 %3152, %v3908_v3  }
 0x120   :  { %6572 = vst [vmem:[#allocation95_spill] sm:$0xff] %v3912_v2  ;;  %879 = vperm.xlu1 %3129, %v3783_v42  }
 0x121   :  { %v3921_v38 = vpop.permute.xlu0 %2390 }
 0x122   :  { %6573 = vst [vmem:[#allocation96_spill] sm:$0xff] %v3921_v38  ;;  %v3941_v38 = vld [vmem:[%s6405_s0 + $0x61] sm:$0x3f] }
 0x123   :  { %v3923_v40 = vpop.permute.xlu1 %519  ;;  %1451 = vperm.xlu0 %3152, %v3919_v0  }
 0x124   :  { %6574 = vst [vmem:[#allocation97_spill] sm:$0xff] %v3923_v40  ;;  %887 = vperm.xlu1 %3129, %v3794_v44  }
 0x125   :  { %v3932_v2 = vpop.permute.xlu0 %2677 }
 0x126   :  { %6575 = vst [vmem:[#allocation98_spill] sm:$0xff] %v3932_v2  ;;  %v3952_v2 = vld [vmem:[%s6405_s0 + $0x71] sm:$0x3f] }
 0x127   :  { %v3934_v42 = vpop.permute.xlu1 %523  ;;  %1459 = vperm.xlu0 %3152, %v3930_v36  }
 0x128   :  { %6576 = vst [vmem:[#allocation99_spill] sm:$0xff] %v3934_v42  ;;  %3130 = vset.pattern.permute.xlu1 %v6515_v54 }
 0x129   :  { %924 = vperm.xlu1 %3130, %v3346_v19   ;;  %v3944_v40 = vpop.permute.xlu0 %2692 }
 0x12a   :  { %6577 = vst [vmem:[#allocation100_spill] sm:$0xff] %v3944_v40  ;;  %v3963_v40 = vld [vmem:[%s6405_s0 + $0xa] sm:$0x3f] }
 0x12b   :  { %v3946_v44 = vpop.permute.xlu1 %531  ;;  %1467 = vperm.xlu0 %3152, %v3941_v38  }
 0x12c   :  { %6578 = vst [vmem:[#allocation101_spill] sm:$0xff] %v3946_v44 }
 0x12d   :  { %928 = vperm.xlu1 %3130, %v3739_v11   ;;  %v3955_v42 = vpop.permute.xlu0 %2702  ;;  %v3974_v11 = vld [vmem:[%s6405_s0 + $0x22] sm:$0x3f] }
 0x12e   :  { %6579 = vst [vmem:[#allocation102_spill] sm:$0xff] %v3955_v42 }
 0x12f   :  { %v3957_v7 = vpop.permute.xlu1 %539  ;;  %1475 = vperm.xlu0 %3152, %v3952_v2  }
 0x130   :  { %6580 = vst [vmem:[#allocation103_spill] sm:$0xff] %v3957_v7 }
 0x131   :  { %936 = vperm.xlu1 %3130, %v3353_v20   ;;  %v3966_v44 = vpop.permute.xlu0 %2712 }
 0x132   :  { %6581 = vst [vmem:[#allocation104_spill] sm:$0xff] %v3966_v44  ;;  %v3985_v44 = vld [vmem:[%s6405_s0 + $0x32] sm:$0x3f] }
 0x133   :  { %v3968_v62 = vpop.permute.xlu1 %547  ;;  %1763 = vperm.xlu0 %3152, %v3963_v40  }
 0x134   :  { %6582 = vst [vmem:[#allocation105_spill] sm:$0xff] %v3968_v62 }
 0x135   :  { %944 = vperm.xlu1 %3130, %v3360_v22   ;;  %v3977_v42 = vpop.permute.xlu0 %2722 }
 0x136   :  { %6583 = vst [vmem:[#allocation106_spill] sm:$0xff] %v3977_v42  ;;  %v3996_v42 = vld [vmem:[%s6405_s0 + $0x52] sm:$0x3f] }
 0x137   :  { %v3979_v7 = vpop.permute.xlu1 %555  ;;  %1775 = vperm.xlu0 %3152, %v3974_v11   ;;  %6587 = vst [vmem:[#allocation110_spill] sm:$0xff] %v3996_v42 }
 0x138   :  { %6584 = vst [vmem:[#allocation107_spill] sm:$0xff] %v3979_v7 }
 0x139   :  { %952 = vperm.xlu1 %3130, %v3367_v23  }
 0x13a   :  { %v3988_v62 = vpop.permute.xlu0 %102 }
 0x13b   :  { %6585 = vst [vmem:[#allocation108_spill] sm:$0xff] %v3988_v62  ;;  %1783 = vperm.xlu0 %3152, %v3985_v44   ;;  %v4007_v62 = vld [vmem:[%s6405_s0 + $0x62] sm:$0x3f] }
 0x13c   :  { %v3991_v63 = vpop.permute.xlu1 %592  ;;  %6590 = vst [vmem:[#allocation113_spill] sm:$0xff] %v4007_v62 }
 0x13d   :  { %6586 = vst [vmem:[#allocation109_spill] sm:$0xff] %v3991_v63  ;;  %960 = vperm.xlu1 %3130, %v3374_v24  }
 0x13e   :  { %v3999_v7 = vpop.permute.xlu0 %114 }
 0x13f   :  { %6588 = vst [vmem:[#allocation111_spill] sm:$0xff] %v3999_v7  ;;  %1791 = vperm.xlu0 %3152, %v3996_v42   ;;  %v4017_v7 = vld [vmem:[%s6405_s0 + $0x18] sm:$0x3f] }
 0x140   :  { %v4002_v60 = vpop.permute.xlu1 %596 }
 0x141   :  { %6589 = vst [vmem:[#allocation112_spill] sm:$0xff] %v4002_v60  ;;  %3131 = vset.pattern.permute.xlu1 %v6529_v57  ;;  %v4024_v60 = vld [vmem:[%s6405_s0 + $0x72] sm:$0x3f] }
 0x142   :  { %1011 = vperm.xlu1 %3131, %v3830_v56   ;;  %v4011_v63 = vpop.permute.xlu0 %122  ;;  %6593 = vst [vmem:[#allocation116_spill] sm:$0xff] %v4024_v60 }
 0x143   :  { %6591 = vst [vmem:[#allocation114_spill] sm:$0xff] %v4011_v63  ;;  %1799 = vperm.xlu0 %3152, %v4007_v62   ;;  %v4035_v62 = vld [vmem:[%s6405_s0 + $0x10] sm:$0x3f] }
 0x144   :  { %v4019_v21 = vpop.permute.xlu1 %604  ;;  %6596 = vst [vmem:[#allocation119_spill] sm:$0xff] %v4035_v62 }
 0x145   :  { %6592 = vst [vmem:[#allocation115_spill] sm:$0xff] %v4019_v21 }
 0x146   :  { %1021 = vperm.xlu1 %3131, %v4017_v7   ;;  %v4027_v30 = vpop.permute.xlu0 %130 }
 0x147   :  { %6594 = vst [vmem:[#allocation117_spill] sm:$0xff] %v4027_v30  ;;  %1807 = vperm.xlu0 %3152, %v4024_v60   ;;  %v4046_v30 = vld [vmem:[%s6405_s0 + $0x28] sm:$0x3f] }
 0x148   :  { %v4030_v63 = vpop.permute.xlu1 %612  ;;  %6599 = vst [vmem:[#allocation122_spill] sm:$0xff] %v4046_v30 }
 0x149   :  { %6595 = vst [vmem:[#allocation118_spill] sm:$0xff] %v4030_v63 }
 0x14a   :  { %1026 = vperm.xlu1 %3131, %v3841_v59   ;;  %v4038_v21 = vpop.permute.xlu0 %138 }
 0x14b   :  { %6597 = vst [vmem:[#allocation120_spill] sm:$0xff] %v4038_v21  ;;  %2096 = vperm.xlu0 %3152, %v4035_v62   ;;  %v4057_v21 = vld [vmem:[%s6405_s0 + $0x38] sm:$0x3f] }
 0x14c   :  { %v4041_v42 = vpop.permute.xlu1 %620  ;;  %6602 = vst [vmem:[#allocation125_spill] sm:$0xff] %v4057_v21  ;;  %v4066_v62 = vld [vmem:[%s6405_s0 + $0x58] sm:$0x3f] }
 0x14d   :  { %6598 = vst [vmem:[#allocation121_spill] sm:$0xff] %v4041_v42  ;;  %6604 = vst [vmem:[#allocation127_spill] sm:$0xff] %v4066_v62 }
 0x14e   :  { %1036 = vperm.xlu1 %3131, %v3852_v5   ;;  %v4049_v63 = vpop.permute.xlu0 %146 }
 0x14f   :  { %6600 = vst [vmem:[#allocation123_spill] sm:$0xff] %v4049_v63  ;;  %2108 = vperm.xlu0 %3152, %v4046_v30   ;;  %v4077_v30 = vld [vmem:[%s6405_s0 + $0x68] sm:$0x3f] }
 0x150   :  { %v4052_v60 = vpop.permute.xlu1 %628  ;;  %6607 = vst [vmem:[#allocation130_spill] sm:$0xff] %v4077_v30 }
 0x151   :  { %6601 = vst [vmem:[#allocation124_spill] sm:$0xff] %v4052_v60 }
 0x152   :  { %1046 = vperm.xlu1 %3131, %v3864_v9   ;;  %v4060_v42 = vpop.permute.xlu0 %434 }
 0x153   :  { %6603 = vst [vmem:[#allocation126_spill] sm:$0xff] %v4060_v42  ;;  %2116 = vperm.xlu0 %3152, %v4057_v21  }
 0x155   :  { %v4068_v63 = vpop.permute.xlu1 %678 }
 0x156   :  { %6605 = vst [vmem:[#allocation128_spill] sm:$0xff] %v4068_v63  ;;  %1056 = vperm.xlu1 %3131, %v3875_v48   ;;  %v4071_v60 = vpop.permute.xlu0 %446  ;;  %v4088_v63 = vld [vmem:[%s6405_s0 + $0x78] sm:$0x3f] }
 0x157   :  { %6606 = vst [vmem:[#allocation129_spill] sm:$0xff] %v4071_v60  ;;  %2124 = vperm.xlu0 %3152, %v4066_v62   ;;  %6610 = vst [vmem:[#allocation133_spill] sm:$0xff] %v4088_v63 }
 0x159   :  { %v4079_v42 = vpop.permute.xlu1 %688 }
 0x15a   :  { %6608 = vst [vmem:[#allocation131_spill] sm:$0xff] %v4079_v42  ;;  %1066 = vperm.xlu1 %3131, %v3886_v46   ;;  %v4082_v21 = vpop.permute.xlu0 %454  ;;  %v4100_v42 = vld [vmem:[%s6405_s0 + $0x11] sm:$0x3f] }
 0x15b   :  { %6609 = vst [vmem:[#allocation132_spill] sm:$0xff] %v4082_v21  ;;  %2132 = vperm.xlu0 %3152, %v4077_v30   ;;  %6613 = vst [vmem:[#allocation136_spill] sm:$0xff] %v4100_v42 }
 0x15d   :  { %v4090_v60 = vpop.permute.xlu1 %693 }
 0x15e   :  { %6611 = vst [vmem:[#allocation134_spill] sm:$0xff] %v4090_v60  ;;  %3132 = vset.pattern.permute.xlu1 %v6513_v51  ;;  %v4093_v62 = vpop.permute.xlu0 %462  ;;  %v3085_v60 = vld [vmem:[%s6405_s0 + $0x29] sm:$0x3f] }
 0x15f   :  { %6612 = vst [vmem:[#allocation135_spill] sm:$0xff] %v4093_v62  ;;  %1103 = vperm.xlu1 %3132, %v3381_v25   ;;  %2140 = vperm.xlu0 %3152, %v4088_v63  }
 0x161   :  { %v4102_v21 = vpop.permute.xlu1 %703 }
 0x162   :  { %6614 = vst [vmem:[#allocation137_spill] sm:$0xff] %v4102_v21  ;;  %v4104_v30 = vpop.permute.xlu0 %470  ;;  %v3087_v21 = vld [vmem:[%s6405_s0 + $0x39] sm:$0x3f] }
 0x163   :  { %6615 = vst [vmem:[#allocation138_spill] sm:$0xff] %v4104_v30  ;;  %1107 = vperm.xlu1 %3132, %v4017_v7   ;;  %2428 = vperm.xlu0 %3152, %v4100_v42  }
 0x165   :  { %v4111_v62 = vpop.permute.xlu1 %713 }
 0x166   :  { %6616 = vst [vmem:[#allocation139_spill] sm:$0xff] %v4111_v62  ;;  %v4113_v63 = vpop.permute.xlu0 %478  ;;  %v3089_v62 = vld [vmem:[%s6405_s0 + $0x59] sm:$0x3f] }
 0x167   :  { %6617 = vst [vmem:[#allocation140_spill] sm:$0xff] %v4113_v63  ;;  %1115 = vperm.xlu1 %3132, %v3388_v26   ;;  %2440 = vperm.xlu0 %3152, %v3085_v60   ;;  %v3091_v60 = vld [vmem:[%s6405_s0 + $0x69] sm:$0x3f] }
 0x169   :  { %v4119_v30 = vpop.permute.xlu1 %723 }
 0x16a   :  { %6618 = vst [vmem:[#allocation141_spill] sm:$0xff] %v4119_v30  ;;  %v4121_v14 = vpop.permute.xlu0 %766 }
 0x16b   :  { %6619 = vst [vmem:[#allocation142_spill] sm:$0xff] %v4121_v14  ;;  %1123 = vperm.xlu1 %3132, %v3395_v27   ;;  %2448 = vperm.xlu0 %3152, %v3087_v21   ;;  %v3093_v21 = vld [vmem:[%s6405_s0 + $0x79] sm:$0x3f] }
 0x16d   :  { %v4127_v42 = vpop.permute.xlu1 %733 }
 0x16e   :  { %6620 = vst [vmem:[#allocation143_spill] sm:$0xff] %v4127_v42  ;;  %v4129_v63 = vpop.permute.xlu0 %778 }
 0x16f   :  { %6621 = vst [vmem:[#allocation144_spill] sm:$0xff] %v4129_v63  ;;  %1131 = vperm.xlu1 %3132, %v3402_v28   ;;  %2456 = vperm.xlu0 %3152, %v3089_v62   ;;  %v3098_v62 = vld [vmem:[%s6405_s0 + $0x12] sm:$0x3f] }
 0x172   :  { %v4135_v30 = vpop.permute.xlu1 %770  ;;  %v4137_v14 = vpop.permute.xlu0 %786 }
 0x173   :  { %6622 = vst [vmem:[#allocation145_spill] sm:$0xff] %v4135_v30  ;;  %6623 = vst [vmem:[#allocation146_spill] sm:$0xff] %v4137_v14  ;;  %1139 = vperm.xlu1 %3132, %v3409_v29   ;;  %2464 = vperm.xlu0 %3152, %v3091_v60  }
 0x176   :  { %v4143_v42 = vpop.permute.xlu1 %774  ;;  %v4145_v63 = vpop.permute.xlu0 %794 }
 0x177   :  { %6624 = vst [vmem:[#allocation147_spill] sm:$0xff] %v4143_v42  ;;  %6625 = vst [vmem:[#allocation148_spill] sm:$0xff] %v4145_v63  ;;  %3133 = vset.pattern.permute.xlu1 %v6493_v50  ;;  %2472 = vperm.xlu0 %3152, %v3093_v21   ;;  %v3101_v42 = vld [vmem:[%s6405_s0 + $0x2a] sm:$0x3f] }
 0x178   :  { %1176 = vperm.xlu1 %3133, %v3830_v56  }
 0x17a   :  { %v4152_v30 = vpop.permute.xlu1 %782  ;;  %v4154_v60 = vpop.permute.xlu0 %802 }
 0x17b   :  { %6626 = vst [vmem:[#allocation149_spill] sm:$0xff] %v4152_v30  ;;  %6627 = vst [vmem:[#allocation150_spill] sm:$0xff] %v4154_v60  ;;  %2760 = vperm.xlu0 %3152, %v3098_v62   ;;  %v3103_v30 = vld [vmem:[%s6405_s0 + $0x3a] sm:$0x3f] }
 0x17c   :  { %1184 = vperm.xlu1 %3133, %v4017_v7  }
 0x17e   :  { %v4160_v63 = vpop.permute.xlu1 %790  ;;  %v4162_v21 = vpop.permute.xlu0 %810 }
 0x17f   :  { %6628 = vst [vmem:[#allocation151_spill] sm:$0xff] %v4160_v63  ;;  %6629 = vst [vmem:[#allocation152_spill] sm:$0xff] %v4162_v21  ;;  %2772 = vperm.xlu0 %3152, %v3101_v42   ;;  %v3105_v63 = vld [vmem:[%s6405_s0 + $0x5a] sm:$0x3f] }
 0x180   :  { %1188 = vperm.xlu1 %3133, %v3841_v59  }
 0x182   :  { %v4168_v14 = vpop.permute.xlu1 %798  ;;  %v4170_v62 = vpop.permute.xlu0 %1099 }
 0x183   :  { %6630 = vst [vmem:[#allocation153_spill] sm:$0xff] %v4168_v14  ;;  %6631 = vst [vmem:[#allocation154_spill] sm:$0xff] %v4170_v62  ;;  %2780 = vperm.xlu0 %3152, %v3103_v30   ;;  %v3107_v14 = vld [vmem:[%s6405_s0 + $0x6a] sm:$0x3f] }
 0x184   :  { %1196 = vperm.xlu1 %3133, %v3852_v5  }
 0x186   :  { %v4176_v60 = vpop.permute.xlu1 %806  ;;  %v4178_v42 = vpop.permute.xlu0 %1111 }
 0x187   :  { %6632 = vst [vmem:[#allocation155_spill] sm:$0xff] %v4176_v60  ;;  %6633 = vst [vmem:[#allocation156_spill] sm:$0xff] %v4178_v42  ;;  %2788 = vperm.xlu0 %3152, %v3105_v63   ;;  %v3109_v60 = vld [vmem:[%s6405_s0 + $0x7a] sm:$0x3f] }
 0x188   :  { %1204 = vperm.xlu1 %3133, %v3864_v9  }
 0x18a   :  { %v4184_v21 = vpop.permute.xlu0 %1119 }
 0x18b   :  { %v4186_v30 = vpop.permute.xlu1 %843  ;;  %2796 = vperm.xlu0 %3152, %v3107_v14  }
 0x18c   :  { %1212 = vperm.xlu1 %3133, %v3875_v48  }
 0x18e   :  { %v4192_v62 = vpop.permute.xlu0 %1127 }
 0x18f   :  { %6634 = vst [vmem:[#allocation157_spill] sm:$0xff] %v4192_v62  ;;  %v4194_v63 = vpop.permute.xlu1 %851  ;;  %2804 = vperm.xlu0 %3152, %v3109_v60  }
 0x190   :  { %6635 = vst [vmem:[#allocation158_spill] sm:$0xff] %v4194_v63  ;;  %1220 = vperm.xlu1 %3133, %v3886_v46  }
 0x192   :  { %v4197_v42 = vpop.permute.xlu0 %1135 }
 0x193   :  { %6636 = vst [vmem:[#allocation159_spill] sm:$0xff] %v4197_v42  ;;  %v4199_v9 = vpop.permute.xlu1 %855  ;;  %3154 = vset.pattern.permute.xlu0 %v6493_v50 }
 0x194   :  { %3134 = vset.pattern.permute.xlu1 %v6515_v54  ;;  %183 = vperm.xlu0 %3154, %v3255_v4  }
 0x195   :  { %1257 = vperm.xlu1 %3134, %v3381_v25  }
 0x196   :  { %v4205_v14 = vpop.permute.xlu0 %1143 }
 0x197   :  { %6637 = vst [vmem:[#allocation160_spill] sm:$0xff] %v4205_v14  ;;  %v4207_v62 = vpop.permute.xlu1 %863 }
 0x198   :  { %195 = vperm.xlu0 %3154, %v3267_v6  }
 0x199   :  { %1261 = vperm.xlu1 %3134, %v4017_v7  }
 0x19a   :  { %v4211_v60 = vpop.permute.xlu0 %1431 }
 0x19b   :  { %v4213_v63 = vpop.permute.xlu1 %871 }
 0x19c   :  { %203 = vperm.xlu0 %3154, %v3279_v8  }
 0x19d   :  { %1269 = vperm.xlu1 %3134, %v3388_v26  }
 0x19e   :  { %v4217_v42 = vpop.permute.xlu0 %1443 }
 0x19f   :  { %6638 = vst [vmem:[#allocation161_spill] sm:$0xff] %v4217_v42  ;;  %v4219_v4 = vpop.permute.xlu1 %879 }
 0x1a0   :  { %211 = vperm.xlu0 %3154, %v3291_v10  }
 0x1a1   :  { %1277 = vperm.xlu1 %3134, %v3395_v27  }
 0x1a2   :  { %v4223_v14 = vpop.permute.xlu0 %1451 }
 0x1a3   :  { %6639 = vst [vmem:[#allocation162_spill] sm:$0xff] %v4223_v14  ;;  %v4225_v6 = vpop.permute.xlu1 %887  ;;  %v6809_v14 = vld [vmem:[#allocation12_spill] sm:$0xff] }
 0x1a4   :  { %219 = vperm.xlu0 %3154, %v3303_v12  }
 0x1a5   :  { %1285 = vperm.xlu1 %3134, %v3402_v28  }
 0x1a6   :  { %v4229_v7 = vpop.permute.xlu0 %1459 }
 0x1a7   :  { %6640 = vst [vmem:[#allocation163_spill] sm:$0xff] %v4229_v7 }
 0x1a8   :  { %v4231_v8 = vpop.permute.xlu1 %924  ;;  %515 = vperm.xlu0 %3154, %v3310_v13  }
 0x1a9   :  { %6641 = vst [vmem:[#allocation164_spill] sm:$0xff] %v4231_v8  ;;  %1293 = vperm.xlu1 %3134, %v3409_v29   ;;  %v4247_v8 = vld [vmem:[%s6405_s0 + $0x19] sm:$0x3f] }
 0x1aa   :  { %v4235_v42 = vpop.permute.xlu0 %1467 }
 0x1ab   :  { %6642 = vst [vmem:[#allocation165_spill] sm:$0xff] %v4235_v42 }
 0x1ac   :  { %v4237_v10 = vpop.permute.xlu1 %928  ;;  %527 = vperm.xlu0 %3154, %v3318_v15  }
 0x1ad   :  { %6643 = vst [vmem:[#allocation166_spill] sm:$0xff] %v4237_v10  ;;  %3135 = vset.pattern.permute.xlu1 %v6529_v57 }
 0x1ae   :  { %1343 = vperm.xlu1 %3135, %v3897_v53   ;;  %v4242_v12 = vpop.permute.xlu0 %1475 }
 0x1af   :  { %6644 = vst [vmem:[#allocation167_spill] sm:$0xff] %v4242_v12 }
 0x1b0   :  { %v4249_v13 = vpop.permute.xlu1 %936  ;;  %535 = vperm.xlu0 %3154, %v3325_v16  }
 0x1b1   :  { %6645 = vst [vmem:[#allocation168_spill] sm:$0xff] %v4249_v13 }
 0x1b2   :  { %1353 = vperm.xlu1 %3135, %v4247_v8   ;;  %v4253_v10 = vpop.permute.xlu0 %1763 }
 0x1b3   :  { %6646 = vst [vmem:[#allocation169_spill] sm:$0xff] %v4253_v10 }
 0x1b4   :  { %v4255_v15 = vpop.permute.xlu1 %944  ;;  %543 = vperm.xlu0 %3154, %v3332_v17  }
 0x1b5   :  { %6647 = vst [vmem:[#allocation170_spill] sm:$0xff] %v4255_v15 }
 0x1b6   :  { %1358 = vperm.xlu1 %3135, %v3908_v3   ;;  %v4259_v12 = vpop.permute.xlu0 %1775 }
 0x1b7   :  { %6648 = vst [vmem:[#allocation171_spill] sm:$0xff] %v4259_v12 }
 0x1b8   :  { %v4261_v42 = vpop.permute.xlu1 %952  ;;  %551 = vperm.xlu0 %3154, %v3339_v18  }
 0x1b9   :  { %6649 = vst [vmem:[#allocation172_spill] sm:$0xff] %v4261_v42 }
 0x1ba   :  { %1368 = vperm.xlu1 %3135, %v3919_v0   ;;  %v4265_v13 = vpop.permute.xlu0 %1783 }
 0x1bb   :  { %6650 = vst [vmem:[#allocation173_spill] sm:$0xff] %v4265_v13 }
 0x1bc   :  { %v4267_v16 = vpop.permute.xlu1 %960  ;;  %847 = vperm.xlu0 %3154, %v3346_v19  }
 0x1bd   :  { %6651 = vst [vmem:[#allocation174_spill] sm:$0xff] %v4267_v16 }
 0x1be   :  { %1378 = vperm.xlu1 %3135, %v3930_v36   ;;  %v4271_v15 = vpop.permute.xlu0 %1791 }
 0x1bf   :  { %6652 = vst [vmem:[#allocation175_spill] sm:$0xff] %v4271_v15 }
 0x1c0   :  { %859 = vperm.xlu0 %3154, %v3353_v20  }
 0x1c1   :  { %v4274_v17 = vpop.permute.xlu1 %1011 }
 0x1c2   :  { %1388 = vperm.xlu1 %3135, %v3941_v38   ;;  %v4277_v42 = vpop.permute.xlu0 %1799 }
 0x1c3   :  { %6653 = vst [vmem:[#allocation176_spill] sm:$0xff] %v4277_v42 }
 0x1c4   :  { %867 = vperm.xlu0 %3154, %v3360_v22  }
 0x1c5   :  { %v4280_v18 = vpop.permute.xlu1 %1021 }
 0x1c6   :  { %6654 = vst [vmem:[#allocation177_spill] sm:$0xff] %v4280_v18  ;;  %1398 = vperm.xlu1 %3135, %v3952_v2   ;;  %v4283_v16 = vpop.permute.xlu0 %1807  ;;  %v3162_v18 = vld [vmem:[%s6405_s0] sm:$0x3f] }
 0x1c7   :  { %6655 = vst [vmem:[#allocation178_spill] sm:$0xff] %v4283_v16 }
 0x1c8   :  { %875 = vperm.xlu0 %3154, %v3367_v23  }
 0x1c9   :  { %v4286_v19 = vpop.permute.xlu1 %1026 }
 0x1ca   :  { %3136 = vset.pattern.permute.xlu1 %v6513_v51  ;;  %v4289_v20 = vpop.permute.xlu0 %2096 }
 0x1cb   :  { %6656 = vst [vmem:[#allocation179_spill] sm:$0xff] %v4289_v20  ;;  %1435 = vperm.xlu1 %3136, %v3417_v31  }
 0x1cc   :  { %883 = vperm.xlu0 %3154, %v3374_v24  }
 0x1cd   :  { %v4293_v42 = vpop.permute.xlu1 %1036 }
 0x1ce   :  { %v4295_v22 = vpop.permute.xlu0 %2108 }
 0x1cf   :  { %6657 = vst [vmem:[#allocation180_spill] sm:$0xff] %v4295_v22  ;;  %1439 = vperm.xlu1 %3136, %v4247_v8  }
 0x1d0   :  { %1180 = vperm.xlu0 %3154, %v3381_v25  }
 0x1d1   :  { %v4299_v16 = vpop.permute.xlu1 %1046 }
 0x1d2   :  { %v4301_v23 = vpop.permute.xlu0 %2116 }
 0x1d3   :  { %6658 = vst [vmem:[#allocation181_spill] sm:$0xff] %v4301_v23  ;;  %1447 = vperm.xlu1 %3136, %v3424_v32  }
 0x1d4   :  { %1192 = vperm.xlu0 %3154, %v3388_v26  }
 0x1d5   :  { %v4305_v20 = vpop.permute.xlu1 %1056 }
 0x1d6   :  { %v4307_v15 = vpop.permute.xlu0 %2124 }
 0x1d7   :  { %6659 = vst [vmem:[#allocation182_spill] sm:$0xff] %v4307_v15  ;;  %1455 = vperm.xlu1 %3136, %v3431_v33  }
 0x1d8   :  { %1200 = vperm.xlu0 %3154, %v3395_v27  }
 0x1d9   :  { %v4311_v24 = vpop.permute.xlu1 %1066 }
 0x1da   :  { %v4313_v22 = vpop.permute.xlu0 %2132 }
 0x1db   :  { %6660 = vst [vmem:[#allocation183_spill] sm:$0xff] %v4313_v22  ;;  %1463 = vperm.xlu1 %3136, %v3438_v34   ;;  %v4477_v22 = vld [vmem:[%s6405_s0 + $0x2a] sm:$0x3f] }
 0x1dc   :  { %1208 = vperm.xlu0 %3154, %v3402_v28  }
 0x1de   :  { %v4317_v25 = vpop.permute.xlu1 %1103  ;;  %v4319_v23 = vpop.permute.xlu0 %2140 }
 0x1df   :  { %6661 = vst [vmem:[#allocation184_spill] sm:$0xff] %v4317_v25  ;;  %6662 = vst [vmem:[#allocation185_spill] sm:$0xff] %v4319_v23  ;;  %1471 = vperm.xlu1 %3136, %v3445_v35  }
 0x1e0   :  { %1216 = vperm.xlu0 %3154, %v3409_v29  }
 0x1e2   :  { %v4323_v26 = vpop.permute.xlu1 %1107  ;;  %v4325_v15 = vpop.permute.xlu0 %2428 }
 0x1e3   :  { %6663 = vst [vmem:[#allocation186_spill] sm:$0xff] %v4323_v26  ;;  %6664 = vst [vmem:[#allocation187_spill] sm:$0xff] %v4325_v15  ;;  %3137 = vset.pattern.permute.xlu1 %v6493_v50 }
 0x1e4   :  { %1508 = vperm.xlu1 %3137, %v3897_v53   ;;  %1512 = vperm.xlu0 %3154, %v3417_v31  }
 0x1e6   :  { %v4330_v27 = vpop.permute.xlu1 %1115  ;;  %v4332_v28 = vpop.permute.xlu0 %2440 }
 0x1e7   :  { %6665 = vst [vmem:[#allocation188_spill] sm:$0xff] %v4330_v27  ;;  %6666 = vst [vmem:[#allocation189_spill] sm:$0xff] %v4332_v28 }
 0x1e8   :  { %1516 = vperm.xlu1 %3137, %v4247_v8   ;;  %1524 = vperm.xlu0 %3154, %v3424_v32  }
 0x1ea   :  { %v4336_v23 = vpop.permute.xlu1 %1123  ;;  %v4338_v29 = vpop.permute.xlu0 %2448 }
 0x1eb   :  { %6667 = vst [vmem:[#allocation190_spill] sm:$0xff] %v4336_v23  ;;  %6668 = vst [vmem:[#allocation191_spill] sm:$0xff] %v4338_v29 }
 0x1ec   :  { %1520 = vperm.xlu1 %3137, %v3908_v3   ;;  %1532 = vperm.xlu0 %3154, %v3431_v33  }
 0x1ee   :  { %v4342_v15 = vpop.permute.xlu1 %1131  ;;  %v4344_v26 = vpop.permute.xlu0 %2456 }
 0x1ef   :  { %6669 = vst [vmem:[#allocation192_spill] sm:$0xff] %v4342_v15  ;;  %6670 = vst [vmem:[#allocation193_spill] sm:$0xff] %v4344_v26 }
 0x1f0   :  { %1528 = vperm.xlu1 %3137, %v3919_v0   ;;  %1540 = vperm.xlu0 %3154, %v3438_v34  }
 0x1f2   :  { %v4348_v28 = vpop.permute.xlu1 %1139  ;;  %v4350_v27 = vpop.permute.xlu0 %2464 }
 0x1f3   :  { %6671 = vst [vmem:[#allocation194_spill] sm:$0xff] %v4348_v28  ;;  %6672 = vst [vmem:[#allocation195_spill] sm:$0xff] %v4350_v27 }
 0x1f4   :  { %1536 = vperm.xlu1 %3137, %v3930_v36   ;;  %1548 = vperm.xlu0 %3154, %v3445_v35  }
 0x1f6   :  { %v4354_v29 = vpop.permute.xlu0 %2472 }
 0x1f7   :  { %6673 = vst [vmem:[#allocation196_spill] sm:$0xff] %v4354_v29  ;;  %v4356_v23 = vpop.permute.xlu1 %1176 }
 0x1f8   :  { %1544 = vperm.xlu1 %3137, %v3941_v38   ;;  %1844 = vperm.xlu0 %3154, %v3457_v37  }
 0x1fa   :  { %v4360_v26 = vpop.permute.xlu0 %2760 }
 0x1fb   :  { %6674 = vst [vmem:[#allocation197_spill] sm:$0xff] %v4360_v26  ;;  %v4362_v15 = vpop.permute.xlu1 %1184 }
 0x1fc   :  { %6675 = vst [vmem:[#allocation198_spill] sm:$0xff] %v4362_v15  ;;  %1552 = vperm.xlu1 %3137, %v3952_v2   ;;  %1856 = vperm.xlu0 %3154, %v3470_v39   ;;  %v6701_v15 = vld [vmem:[#allocation116_spill] sm:$0xff] }
 0x1fe   :  { %v4366_v27 = vpop.permute.xlu0 %2772 }
 0x1ff   :  { %6676 = vst [vmem:[#allocation199_spill] sm:$0xff] %v4366_v27  ;;  %v4368_v28 = vpop.permute.xlu1 %1188 }
 0x200   :  { %3138 = vset.pattern.permute.xlu1 %v6515_v54  ;;  %1864 = vperm.xlu0 %3154, %v3482_v41  }
 0x201   :  { %1589 = vperm.xlu1 %3138, %v3417_v31  }
 0x202   :  { %v4373_v29 = vpop.permute.xlu0 %2780 }
 0x203   :  { %6677 = vst [vmem:[#allocation200_spill] sm:$0xff] %v4373_v29  ;;  %v4375_v37 = vpop.permute.xlu1 %1196  ;;  %v6694_v29 = vld [vmem:[#allocation110_spill] sm:$0xff] }
 0x204   :  { %1872 = vperm.xlu0 %3154, %v3494_v43  }
 0x205   :  { %1593 = vperm.xlu1 %3138, %v4247_v8  }
 0x206   :  { %v4379_v26 = vpop.permute.xlu0 %2788 }
 0x207   :  { %6678 = vst [vmem:[#allocation201_spill] sm:$0xff] %v4379_v26  ;;  %v4381_v39 = vpop.permute.xlu1 %1204  ;;  %v6693_v26 = vld [vmem:[#allocation14_spill] sm:$0xff] }
 0x208   :  { %1880 = vperm.xlu0 %3154, %v3506_v45  }
 0x209   :  { %1601 = vperm.xlu1 %3138, %v3424_v32  }
 0x20a   :  { %v4385_v27 = vpop.permute.xlu0 %2796 }
 0x20b   :  { %6679 = vst [vmem:[#allocation202_spill] sm:$0xff] %v4385_v27  ;;  %v4387_v41 = vpop.permute.xlu1 %1212 }
 0x20c   :  { %2177 = vperm.xlu0 %3154, %v3518_v47  }
 0x20d   :  { %1609 = vperm.xlu1 %3138, %v3431_v33  }
 0x20e   :  { %v4391_v31 = vpop.permute.xlu0 %2804 }
 0x20f   :  { %6680 = vst [vmem:[#allocation203_spill] sm:$0xff] %v4391_v31  ;;  %v4393_v43 = vpop.permute.xlu1 %1220 }
 0x210   :  { %2189 = vperm.xlu0 %3154, %v3530_v49  }
 0x211   :  { %1617 = vperm.xlu1 %3138, %v3438_v34   ;;  %v4415_v34 = vld [vmem:[%s6405_s0 + $0x1a] sm:$0x3f] }
 0x213   :  { %v4397_v8 = vpop.permute.xlu0 %183 }
 0x214   :  { %6681 = vst [vmem:[#allocation204_spill] sm:$0xff] %v4397_v8  ;;  %v4399_v45 = vpop.permute.xlu1 %1257  ;;  %2197 = vperm.xlu0 %3154, %v3541_v52  }
 0x215   :  { %6682 = vst [vmem:[#allocation205_spill] sm:$0xff] %v4399_v45  ;;  %1625 = vperm.xlu1 %3138, %v3445_v35   ;;  %v6697_v45 = vld [vmem:[#allocation113_spill] sm:$0xff] }
 0x217   :  { %v4403_v32 = vpop.permute.xlu0 %195 }
 0x218   :  { %6683 = vst [vmem:[#allocation206_spill] sm:$0xff] %v4403_v32  ;;  %v4405_v47 = vpop.permute.xlu1 %1261  ;;  %2205 = vperm.xlu0 %3154, %v3553_v55  }
 0x219   :  { %6684 = vst [vmem:[#allocation207_spill] sm:$0xff] %v4405_v47  ;;  %3139 = vset.pattern.permute.xlu1 %v6529_v57 }
 0x21a   :  { %1675 = vperm.xlu1 %3139, %v3963_v40  }
 0x21b   :  { %v4410_v33 = vpop.permute.xlu0 %203 }
 0x21c   :  { %6685 = vst [vmem:[#allocation208_spill] sm:$0xff] %v4410_v33  ;;  %v4417_v49 = vpop.permute.xlu1 %1269  ;;  %2213 = vperm.xlu0 %3154, %v3564_v58  }
 0x21d   :  { %6686 = vst [vmem:[#allocation209_spill] sm:$0xff] %v4417_v49 }
 0x21e   :  { %1685 = vperm.xlu1 %3139, %v4415_v34  }
 0x21f   :  { %v4421_v35 = vpop.permute.xlu0 %211 }
 0x220   :  { %6687 = vst [vmem:[#allocation210_spill] sm:$0xff] %v4421_v35  ;;  %v4423_v52 = vpop.permute.xlu1 %1277  ;;  %2509 = vperm.xlu0 %3154, %v3575_v61   ;;  %v6696_v61 = vld [vmem:[#allocation17_spill] sm:$0xff] }
 0x221   :  { %6688 = vst [vmem:[#allocation211_spill] sm:$0xff] %v4423_v52 }
 0x222   :  { %1690 = vperm.xlu1 %3139, %v3974_v11  }
 0x223   :  { %v4427_v55 = vpop.permute.xlu0 %219 }
 0x224   :  { %6689 = vst [vmem:[#allocation212_spill] sm:$0xff] %v4427_v55  ;;  %v4429_v31 = vpop.permute.xlu1 %1285  ;;  %2521 = vperm.xlu0 %3154, %v3586_v1   ;;  %v6699_v1 = vld [vmem:[#allocation20_spill] sm:$0xff] }
 0x225   :  { %6690 = vst [vmem:[#allocation213_spill] sm:$0xff] %v4429_v31 }
 0x226   :  { %1700 = vperm.xlu1 %3139, %v3985_v44  }
 0x227   :  { %v4433_v27 = vpop.permute.xlu0 %515 }
 0x228   :  { %6691 = vst [vmem:[#allocation214_spill] sm:$0xff] %v4433_v27  ;;  %v4435_v58 = vpop.permute.xlu1 %1293  ;;  %2529 = vperm.xlu0 %3154, %v6693_v26   ;;  %v6703_v26 = vld [vmem:[#allocation23_spill] sm:$0xff] }
 0x229   :  { %6692 = vst [vmem:[#allocation215_spill] sm:$0xff] %v4435_v58  ;;  %v6713_v27 = vld [vmem:[#allocation35_spill] sm:$0xff] }
 0x22a   :  { %1710 = vperm.xlu1 %3139, %v6694_v29  }
 0x22b   :  { %v4439_v52 = vpop.permute.xlu0 %527 }
 0x22c   :  { %6695 = vst [vmem:[#allocation14_spill] sm:$0xff] %v4439_v52  ;;  %2537 = vperm.xlu0 %3154, %v6696_v61   ;;  %v4460_v61 = vld [vmem:[%s6405_s0 + $0x12] sm:$0x3f] }
 0x22d   :  { %v4442_v49 = vpop.permute.xlu1 %1343 }
 0x22e   :  { %1720 = vperm.xlu1 %3139, %v6697_v45  }
 0x22f   :  { %v4445_v31 = vpop.permute.xlu0 %535 }
 0x230   :  { %6698 = vst [vmem:[#allocation110_spill] sm:$0xff] %v4445_v31  ;;  %2545 = vperm.xlu0 %3154, %v6699_v1  }
 0x231   :  { %v4448_v47 = vpop.permute.xlu1 %1353 }
 0x232   :  { %6700 = vst [vmem:[#allocation17_spill] sm:$0xff] %v4448_v47  ;;  %1730 = vperm.xlu1 %3139, %v6701_v15   ;;  %v6705_v47 = vld [vmem:[#allocation26_spill] sm:$0xff] }
 0x233   :  { %v4451_v58 = vpop.permute.xlu0 %543 }
 0x234   :  { %6702 = vst [vmem:[#allocation113_spill] sm:$0xff] %v4451_v58  ;;  %2841 = vperm.xlu0 %3154, %v6703_v26   ;;  %v6707_v58 = vld [vmem:[#allocation29_spill] sm:$0xff] }
 0x235   :  { %v4454_v25 = vpop.permute.xlu1 %1358 }
 0x236   :  { %3140 = vset.pattern.permute.xlu1 %v6513_v51 }
 0x237   :  { %1767 = vperm.xlu1 %3140, %v4460_v61   ;;  %v4463_v1 = vpop.permute.xlu0 %551 }
 0x238   :  { %6704 = vst [vmem:[#allocation20_spill] sm:$0xff] %v4463_v1  ;;  %2853 = vperm.xlu0 %3154, %v6705_v47   ;;  %v6710_v47 = vld [vmem:[#allocation32_spill] sm:$0xff] }
 0x239   :  { %v4466_v31 = vpop.permute.xlu1 %1368 }
 0x23b   :  { %1771 = vperm.xlu1 %3140, %v4415_v34   ;;  %v4469_v26 = vpop.permute.xlu0 %847 }
 0x23c   :  { %6706 = vst [vmem:[#allocation116_spill] sm:$0xff] %v4469_v26  ;;  %2861 = vperm.xlu0 %3154, %v6707_v58   ;;  %v4488_v26 = vld [vmem:[%s6405_s0 + $0x4a] sm:$0x3f] }
 0x23d   :  { %v4472_v52 = vpop.permute.xlu1 %1378 }
 0x23e   :  { %6708 = vst [vmem:[#allocation23_spill] sm:$0xff] %v4472_v52 }
 0x23f   :  { %1779 = vperm.xlu1 %3140, %v4477_v22   ;;  %v4480_v1 = vpop.permute.xlu0 %859 }
 0x240   :  { %6709 = vst [vmem:[#allocation26_spill] sm:$0xff] %v4480_v1  ;;  %2869 = vperm.xlu0 %3154, %v6710_v47   ;;  %v4499_v1 = vld [vmem:[%s6405_s0 + $0x5a] sm:$0x3f] }
 0x241   :  { %v4483_v55 = vpop.permute.xlu1 %1388 }
 0x242   :  { %6711 = vst [vmem:[#allocation29_spill] sm:$0xff] %v4483_v55 }
 0x243   :  { %1787 = vperm.xlu1 %3140, %v4488_v26   ;;  %v4491_v58 = vpop.permute.xlu0 %867 }
 0x244   :  { %6712 = vst [vmem:[#allocation32_spill] sm:$0xff] %v4491_v58  ;;  %2877 = vperm.xlu0 %3154, %v6713_v27   ;;  %v4513_v27 = vld [vmem:[%s6405_s0 + $0x6a] sm:$0x3f] }
 0x245   :  { %v4494_v35 = vpop.permute.xlu1 %1398 }
 0x246   :  { %6714 = vst [vmem:[#allocation35_spill] sm:$0xff] %v4494_v35  ;;  %v6803_v35 = vld [vmem:[#allocation114_spill] sm:$0xff] }
 0x247   :  { %1795 = vperm.xlu1 %3140, %v4499_v1   ;;  %v4502_v47 = vpop.permute.xlu0 %875 }
 0x248   :  { %6715 = vst [vmem:[#allocation216_spill] sm:$0xff] %v4502_v47  ;;  %3156 = vset.pattern.permute.xlu0 %v6515_v54  ;;  %v3164_v47 = vld [vmem:[%s6405_s0 + $0x18] sm:$0x3f] }
 0x249   :  { %256 = vperm.xlu0 %3156, %v3162_v18  }
 0x24a   :  { %v4508_v58 = vpop.permute.xlu1 %1435 }
 0x24b   :  { %6716 = vst [vmem:[#allocation217_spill] sm:$0xff] %v4508_v58  ;;  %1803 = vperm.xlu1 %3140, %v4513_v27   ;;  %v4516_v12 = vpop.permute.xlu0 %883  ;;  %v3165_v58 = vld [vmem:[%s6405_s0 + $0x28] sm:$0x3f] }
 0x24c   :  { %6717 = vst [vmem:[#allocation218_spill] sm:$0xff] %v4516_v12 }
 0x24d   :  { %268 = vperm.xlu0 %3156, %v3164_v47   ;;  %v3166_v47 = vld [vmem:[%s6405_s0 + $0x48] sm:$0x3f] }
 0x24e   :  { %v4521_v33 = vpop.permute.xlu1 %1439 }
 0x24f   :  { %6718 = vst [vmem:[#allocation219_spill] sm:$0xff] %v4521_v33  ;;  %3141 = vset.pattern.permute.xlu1 %v6493_v50  ;;  %v4524_v18 = vpop.permute.xlu0 %1180 }
 0x250   :  { %6719 = vst [vmem:[#allocation220_spill] sm:$0xff] %v4524_v18  ;;  %1840 = vperm.xlu1 %3141, %v3963_v40  }
 0x251   :  { %276 = vperm.xlu0 %3156, %v3165_v58   ;;  %v3167_v58 = vld [vmem:[%s6405_s0 + $0x58] sm:$0x3f] }
 0x252   :  { %v4530_v10 = vpop.permute.xlu1 %1447 }
 0x253   :  { %6720 = vst [vmem:[#allocation221_spill] sm:$0xff] %v4530_v10  ;;  %v4532_v12 = vpop.permute.xlu0 %1192 }
 0x254   :  { %6721 = vst [vmem:[#allocation222_spill] sm:$0xff] %v4532_v12  ;;  %1848 = vperm.xlu1 %3141, %v4415_v34  }
 0x255   :  { %284 = vperm.xlu0 %3156, %v3166_v47   ;;  %v3168_v47 = vld [vmem:[%s6405_s0 + $0x68] sm:$0x3f] }
 0x256   :  { %v4538_v33 = vpop.permute.xlu1 %1455 }
 0x257   :  { %6722 = vst [vmem:[#allocation223_spill] sm:$0xff] %v4538_v33  ;;  %v4540_v18 = vpop.permute.xlu0 %1200 }
 0x258   :  { %6723 = vst [vmem:[#allocation224_spill] sm:$0xff] %v4540_v18  ;;  %1852 = vperm.xlu1 %3141, %v3974_v11  }
 0x259   :  { %292 = vperm.xlu0 %3156, %v3167_v58   ;;  %v3169_v58 = vld [vmem:[%s6405_s0 + $0x1] sm:$0x3f] }
 0x25a   :  { %v4546_v10 = vpop.permute.xlu1 %1463 }
 0x25b   :  { %6724 = vst [vmem:[#allocation225_spill] sm:$0xff] %v4546_v10  ;;  %v4548_v12 = vpop.permute.xlu0 %1208 }
 0x25c   :  { %6725 = vst [vmem:[#allocation226_spill] sm:$0xff] %v4548_v12  ;;  %1860 = vperm.xlu1 %3141, %v3985_v44  }
 0x25d   :  { %300 = vperm.xlu0 %3156, %v3168_v47   ;;  %v3170_v47 = vld [vmem:[%s6405_s0 + $0x19] sm:$0x3f] }
 0x25e   :  { %v4554_v33 = vpop.permute.xlu1 %1471 }
 0x25f   :  { %6726 = vst [vmem:[#allocation227_spill] sm:$0xff] %v4554_v33  ;;  %v4556_v18 = vpop.permute.xlu0 %1216 }
 0x260   :  { %6727 = vst [vmem:[#allocation228_spill] sm:$0xff] %v4556_v18  ;;  %1868 = vperm.xlu1 %3141, %v6694_v29  }
 0x261   :  { %588 = vperm.xlu0 %3156, %v3169_v58   ;;  %v3171_v58 = vld [vmem:[%s6405_s0 + $0x29] sm:$0x3f] }
 0x263   :  { %v4562_v10 = vpop.permute.xlu1 %1508  ;;  %v4564_v12 = vpop.permute.xlu0 %1512 }
 0x264   :  { %6728 = vst [vmem:[#allocation229_spill] sm:$0xff] %v4562_v10  ;;  %6729 = vst [vmem:[#allocation230_spill] sm:$0xff] %v4564_v12  ;;  %1876 = vperm.xlu1 %3141, %v6697_v45  }
 0x265   :  { %600 = vperm.xlu0 %3156, %v3170_v47   ;;  %v3172_v47 = vld [vmem:[%s6405_s0 + $0x49] sm:$0x3f] }
 0x267   :  { %v4570_v33 = vpop.permute.xlu1 %1516  ;;  %v4572_v18 = vpop.permute.xlu0 %1524 }
 0x268   :  { %6730 = vst [vmem:[#allocation231_spill] sm:$0xff] %v4570_v33  ;;  %6731 = vst [vmem:[#allocation232_spill] sm:$0xff] %v4572_v18  ;;  %1884 = vperm.xlu1 %3141, %v6701_v15  }
 0x269   :  { %608 = vperm.xlu0 %3156, %v3171_v58   ;;  %v3173_v58 = vld [vmem:[%s6405_s0 + $0x59] sm:$0x3f] }
 0x26b   :  { %v4578_v13 = vpop.permute.xlu1 %1520  ;;  %v4580_v12 = vpop.permute.xlu0 %1532 }
 0x26c   :  { %6732 = vst [vmem:[#allocation233_spill] sm:$0xff] %v4578_v13  ;;  %6733 = vst [vmem:[#allocation234_spill] sm:$0xff] %v4580_v12  ;;  %3142 = vset.pattern.permute.xlu1 %v6515_v54 }
 0x26d   :  { %1921 = vperm.xlu1 %3142, %v4460_v61   ;;  %616 = vperm.xlu0 %3156, %v3172_v47   ;;  %v3174_v61 = vld [vmem:[%s6405_s0 + $0x69] sm:$0x3f] }
 0x26f   :  { %v4587_v18 = vpop.permute.xlu1 %1528  ;;  %v4589_v33 = vpop.permute.xlu0 %1540 }
 0x270   :  { %6734 = vst [vmem:[#allocation235_spill] sm:$0xff] %v4587_v18  ;;  %6735 = vst [vmem:[#allocation236_spill] sm:$0xff] %v4589_v33 }
 0x271   :  { %1925 = vperm.xlu1 %3142, %v4415_v34   ;;  %624 = vperm.xlu0 %3156, %v3173_v58   ;;  %v6740_v34 = vld [vmem:[#allocation51_spill] sm:$0xff] }
 0x273   :  { %v4595_v12 = vpop.permute.xlu1 %1536  ;;  %v4597_v32 = vpop.permute.xlu0 %1548 }
 0x274   :  { %6736 = vst [vmem:[#allocation237_spill] sm:$0xff] %v4595_v12  ;;  %6737 = vst [vmem:[#allocation238_spill] sm:$0xff] %v4597_v32 }
 0x275   :  { %1933 = vperm.xlu1 %3142, %v4477_v22   ;;  %632 = vperm.xlu0 %3156, %v3174_v61   ;;  %v6743_v22 = vld [vmem:[#allocation56_spill] sm:$0xff]  ;;  %v6746_v61 = vld [vmem:[#allocation59_spill] sm:$0xff] }
 0x277   :  { %v4603_v47 = vpop.permute.xlu1 %1544  ;;  %v4605_v33 = vpop.permute.xlu0 %1844 }
 0x278   :  { %6738 = vst [vmem:[#allocation239_spill] sm:$0xff] %v4603_v47  ;;  %6739 = vst [vmem:[#allocation240_spill] sm:$0xff] %v4605_v33  ;;  %v6769_v47 = vld [vmem:[#allocation85_spill] sm:$0xff] }
 0x279   :  { %1941 = vperm.xlu1 %3142, %v4488_v26   ;;  %920 = vperm.xlu0 %3156, %v6740_v34   ;;  %v6749_v34 = vld [vmem:[#allocation62_spill] sm:$0xff] }
 0x27b   :  { %v4609_v58 = vpop.permute.xlu1 %1552  ;;  %v4611_v8 = vpop.permute.xlu0 %1856 }
 0x27c   :  { %6741 = vst [vmem:[#allocation51_spill] sm:$0xff] %v4609_v58  ;;  %6742 = vst [vmem:[#allocation241_spill] sm:$0xff] %v4611_v8  ;;  %v6750_v8 = vld [vmem:[#allocation119_spill] sm:$0xff]  ;;  %v6760_v58 = vld [vmem:[#allocation125_spill] sm:$0xff] }
 0x27d   :  { %1949 = vperm.xlu1 %3142, %v4499_v1   ;;  %932 = vperm.xlu0 %3156, %v6743_v22   ;;  %v4633_v22 = vld [vmem:[%s6405_s0 + $0x20] sm:$0x3f] }
 0x27f   :  { %v4615_v32 = vpop.permute.xlu0 %1864 }
 0x280   :  { %6744 = vst [vmem:[#allocation56_spill] sm:$0xff] %v4615_v32  ;;  %v4617_v12 = vpop.permute.xlu1 %1589 }
 0x281   :  { %6745 = vst [vmem:[#allocation242_spill] sm:$0xff] %v4617_v12  ;;  %1957 = vperm.xlu1 %3142, %v4513_v27   ;;  %940 = vperm.xlu0 %3156, %v6746_v61   ;;  %v6753_v61 = vld [vmem:[#allocation65_spill] sm:$0xff]  ;;  %v6757_v12 = vld [vmem:[#allocation122_spill] sm:$0xff] }
 0x283   :  { %v4621_v33 = vpop.permute.xlu0 %1872 }
 0x284   :  { %6747 = vst [vmem:[#allocation59_spill] sm:$0xff] %v4621_v33  ;;  %v4623_v26 = vpop.permute.xlu1 %1593 }
 0x285   :  { %6748 = vst [vmem:[#allocation243_spill] sm:$0xff] %v4623_v26  ;;  %3143 = vset.pattern.permute.xlu1 %v6529_v57  ;;  %948 = vperm.xlu0 %3156, %v6749_v34   ;;  %v6756_v34 = vld [vmem:[#allocation68_spill] sm:$0xff] }
 0x286   :  { %2008 = vperm.xlu1 %3143, %v6750_v8  }
 0x287   :  { %v4628_v1 = vpop.permute.xlu0 %1880 }
 0x288   :  { %6751 = vst [vmem:[#allocation62_spill] sm:$0xff] %v4628_v1  ;;  %v4635_v27 = vpop.permute.xlu1 %1601 }
 0x289   :  { %6752 = vst [vmem:[#allocation119_spill] sm:$0xff] %v4635_v27  ;;  %956 = vperm.xlu0 %3156, %v6753_v61  }
 0x28a   :  { %2018 = vperm.xlu1 %3143, %v4633_v22  }
 0x28b   :  { %v4639_v33 = vpop.permute.xlu0 %2177 }
 0x28c   :  { %6754 = vst [vmem:[#allocation65_spill] sm:$0xff] %v4639_v33  ;;  %v4641_v32 = vpop.permute.xlu1 %1609  ;;  %v6763_v33 = vld [vmem:[#allocation127_spill] sm:$0xff] }
 0x28d   :  { %6755 = vst [vmem:[#allocation244_spill] sm:$0xff] %v4641_v32  ;;  %964 = vperm.xlu0 %3156, %v6756_v34  }
 0x28e   :  { %2023 = vperm.xlu1 %3143, %v6757_v12  }
 0x28f   :  { %v4645_v1 = vpop.permute.xlu0 %2189 }
 0x290   :  { %6758 = vst [vmem:[#allocation68_spill] sm:$0xff] %v4645_v1  ;;  %v4647_v26 = vpop.permute.xlu1 %1617  ;;  %v6766_v1 = vld [vmem:[#allocation130_spill] sm:$0xff] }
 0x291   :  { %6759 = vst [vmem:[#allocation122_spill] sm:$0xff] %v4647_v26  ;;  %1253 = vperm.xlu0 %3156, %v3830_v56  }
 0x292   :  { %2033 = vperm.xlu1 %3143, %v6760_v58  }
 0x293   :  { %v4651_v27 = vpop.permute.xlu0 %2197 }
 0x294   :  { %6761 = vst [vmem:[#allocation125_spill] sm:$0xff] %v4651_v27  ;;  %v4653_v61 = vpop.permute.xlu1 %1625  ;;  %v6770_v27 = vld [vmem:[#allocation133_spill] sm:$0xff] }
 0x295   :  { %6762 = vst [vmem:[#allocation245_spill] sm:$0xff] %v4653_v61  ;;  %1265 = vperm.xlu0 %3156, %v3841_v59  }
 0x296   :  { %2043 = vperm.xlu1 %3143, %v6763_v33  }
 0x297   :  { %v4657_v32 = vpop.permute.xlu0 %2205 }
 0x298   :  { %6764 = vst [vmem:[#allocation127_spill] sm:$0xff] %v4657_v32 }
 0x299   :  { %v4659_v34 = vpop.permute.xlu1 %1675  ;;  %1273 = vperm.xlu0 %3156, %v3852_v5   ;;  %v4678_v5 = vld [vmem:[%s6405_s0 + $0x18] sm:$0x3f] }
 0x29a   :  { %6765 = vst [vmem:[#allocation246_spill] sm:$0xff] %v4659_v34  ;;  %2053 = vperm.xlu1 %3143, %v6766_v1  }
 0x29b   :  { %v4663_v26 = vpop.permute.xlu0 %2213 }
 0x29c   :  { %6767 = vst [vmem:[#allocation130_spill] sm:$0xff] %v4663_v26 }
 0x29d   :  { %v4665_v56 = vpop.permute.xlu1 %1685  ;;  %1281 = vperm.xlu0 %3156, %v6769_v47  }
 0x29e   :  { %6768 = vst [vmem:[#allocation247_spill] sm:$0xff] %v4665_v56  ;;  %2063 = vperm.xlu1 %3143, %v6770_v27  }
 0x29f   :  { %v4669_v61 = vpop.permute.xlu0 %2509 }
 0x2a0   :  { %6771 = vst [vmem:[#allocation85_spill] sm:$0xff] %v4669_v61  ;;  %v4695_v61 = vld [vmem:[%s6405_s0 + $0x30] sm:$0x3f] }
 0x2a1   :  { %v4671_v59 = vpop.permute.xlu1 %1690  ;;  %1289 = vperm.xlu0 %3156, %v3875_v48  }
 0x2a2   :  { %6772 = vst [vmem:[#allocation133_spill] sm:$0xff] %v4671_v59  ;;  %3144 = vset.pattern.permute.xlu1 %v6513_v51 }
 0x2a3   :  { %2100 = vperm.xlu1 %3144, %v4678_v5   ;;  %v4681_v26 = vpop.permute.xlu0 %2521 }
 0x2a4   :  { %6773 = vst [vmem:[#allocation248_spill] sm:$0xff] %v4681_v26 }
 0x2a5   :  { %v4683_v47 = vpop.permute.xlu1 %1700  ;;  %1297 = vperm.xlu0 %3156, %v3886_v46   ;;  %v4706_v46 = vld [vmem:[%s6405_s0 + $0x50] sm:$0x3f] }
 0x2a6   :  { %6774 = vst [vmem:[#allocation249_spill] sm:$0xff] %v4683_v47 }
 0x2a7   :  { %2104 = vperm.xlu1 %3144, %v4633_v22   ;;  %v4687_v32 = vpop.permute.xlu0 %2529 }
 0x2a8   :  { %6775 = vst [vmem:[#allocation250_spill] sm:$0xff] %v4687_v32 }
 0x2a9   :  { %v4689_v48 = vpop.permute.xlu1 %1710  ;;  %1585 = vperm.xlu0 %3156, %v3897_v53  }
 0x2aa   :  { %6776 = vst [vmem:[#allocation251_spill] sm:$0xff] %v4689_v48 }
 0x2ab   :  { %2112 = vperm.xlu1 %3144, %v4695_v61   ;;  %v4698_v26 = vpop.permute.xlu0 %2537 }
 0x2ac   :  { %6777 = vst [vmem:[#allocation252_spill] sm:$0xff] %v4698_v26  ;;  %v4717_v26 = vld [vmem:[%s6405_s0 + $0x60] sm:$0x3f] }
 0x2ad   :  { %v4700_v56 = vpop.permute.xlu1 %1720  ;;  %1597 = vperm.xlu0 %3156, %v3908_v3  }
 0x2ae   :  { %6778 = vst [vmem:[#allocation253_spill] sm:$0xff] %v4700_v56 }
 0x2af   :  { %2120 = vperm.xlu1 %3144, %v4706_v46   ;;  %v4709_v53 = vpop.permute.xlu0 %2545 }
 0x2b0   :  { %6779 = vst [vmem:[#allocation254_spill] sm:$0xff] %v4709_v53  ;;  %v4728_v53 = vld [vmem:[%s6405_s0 + $0x70] sm:$0x3f] }
 0x2b1   :  { %v4711_v32 = vpop.permute.xlu1 %1730  ;;  %1605 = vperm.xlu0 %3156, %v3919_v0  }
 0x2b2   :  { %6780 = vst [vmem:[#allocation255_spill] sm:$0xff] %v4711_v32  ;;  %v6799_v32 = vld [vmem:[#allocation111_spill] sm:$0xff] }
 0x2b3   :  { %2128 = vperm.xlu1 %3144, %v4717_v26   ;;  %v4720_v3 = vpop.permute.xlu0 %2841 }
 0x2b4   :  { %6781 = vst [vmem:[#allocation256_spill] sm:$0xff] %v4720_v3 }
 0x2b5   :  { %1613 = vperm.xlu0 %3156, %v3930_v36  }
 0x2b6   :  { %v4723_v59 = vpop.permute.xlu1 %1767 }
 0x2b7   :  { %6782 = vst [vmem:[#allocation257_spill] sm:$0xff] %v4723_v59  ;;  %2136 = vperm.xlu1 %3144, %v4728_v53   ;;  %v4731_v0 = vpop.permute.xlu0 %2853 }
 0x2b8   :  { %6783 = vst [vmem:[#allocation258_spill] sm:$0xff] %v4731_v0 }
 0x2b9   :  { %1621 = vperm.xlu0 %3156, %v3941_v38  }
 0x2ba   :  { %v4734_v34 = vpop.permute.xlu1 %1771 }
 0x2bb   :  { %6784 = vst [vmem:[#allocation259_spill] sm:$0xff] %v4734_v34  ;;  %3145 = vset.pattern.permute.xlu1 %v6493_v50  ;;  %v4737_v3 = vpop.permute.xlu0 %2861  ;;  %v6810_v50 = vld [vmem:[#allocation117_spill] sm:$0xff] }
 0x2bc   :  { %6785 = vst [vmem:[#allocation260_spill] sm:$0xff] %v4737_v3  ;;  %2173 = vperm.xlu1 %3145, %v6750_v8  }
 0x2bd   :  { %1629 = vperm.xlu0 %3156, %v3952_v2  }
 0x2be   :  { %v4741_v36 = vpop.permute.xlu1 %1779 }
 0x2bf   :  { %6786 = vst [vmem:[#allocation261_spill] sm:$0xff] %v4741_v36  ;;  %v4743_v59 = vpop.permute.xlu0 %2869  ;;  %v4780_v36 = vld [vmem:[%s6406_s1] ss:$0 sm:$0xff] }
 0x2c0   :  { %6787 = vst [vmem:[#allocation262_spill] sm:$0xff] %v4743_v59  ;;  %2181 = vperm.xlu1 %3145, %v4633_v22  }
 0x2c1   :  { %1917 = vperm.xlu0 %3156, %v3963_v40  }
 0x2c2   :  { %v4747_v0 = vpop.permute.xlu1 %1787 }
 0x2c3   :  { %6788 = vst [vmem:[#allocation263_spill] sm:$0xff] %v4747_v0  ;;  %v4749_v38 = vpop.permute.xlu0 %2877 }
 0x2c4   :  { %6789 = vst [vmem:[#allocation264_spill] sm:$0xff] %v4749_v38  ;;  %2185 = vperm.xlu1 %3145, %v6757_v12  }
 0x2c5   :  { %1929 = vperm.xlu0 %3156, %v3974_v11   ;;  %v4768_v11 = vld [vmem:[%s6406_s1 + $0x1] ss:$0 sm:$0xff] }
 0x2c6   :  { %v4753_v3 = vpop.permute.xlu1 %1795  ;;  %6793 = vst [vmem:[#allocation268_spill] sm:$0xff] %v4768_v11  ;;  %v156_v56 = vmul.f32 %v4768_v11, %v6799_v32  ;;  %v158_v18 = vmul.f32 %v4768_v11, %v6803_v35 }
 0x2c7   :  { %6790 = vst [vmem:[#allocation265_spill] sm:$0xff] %v4753_v3 }
 0x2c8   :  { %2193 = vperm.xlu1 %3145, %v6760_v58   ;;  %v257_v2 = vpop.permute.xlu0 %256 }
 0x2c9   :  { %1937 = vperm.xlu0 %3156, %v3985_v44  }
 0x2ca   :  { %v4757_v59 = vpop.permute.xlu1 %1803 }
 0x2cb   :  { %6791 = vst [vmem:[#allocation266_spill] sm:$0xff] %v4757_v59  ;;  %v6795_v59 = vld [vmem:[#allocation108_spill] sm:$0xff] }
 0x2cc   :  { %2201 = vperm.xlu1 %3145, %v6763_v33   ;;  %v269_v40 = vpop.permute.xlu0 %268  ;;  %v153_v3 = vmul.f32 %v4768_v11, %v6795_v59  ;;  %6796 = vst [vmem:[#allocation108_spill] sm:$0xff] %v4780_v36 }
 0x2cd   :  { %1945 = vperm.xlu0 %3156, %v6694_v29  }
 0x2cf   :  { %v4761_v0 = vpop.permute.xlu1 %1840 }
 0x2d0   :  { %6792 = vst [vmem:[#allocation267_spill] sm:$0xff] %v4761_v0  ;;  %2209 = vperm.xlu1 %3145, %v6766_v1   ;;  %v277_v38 = vpop.permute.xlu0 %276 }
 0x2d1   :  { %1953 = vperm.xlu0 %3156, %v6697_v45   ;;  %v6797_v45 = vld [vmem:[#allocation3_spill] sm:$0xff] }
 0x2d2   :  { %v88_v34 = vmul.f32 %v4780_v36, %v6797_v45  ;;  %v6800_v45 = vld [vmem:[#allocation4_spill] sm:$0xff] }
 0x2d3   :  { %v4770_v44 = vpop.permute.xlu1 %1848 }
 0x2d4   :  { %6794 = vst [vmem:[#allocation269_spill] sm:$0xff] %v4770_v44  ;;  %2217 = vperm.xlu1 %3145, %v6770_v27   ;;  %v4775_v29 = vpop.permute.xlu0 %284  ;;  %v4788_v44 = vld [vmem:[%s6406_s1 + $0x2] ss:$0 sm:$0xff]  ;;  %v165_v0 = vadd.f32 %v153_v3, %v88_v34 }
 0x2d5   :  { %1961 = vperm.xlu0 %3156, %v6701_v15   ;;  %v4800_v15 = vld [vmem:[%s6406_s1 + $0x3] ss:$0 sm:$0xff] }
 0x2d6   :  { %v6801_v34 = vld [vmem:[#allocation34_spill] sm:$0xff]  ;;  %v307_v32 = vmul.f32 %v4800_v15, %v257_v2  ;;  %v310_v35 = vmul.f32 %v4800_v15, %v269_v40 }
 0x2d7   :  { %v4790_v59 = vpop.permute.xlu1 %1852  ;;  %v230_v3 = vmul.f32 %v4788_v44, %v6801_v34 }
 0x2d8   :  { %6798 = vst [vmem:[#allocation3_spill] sm:$0xff] %v4790_v59  ;;  %3146 = vset.pattern.permute.xlu1 %v6515_v54  ;;  %v4795_v48 = vpop.permute.xlu0 %292  ;;  %v91_v59 = vmul.f32 %v4780_v36, %v6800_v45  ;;  %v6805_v45 = vld [vmem:[#allocation39_spill] sm:$0xff] }
 0x2d9   :  { %2254 = vperm.xlu1 %3146, %v4678_v5   ;;  %2250 = vperm.xlu0 %3156, %v6750_v8   ;;  %v242_v55 = vadd.f32 %v230_v3, %v165_v0  ;;  %v4816_v8 = vld [vmem:[%s6406_s1 + $0x4] ss:$0 sm:$0xff]  ;;  %v6806_v0 = vld [vmem:[#allocation123_spill] sm:$0xff] }
 0x2da   :  { %v168_v54 = vadd.f32 %v156_v56, %v91_v59  ;;  %v6804_v5 = vld [vmem:[#allocation6_spill] sm:$0xff]  ;;  %v233_v56 = vmul.f32 %v4788_v44, %v6805_v45  ;;  %v164_v34 = vmul.f32 %v4768_v11, %v6806_v0  ;;  %v160_v45 = vmul.f32 %v4768_v11, %v6810_v50 }
 0x2db   :  { %v4809_v47 = vpop.permute.xlu1 %1860  ;;  %v93_v2 = vmul.f32 %v4780_v36, %v6804_v5  ;;  %v319_v59 = vadd.f32 %v307_v32, %v242_v55  ;;  %v99_v5 = vmul.f32 %v4780_v36, %v6809_v14  ;;  %v6811_v55 = vld [vmem:[#allocation41_spill] sm:$0xff]  ;;  %v312_v50 = vmul.f32 %v4800_v15, %v277_v38  ;;  %v6817_v38 = vld [vmem:[#allocation120_spill] sm:$0xff] }
 0x2dc   :  { %6802 = vst [vmem:[#allocation111_spill] sm:$0xff] %v4809_v47  ;;  %v301_v7 = vpop.permute.xlu0 %300  ;;  %v6808_v47 = vld [vmem:[#allocation66_spill] sm:$0xff]  ;;  %v245_v52 = vadd.f32 %v233_v56, %v168_v54  ;;  %v235_v40 = vmul.f32 %v4788_v44, %v6811_v55 }
 0x2dd   :  { %2258 = vperm.xlu1 %3146, %v4633_v22   ;;  %2262 = vperm.xlu0 %3156, %v6757_v12   ;;  %v408_v13 = vmul.f32 %v4816_v8, %v6808_v47  ;;  %v170_v22 = vadd.f32 %v158_v18, %v93_v2  ;;  %v4844_v54 = vld [vmem:[%s6406_s1 + $0x5] ss:$0 sm:$0xff]  ;;  %v176_v14 = vadd.f32 %v164_v34, %v99_v5  ;;  %v6815_v2 = vld [vmem:[#allocation71_spill] sm:$0xff] }
 0x2de   :  { %v322_v0 = vadd.f32 %v310_v35, %v245_v52  ;;  %v6816_v52 = vld [vmem:[#allocation126_spill] sm:$0xff]  ;;  %v162_v5 = vmul.f32 %v4768_v11, %v6817_v38  ;;  %v318_v55 = vmul.f32 %v4800_v15, %v301_v7  ;;  %v314_v7 = vmul.f32 %v4800_v15, %v4775_v29  ;;  %v6824_v29 = vld [vmem:[#allocation45_spill] sm:$0xff] }
 0x2df   :  { %v4827_v3 = vpop.permute.xlu1 %1868  ;;  %v420_v32 = vadd.f32 %v408_v13, %v319_v59  ;;  %v411_v13 = vmul.f32 %v4816_v8, %v6815_v2  ;;  %v485_v56 = vmul.f32 %v4844_v54, %v6816_v52  ;;  %v247_v59 = vadd.f32 %v235_v40, %v170_v22  ;;  %v6819_v52 = vld [vmem:[#allocation43_spill] sm:$0xff] }
 0x2e0   :  { %6807 = vst [vmem:[#allocation4_spill] sm:$0xff] %v4827_v3  ;;  %v589_v12 = vpop.permute.xlu0 %588  ;;  %v6812_v3 = vld [vmem:[#allocation8_spill] sm:$0xff] }
 0x2e1   :  { %2266 = vperm.xlu1 %3146, %v4695_v61   ;;  %2270 = vperm.xlu0 %3156, %v6760_v58   ;;  %v95_v18 = vmul.f32 %v4780_v36, %v6812_v3  ;;  %v6814_v61 = vld [vmem:[#allocation47_spill] sm:$0xff]  ;;  %v4858_v3 = vld [vmem:[%s6406_s1 + $0x6] ss:$0 sm:$0xff]  ;;  %v423_v22 = vadd.f32 %v411_v13, %v322_v0  ;;  %v497_v40 = vadd.f32 %v485_v56, %v420_v32  ;;  %v6823_v13 = vld [vmem:[#allocation129_spill] sm:$0xff] }
 0x2e2   :  { %v241_v58 = vmul.f32 %v4788_v44, %v6814_v61  ;;  %v6818_v61 = vld [vmem:[#allocation10_spill] sm:$0xff]  ;;  %v6822_v0 = vld [vmem:[#allocation95_spill] sm:$0xff]  ;;  %v488_v56 = vmul.f32 %v4844_v54, %v6823_v13 }
 0x2e3   :  { %v4847_v47 = vpop.permute.xlu1 %1876  ;;  %v172_v34 = vadd.f32 %v160_v45, %v95_v18  ;;  %v97_v2 = vmul.f32 %v4780_v36, %v6818_v61  ;;  %v4872_v45 = vld [vmem:[%s6406_s1 + $0x7] ss:$0 sm:$0xff]  ;;  %v324_v18 = vadd.f32 %v312_v50, %v247_v59  ;;  %v562_v32 = vmul.f32 %v4858_v3, %v6822_v0 }
 0x2e4   :  { %6813 = vst [vmem:[#allocation34_spill] sm:$0xff] %v4847_v47  ;;  %v601_v35 = vpop.permute.xlu0 %600  ;;  %v237_v47 = vmul.f32 %v4788_v44, %v6819_v52  ;;  %v639_v52 = vmul.f32 %v4872_v45, %v589_v12  ;;  %v316_v12 = vmul.f32 %v4800_v15, %v4795_v48 }
 0x2e5   :  { %2274 = vperm.xlu1 %3146, %v4706_v46   ;;  %2278 = vperm.xlu0 %3156, %v6763_v33   ;;  %v253_v46 = vadd.f32 %v241_v58, %v176_v14  ;;  %v6821_v33 = vld [vmem:[#allocation73_spill] sm:$0xff]  ;;  %v174_v11 = vadd.f32 %v162_v5, %v97_v2  ;;  %v239_v14 = vmul.f32 %v4788_v44, %v6824_v29  ;;  %v6826_v5 = vld [vmem:[#allocation75_spill] sm:$0xff] }
 0x2e6   :  { %v413_v61 = vmul.f32 %v4816_v8, %v6821_v33  ;;  %v249_v50 = vadd.f32 %v237_v47, %v172_v34  ;;  %v574_v58 = vadd.f32 %v562_v32, %v497_v40  ;;  %v500_v33 = vadd.f32 %v488_v56, %v423_v22  ;;  %v6827_v34 = vld [vmem:[#allocation99_spill] sm:$0xff]  ;;  %v6831_v32 = vld [vmem:[#allocation140_spill] sm:$0xff] }
 0x2e7   :  { %v4876_v38 = vpop.permute.xlu1 %1884  ;;  %v330_v59 = vadd.f32 %v318_v55, %v253_v46  ;;  %v415_v47 = vmul.f32 %v4816_v8, %v6826_v5  ;;  %v642_v55 = vmul.f32 %v4872_v45, %v601_v35  ;;  %v4903_v40 = vld [vmem:[%s6406_s1 + $0x8] ss:$0 sm:$0xff]  ;;  %v496_v56 = vmul.f32 %v4844_v54, %v6831_v32  ;;  %v4949_v32 = vld [vmem:[%s6405_s0 + $0x21] sm:$0x3f] }
 0x2e8   :  { %6820 = vst [vmem:[#allocation114_spill] sm:$0xff] %v4876_v38  ;;  %v609_v36 = vpop.permute.xlu0 %608  ;;  %v6825_v38 = vld [vmem:[#allocation79_spill] sm:$0xff]  ;;  %v425_v10 = vadd.f32 %v413_v61, %v324_v18  ;;  %v326_v13 = vadd.f32 %v314_v7, %v249_v50  ;;  %v6829_v18 = vld [vmem:[#allocation132_spill] sm:$0xff]  ;;  %v251_v7 = vadd.f32 %v239_v14, %v174_v11 }
 0x2e9   :  { %2282 = vperm.xlu1 %3146, %v4717_v26   ;;  %2286 = vperm.xlu0 %3156, %v6766_v1   ;;  %v419_v0 = vmul.f32 %v4816_v8, %v6825_v38  ;;  %v565_v26 = vmul.f32 %v4858_v3, %v6827_v34  ;;  %v651_v1 = vadd.f32 %v639_v52, %v574_v58  ;;  %v6830_v38 = vld [vmem:[#allocation128_spill] sm:$0xff]  ;;  %v6832_v58 = vld [vmem:[#allocation77_spill] sm:$0xff] }
 0x2ea   :  { %v490_v48 = vmul.f32 %v4844_v54, %v6829_v18  ;;  %v740_v35 = vmul.f32 %v4903_v40, %v6830_v38  ;;  %v427_v52 = vadd.f32 %v415_v47, %v326_v13  ;;  %v328_v50 = vadd.f32 %v316_v12, %v251_v7  ;;  %v6833_v34 = vld [vmem:[#allocation101_spill] sm:$0xff]  ;;  %v4924_v13 = vld [vmem:[%s6406_s1 + $0x9] ss:$0 sm:$0xff]  ;;  %v6836_v12 = vld [vmem:[#allocation136_spill] sm:$0xff] }
 0x2eb   :  { %v431_v46 = vadd.f32 %v419_v0, %v330_v59  ;;  %v577_v61 = vadd.f32 %v565_v26, %v500_v33  ;;  %v417_v5 = vmul.f32 %v4816_v8, %v6832_v58  ;;  %v567_v11 = vmul.f32 %v4858_v3, %v6833_v34  ;;  %v6835_v0 = vld [vmem:[#allocation135_spill] sm:$0xff]  ;;  %v6837_v26 = vld [vmem:[#allocation134_spill] sm:$0xff] }
 0x2ec   :  { %v4898_v2 = vpop.permute.xlu1 %1921  ;;  %v617_v22 = vpop.permute.xlu0 %616  ;;  %v502_v29 = vadd.f32 %v490_v48, %v425_v10  ;;  %v752_v59 = vadd.f32 %v740_v35, %v651_v1  ;;  %v492_v33 = vmul.f32 %v4844_v54, %v6835_v0  ;;  %v644_v10 = vmul.f32 %v4872_v45, %v609_v36  ;;  %v4936_v48 = vld [vmem:[%s6405_s0 + $0x11] sm:$0x3f]  ;;  %v6839_v7 = vld [vmem:[#allocation107_spill] sm:$0xff]  ;;  %v6842_v34 = vld [vmem:[#allocation138_spill] sm:$0xff] }
 0x2ed   :  { %6828 = vst [vmem:[#allocation6_spill] sm:$0xff] %v4898_v2  ;;  %2290 = vperm.xlu1 %3146, %v4728_v53   ;;  %2294 = vperm.xlu0 %3156, %v6770_v27   ;;  %v654_v53 = vadd.f32 %v642_v55, %v577_v61  ;;  %v508_v47 = vadd.f32 %v496_v56, %v431_v46  ;;  %v6838_v55 = vld [vmem:[#allocation142_spill] sm:$0xff]  ;;  %v4944_v46 = vld [vmem:[%s6406_s1 + $0xa] ss:$0 sm:$0xff] }
 0x2ee   :  { %v743_v1 = vmul.f32 %v4903_v40, %v6837_v26  ;;  %v817_v18 = vmul.f32 %v4924_v13, %v6838_v55  ;;  %v573_v36 = vmul.f32 %v4858_v3, %v6839_v7  ;;  %6840 = vst [vmem:[#allocation123_spill] sm:$0xff] %v4944_v46  ;;  %v429_v38 = vadd.f32 %v417_v5, %v328_v50  ;;  %v6841_v56 = vld [vmem:[#allocation103_spill] sm:$0xff] }
 0x2ef   :  { %v579_v35 = vadd.f32 %v567_v11, %v502_v29  ;;  %v504_v61 = vadd.f32 %v492_v33, %v427_v52  ;;  %v569_v58 = vmul.f32 %v4858_v3, %v6841_v56  ;;  %v494_v0 = vmul.f32 %v4844_v54, %v6842_v34  ;;  %v4962_v5 = vld [vmem:[%s6405_s0 + $0x29] sm:$0x3f]  ;;  %v6844_v11 = vld [vmem:[#allocation144_spill] sm:$0xff] }
 0x2f0   :  { %v4917_v14 = vpop.permute.xlu1 %1925  ;;  %v625_v27 = vpop.permute.xlu0 %624  ;;  %v829_v7 = vadd.f32 %v817_v18, %v752_v59  ;;  %v646_v50 = vmul.f32 %v4872_v45, %v617_v22  ;;  %v585_v52 = vadd.f32 %v573_v36, %v508_v47  ;;  %v894_v33 = vmul.f32 %v4944_v46, %v4186_v30  ;;  %v6845_v59 = vld [vmem:[#allocation137_spill] sm:$0xff] }
 0x2f1   :  { %6834 = vst [vmem:[#allocation39_spill] sm:$0xff] %v4917_v14  ;;  %3147 = vset.pattern.permute.xlu1 %v6529_v57  ;;  %2582 = vperm.xlu0 %3156, %v6836_v12   ;;  %v755_v12 = vadd.f32 %v743_v1, %v654_v53  ;;  %v656_v2 = vadd.f32 %v644_v10, %v579_v35  ;;  %v6846_v18 = vld [vmem:[#allocation105_spill] sm:$0xff]  ;;  %v4977_v35 = vld [vmem:[%s6406_s1 + $0xb] ss:$0 sm:$0xff] }
 0x2f2   :  { %2340 = vperm.xlu1 %3147, %v4936_v48   ;;  %v820_v53 = vmul.f32 %v4924_v13, %v6844_v11  ;;  %v745_v22 = vmul.f32 %v4903_v40, %v6845_v59  ;;  %v581_v10 = vadd.f32 %v569_v58, %v504_v61  ;;  %v506_v47 = vadd.f32 %v494_v0, %v429_v38  ;;  %v4986_v61 = vld [vmem:[%s6405_s0 + $0x39] sm:$0x3f]  ;;  %v6848_v0 = vld [vmem:[#allocation139_spill] sm:$0xff] }
 0x2f3   :  { %v571_v36 = vmul.f32 %v4858_v3, %v6846_v18  ;;  %v906_v34 = vadd.f32 %v894_v33, %v829_v7  ;;  %v648_v59 = vmul.f32 %v4872_v45, %v625_v27  ;;  %v897_v58 = vmul.f32 %v4944_v46, %v4199_v9  ;;  %v5002_v9 = vld [vmem:[%s6405_s0 + $0x59] sm:$0x3f] }
 0x2f4   :  { %v4955_v26 = vpop.permute.xlu1 %1933  ;;  %v633_v55 = vpop.permute.xlu0 %632  ;;  %v757_v11 = vadd.f32 %v745_v22, %v656_v2  ;;  %v747_v2 = vmul.f32 %v4903_v40, %v6848_v0 }
 0x2f5   :  { %6843 = vst [vmem:[#allocation66_spill] sm:$0xff] %v4955_v26  ;;  %v650_v29 = vmul.f32 %v4872_v45, %v633_v55  ;;  %2594 = vperm.xlu0 %3156, %v4962_v5   ;;  %v832_v55 = vadd.f32 %v820_v53, %v755_v12  ;;  %v658_v26 = vadd.f32 %v646_v50, %v581_v10  ;;  %v6849_v12 = vld [vmem:[#allocation146_spill] sm:$0xff] }
 0x2f6   :  { %2350 = vperm.xlu1 %3147, %v4949_v32   ;;  %v822_v27 = vmul.f32 %v4924_v13, %v6849_v12  ;;  %v583_v7 = vadd.f32 %v571_v36, %v506_v47  ;;  %v6851_v47 = vld [vmem:[#allocation141_spill] sm:$0xff] }
 0x2f7   :  { %v662_v1 = vadd.f32 %v650_v29, %v585_v52  ;;  %v909_v29 = vadd.f32 %v897_v58, %v832_v55  ;;  %v759_v33 = vadd.f32 %v747_v2, %v658_v26  ;;  %v749_v36 = vmul.f32 %v4903_v40, %v6851_v47 }
 0x2f8   :  { %v4979_v56 = vpop.permute.xlu1 %1941  ;;  %v921_v30 = vpop.permute.xlu0 %920  ;;  %v660_v22 = vadd.f32 %v648_v59, %v583_v7  ;;  %v834_v18 = vadd.f32 %v822_v27, %v757_v11  ;;  %v899_v26 = vmul.f32 %v4944_v46, %v4207_v62  ;;  %v5018_v11 = vld [vmem:[%s6405_s0 + $0x69] sm:$0x3f]  ;;  %v6855_v7 = vld [vmem:[#allocation150_spill] sm:$0xff] }
 0x2f9   :  { %6847 = vst [vmem:[#allocation12_spill] sm:$0xff] %v4979_v56  ;;  %v971_v38 = vmul.f32 %v4977_v35, %v921_v30  ;;  %2602 = vperm.xlu0 %3156, %v4986_v61   ;;  %v6854_v27 = vld [vmem:[#allocation143_spill] sm:$0xff] }
 0x2fa   :  { %2355 = vperm.xlu1 %3147, %v4962_v5   ;;  %v761_v58 = vadd.f32 %v749_v36, %v660_v22  ;;  %v911_v0 = vadd.f32 %v899_v26, %v834_v18  ;;  %v751_v62 = vmul.f32 %v4903_v40, %v6854_v27 }
 0x2fb   :  { %v983_v50 = vadd.f32 %v971_v38, %v906_v34  ;;  %v6852_v34 = vld [vmem:[#allocation148_spill] sm:$0xff] }
 0x2fc   :  { %v4996_v52 = vpop.permute.xlu1 %1949  ;;  %v933_v53 = vpop.permute.xlu0 %932  ;;  %v824_v30 = vmul.f32 %v4924_v13, %v6852_v34  ;;  %v763_v18 = vadd.f32 %v751_v62, %v662_v1  ;;  %v6857_v1 = vld [vmem:[#allocation152_spill] sm:$0xff] }
 0x2fd   :  { %6850 = vst [vmem:[#allocation117_spill] sm:$0xff] %v4996_v52  ;;  %v974_v10 = vmul.f32 %v4977_v35, %v933_v53  ;;  %2610 = vperm.xlu0 %3156, %v5002_v9   ;;  %v901_v53 = vmul.f32 %v4944_v46, %v4213_v63  ;;  %v5040_v63 = vld [vmem:[%s6406_s1 + $0xc] ss:$0 sm:$0xff]  ;;  %v828_v26 = vmul.f32 %v4924_v13, %v6857_v1 }
 0x2fe   :  { %2365 = vperm.xlu1 %3147, %v4986_v61   ;;  %v836_v12 = vadd.f32 %v824_v30, %v759_v33  ;;  %v5034_v33 = vld [vmem:[%s6405_s0 + $0x79] sm:$0x3f] }
 0x2ff   :  { %v986_v55 = vadd.f32 %v974_v10, %v909_v29  ;;  %v826_v29 = vmul.f32 %v4924_v13, %v6855_v7 }
 0x300   :  { %v5012_v59 = vpop.permute.xlu1 %1957  ;;  %v941_v38 = vpop.permute.xlu0 %940  ;;  %v913_v47 = vadd.f32 %v901_v53, %v836_v12  ;;  %v840_v53 = vadd.f32 %v828_v26, %v763_v18  ;;  %v5073_v18 = vld [vmem:[%s6406_s1 + $0xe] ss:$0 sm:$0xff] }
 0x301   :  { %6853 = vst [vmem:[#allocation41_spill] sm:$0xff] %v5012_v59  ;;  %v976_v2 = vmul.f32 %v4977_v35, %v941_v38  ;;  %2618 = vperm.xlu0 %3156, %v5018_v11   ;;  %v838_v30 = vadd.f32 %v826_v29, %v761_v58  ;;  %v903_v38 = vmul.f32 %v4944_v46, %v4219_v4  ;;  %v5055_v29 = vld [vmem:[%s6405_s0 + $0x12] sm:$0x3f]  ;;  %v5061_v4 = vld [vmem:[%s6406_s1 + $0xd] ss:$0 sm:$0xff]  ;;  %6861 = vst [vmem:[#allocation126_spill] sm:$0xff] %v5073_v18 }
 0x302   :  { %2375 = vperm.xlu1 %3147, %v5002_v9   ;;  %6859 = vst [vmem:[#allocation71_spill] sm:$0xff] %v5055_v29 }
 0x303   :  { %v988_v22 = vadd.f32 %v976_v2, %v911_v0  ;;  %v1073_v0 = vmul.f32 %v5040_v63, %v4274_v17  ;;  %v915_v58 = vadd.f32 %v903_v38, %v838_v30  ;;  %v6860_v17 = vld [vmem:[#allocation154_spill] sm:$0xff] }
 0x304   :  { %v949_v10 = vpop.permute.xlu0 %948 }
 0x305   :  { %v978_v36 = vmul.f32 %v4977_v35, %v949_v10  ;;  %v5029_v34 = vpop.permute.xlu1 %2008  ;;  %2626 = vperm.xlu0 %3156, %v5034_v33   ;;  %v1085_v27 = vadd.f32 %v1073_v0, %v983_v50  ;;  %v1150_v50 = vmul.f32 %v5061_v4, %v6860_v17  ;;  %v905_v10 = vmul.f32 %v4944_v46, %v4225_v6  ;;  %v5081_v6 = vld [vmem:[%s6405_s0 + $0x2a] sm:$0x3f]  ;;  %v5094_v17 = vld [vmem:[%s6405_s0 + $0x19] sm:$0x3f] }
 0x306   :  { %6856 = vst [vmem:[#allocation8_spill] sm:$0xff] %v5029_v34  ;;  %2385 = vperm.xlu1 %3147, %v5018_v11   ;;  %v6876_v34 = vmov 2  }
 0x307   :  { %v990_v2 = vadd.f32 %v978_v36, %v913_v47  ;;  %v1076_v47 = vmul.f32 %v5040_v63, %v4286_v19  ;;  %v917_v26 = vadd.f32 %v905_v10, %v840_v53  ;;  %v1162_v19 = vadd.f32 %v1150_v50, %v1085_v27  ;;  %v5100_v27 = vld [vmem:[%s6406_s1 + $0xf] ss:$0 sm:$0xff] }
 0x308   :  { %v957_v12 = vpop.permute.xlu0 %956  ;;  %6864 = vst [vmem:[#allocation10_spill] sm:$0xff] %v5100_v27 }
 0x309   :  { %v980_v62 = vmul.f32 %v4977_v35, %v957_v12  ;;  %v5050_v7 = vpop.permute.xlu1 %2018  ;;  %2914 = vperm.xlu0 %3156, %v5055_v29   ;;  %v1088_v1 = vadd.f32 %v1076_v47, %v986_v55  ;;  %v6863_v12 = vld [vmem:[#allocation156_spill] sm:$0xff]  ;;  %v1078_v55 = vmul.f32 %v5040_v63, %v4293_v42 }
 0x30a   :  { %6858 = vst [vmem:[#allocation47_spill] sm:$0xff] %v5050_v7  ;;  %2395 = vperm.xlu1 %3147, %v5034_v33  }
 0x30b   :  { %v992_v36 = vadd.f32 %v980_v62, %v915_v58  ;;  %v1153_v58 = vmul.f32 %v5061_v4, %v6863_v12  ;;  %v1227_v62 = vmul.f32 %v5073_v18, %v4356_v23  ;;  %v1090_v10 = vadd.f32 %v1078_v55, %v988_v22  ;;  %v5108_v23 = vld [vmem:[%s6405_s0 + $0x3a] sm:$0x3f] }
 0x30c   :  { %v965_v30 = vpop.permute.xlu0 %964  ;;  %v1080_v12 = vmul.f32 %v5040_v63, %v4299_v16  ;;  %v1230_v22 = vmul.f32 %v5073_v18, %v4368_v28 }
 0x30d   :  { %v982_v38 = vmul.f32 %v4977_v35, %v965_v30  ;;  %v5076_v0 = vpop.permute.xlu1 %2023  ;;  %2926 = vperm.xlu0 %3156, %v5081_v6   ;;  %v1239_v47 = vadd.f32 %v1227_v62, %v1162_v19 }
 0x30e   :  { %6862 = vst [vmem:[#allocation120_spill] sm:$0xff] %v5076_v0  ;;  %3148 = vset.pattern.permute.xlu1 %v6513_v51  ;;  %v1092_v62 = vadd.f32 %v1080_v12, %v990_v2  ;;  %v1232_v2 = vmul.f32 %v5073_v18, %v4375_v37 }
 0x30f   :  { %v994_v53 = vadd.f32 %v982_v38, %v917_v26  ;;  %2432 = vperm.xlu1 %3148, %v5094_v17   ;;  %v1165_v26 = vadd.f32 %v1153_v58, %v1088_v1  ;;  %v1155_v38 = vmul.f32 %v5061_v4, %v4184_v21  ;;  %v5124_v21 = vld [vmem:[%s6405_s0 + $0x5a] sm:$0x3f]  ;;  %v1082_v58 = vmul.f32 %v5040_v63, %v4305_v20  ;;  %v5145_v20 = vld [vmem:[%s6405_s0 + $0x6a] sm:$0x3f] }
 0x310   :  { %v1254_v50 = vpop.permute.xlu0 %1253  ;;  %v6865_v1 = vld [vmem:[#allocation157_spill] sm:$0xff] }
 0x311   :  { %v1304_v42 = vmul.f32 %v5100_v27, %v1254_v50  ;;  %v5103_v30 = vpop.permute.xlu1 %2033  ;;  %2934 = vperm.xlu0 %3156, %v5108_v23   ;;  %v1242_v50 = vadd.f32 %v1230_v22, %v1165_v26  ;;  %v1167_v16 = vadd.f32 %v1155_v38, %v1090_v10  ;;  %v1157_v28 = vmul.f32 %v5061_v4, %v6865_v1  ;;  %v5157_v1 = vld [vmem:[%s6405_s0 + $0x51] sm:$0x3f] }
 0x312   :  { %v1094_v12 = vadd.f32 %v1082_v58, %v992_v36  ;;  %v1234_v36 = vmul.f32 %v5073_v18, %v4381_v39 }
 0x313   :  { %v1316_v19 = vadd.f32 %v1304_v42, %v1239_v47  ;;  %2436 = vperm.xlu1 %3148, %v4949_v32   ;;  %v5136_v42 = vld [vmem:[%s6405_s0 + $0x31] sm:$0x3f]  ;;  %v1244_v10 = vadd.f32 %v1232_v2, %v1167_v16  ;;  %v1169_v37 = vadd.f32 %v1157_v28, %v1092_v62 }
 0x314   :  { %v1266_v55 = vpop.permute.xlu0 %1265 }
 0x315   :  { %v1307_v59 = vmul.f32 %v5100_v27, %v1266_v55  ;;  %v5119_v52 = vpop.permute.xlu1 %2043  ;;  %2942 = vperm.xlu0 %3156, %v5124_v21   ;;  %v1246_v62 = vadd.f32 %v1234_v36, %v1169_v37  ;;  %v1236_v37 = vmul.f32 %v5073_v18, %v4387_v41  ;;  %v5183_v36 = vld [vmem:[%s6405_s0 + $0x61] sm:$0x3f] }
 0x317   :  { %v1319_v47 = vadd.f32 %v1307_v59, %v1242_v50  ;;  %2444 = vperm.xlu1 %3148, %v5136_v42   ;;  %v6866_v59 = vld [vmem:[#allocation159_spill] sm:$0xff]  ;;  %v1084_v50 = vmul.f32 %v5040_v63, %v4311_v24  ;;  %v5166_v24 = vld [vmem:[%s6405_s0 + $0x7a] sm:$0x3f] }
 0x318   :  { %v1274_v26 = vpop.permute.xlu0 %1273  ;;  %v1159_v55 = vmul.f32 %v5061_v4, %v6866_v59 }
 0x319   :  { %v1309_v38 = vmul.f32 %v5100_v27, %v1274_v26  ;;  %v5140_v22 = vpop.permute.xlu1 %2053  ;;  %2950 = vperm.xlu0 %3156, %v5145_v20   ;;  %v1096_v2 = vadd.f32 %v1084_v50, %v994_v53 }
 0x31a   :  { %v1171_v39 = vadd.f32 %v1159_v55, %v1094_v12  ;;  %v5189_v12 = vld [vmem:[%s6406_s1 + $0x11] ss:$0 sm:$0xff] }
 0x31b   :  { %v1321_v16 = vadd.f32 %v1309_v38, %v1244_v10  ;;  %2452 = vperm.xlu1 %3148, %v5157_v1   ;;  %v5172_v10 = vld [vmem:[%s6406_s1 + $0x10] ss:$0 sm:$0xff]  ;;  %6870 = vst [vmem:[#allocation95_spill] sm:$0xff] %v5189_v12 }
 0x31c   :  { %v1282_v58 = vpop.permute.xlu0 %1281  ;;  %6868 = vst [vmem:[#allocation73_spill] sm:$0xff] %v5172_v10  ;;  %v6869_v38 = vld [vmem:[#allocation160_spill] sm:$0xff]  ;;  %v1405_v59 = vmul.f32 %v5172_v10, %v4442_v49  ;;  %v1408_v0 = vmul.f32 %v5172_v10, %v4454_v25 }
 0x31d   :  { %v1311_v28 = vmul.f32 %v5100_v27, %v1282_v58  ;;  %v5161_v26 = vpop.permute.xlu1 %2063  ;;  %2958 = vperm.xlu0 %3156, %v5166_v24   ;;  %v1161_v53 = vmul.f32 %v5061_v4, %v6869_v38  ;;  %v1248_v38 = vadd.f32 %v1236_v37, %v1171_v39 }
 0x31e   :  { %6867 = vst [vmem:[#allocation43_spill] sm:$0xff] %v5161_v26  ;;  %v1417_v58 = vadd.f32 %v1405_v59, %v1316_v19  ;;  %v5203_v19 = vld [vmem:[%s6405_s0 + $0x71] sm:$0x3f]  ;;  %v1420_v39 = vadd.f32 %v1408_v0, %v1319_v47  ;;  %v6874_v59 = vld [vmem:[#allocation161_spill] sm:$0xff] }
 0x31f   :  { %v1323_v50 = vadd.f32 %v1311_v28, %v1246_v62  ;;  %2460 = vperm.xlu1 %3148, %v5183_v36   ;;  %v1173_v56 = vadd.f32 %v1161_v53, %v1096_v2  ;;  %v1482_v62 = vmul.f32 %v5189_v12, %v4211_v60  ;;  %v1238_v28 = vmul.f32 %v5073_v18, %v4393_v43  ;;  %v5209_v2 = vld [vmem:[%s6406_s1 + $0x12] ss:$0 sm:$0xff]  ;;  %v7000_v26 = vld [vmem:[#allocation249_spill] sm:$0xff] }
 0x320   :  { %v1290_v55 = vpop.permute.xlu0 %1289  ;;  %6872 = vst [vmem:[#allocation45_spill] sm:$0xff] %v5209_v2 }
 0x321   :  { %v1313_v41 = vmul.f32 %v5100_v27, %v1290_v55  ;;  %v1250_v53 = vadd.f32 %v1238_v28, %v1173_v56  ;;  %v1494_v37 = vadd.f32 %v1482_v62, %v1417_v58  ;;  %v1485_v55 = vmul.f32 %v5189_v12, %v6874_v59  ;;  %v5224_v56 = vld [vmem:[%s6406_s1 + $0x13] ss:$0 sm:$0xff] }
 0x322   :  { %v5192_v49 = vpop.permute.xlu1 %2100  ;;  %6877 = vst [vmem:[#allocation75_spill] sm:$0xff] %v5224_v56 }
 0x323   :  { %6871 = vst [vmem:[#allocation129_spill] sm:$0xff] %v5192_v49  ;;  %v1325_v7 = vadd.f32 %v1313_v41, %v1248_v38  ;;  %2468 = vperm.xlu1 %3148, %v5203_v19   ;;  %v1410_v38 = vmul.f32 %v5172_v10, %v4466_v31  ;;  %v6875_v41 = vld [vmem:[#allocation229_spill] sm:$0xff]  ;;  %v1497_v28 = vadd.f32 %v1485_v55, %v1420_v39 }
 0x324   :  { %v1298_v60 = vpop.permute.xlu0 %1297  ;;  %v1559_v49 = vmul.f32 %v5209_v2, %v6875_v41  ;;  %v6881_v41 = vld [vmem:[#allocation233_spill] sm:$0xff] }
 0x325   :  { %v1315_v43 = vmul.f32 %v5100_v27, %v1298_v60  ;;  %v1422_v47 = vadd.f32 %v1410_v38, %v1321_v16  ;;  %v6879_v60 = vld [vmem:[#allocation162_spill] sm:$0xff]  ;;  %v6884_v38 = vld [vmem:[#allocation163_spill] sm:$0xff]  ;;  %v6923_v27 = vld [vmem:[#allocation21_spill] sm:$0xff] }
 0x326   :  { %v5212_v25 = vpop.permute.xlu1 %2104  ;;  %v1571_v58 = vadd.f32 %v1559_v49, %v1494_v37 }
 0x327   :  { %6873 = vst [vmem:[#allocation79_spill] sm:$0xff] %v5212_v25  ;;  %v1327_v14 = vadd.f32 %v1315_v43, %v1250_v53  ;;  %3149 = vset.pattern.permute.xlu1 %v6876_v34  ;;  %v1487_v53 = vmul.f32 %v5189_v12, %v6879_v60  ;;  %v6880_v43 = vld [vmem:[#allocation23_spill] sm:$0xff]  ;;  %v1562_v25 = vmul.f32 %v5209_v2, %v6881_v41  ;;  %v6885_v60 = vld [vmem:[#allocation29_spill] sm:$0xff] }
 0x328   :  { %2505 = vperm.xlu1 %3149, %v4936_v48   ;;  %v1586_v0 = vpop.permute.xlu0 %1585  ;;  %v1412_v59 = vmul.f32 %v5172_v10, %v6880_v43  ;;  %v1414_v43 = vmul.f32 %v5172_v10, %v6885_v60  ;;  %v6889_v41 = vld [vmem:[#allocation165_spill] sm:$0xff] }
 0x329   :  { %v1636_v62 = vmul.f32 %v5224_v56, %v1586_v0  ;;  %v1574_v49 = vadd.f32 %v1562_v25, %v1497_v28  ;;  %v1499_v37 = vadd.f32 %v1487_v53, %v1422_v47  ;;  %v1489_v0 = vmul.f32 %v5189_v12, %v6884_v38  ;;  %v6890_v38 = vld [vmem:[#allocation35_spill] sm:$0xff] }
 0x32a   :  { %v5228_v31 = vpop.permute.xlu1 %2112  ;;  %v1424_v16 = vadd.f32 %v1412_v59, %v1323_v50  ;;  %v1426_v25 = vadd.f32 %v1414_v43, %v1325_v7  ;;  %v1416_v60 = vmul.f32 %v5172_v10, %v6890_v38  ;;  %v6893_v43 = vld [vmem:[#allocation167_spill] sm:$0xff] }
 0x32b   :  { %6878 = vst [vmem:[#allocation99_spill] sm:$0xff] %v5228_v31  ;;  %v5236_v34 = vadd.f32 %v1636_v62, %v1571_v58  ;;  %v6886_v31 = vld [vmem:[#allocation235_spill] sm:$0xff] }
 0x32c   :  { %2513 = vperm.xlu1 %3149, %v4949_v32   ;;  %v1598_v48 = vpop.permute.xlu0 %1597  ;;  %v1564_v58 = vmul.f32 %v5209_v2, %v6886_v31  ;;  %v1501_v53 = vadd.f32 %v1489_v0, %v1424_v16  ;;  %v1428_v7 = vadd.f32 %v1416_v60, %v1327_v14 }
 0x32d   :  { %6882 = vst [vmem:[#allocation132_spill] sm:$0xff] %v5236_v34  ;;  %v1639_v39 = vmul.f32 %v5224_v56, %v1598_v48  ;;  %v1491_v48 = vmul.f32 %v5189_v12, %v6889_v41 }
 0x32e   :  { %v5240_v55 = vpop.permute.xlu1 %2120  ;;  %v1576_v28 = vadd.f32 %v1564_v58, %v1499_v37  ;;  %v1493_v58 = vmul.f32 %v5189_v12, %v6893_v43 }
 0x32f   :  { %6883 = vst [vmem:[#allocation128_spill] sm:$0xff] %v5240_v55  ;;  %v5248_v62 = vadd.f32 %v1639_v39, %v1574_v49  ;;  %v6891_v55 = vld [vmem:[#allocation237_spill] sm:$0xff]  ;;  %v1503_v37 = vadd.f32 %v1491_v48, %v1426_v25 }
 0x330   :  { %2517 = vperm.xlu1 %3149, %v4962_v5   ;;  %v1606_v50 = vpop.permute.xlu0 %1605  ;;  %v1566_v31 = vmul.f32 %v5209_v2, %v6891_v55 }
 0x331   :  { %6887 = vst [vmem:[#allocation140_spill] sm:$0xff] %v5248_v62  ;;  %v1641_v47 = vmul.f32 %v5224_v56, %v1606_v50  ;;  %v6894_v50 = vld [vmem:[#allocation239_spill] sm:$0xff] }
 0x332   :  { %v5252_v59 = vpop.permute.xlu1 %2128  ;;  %v1578_v39 = vadd.f32 %v1566_v31, %v1501_v53  ;;  %v1568_v41 = vmul.f32 %v5209_v2, %v6894_v50  ;;  %v6919_v62 = vld [vmem:[#allocation31_spill] sm:$0xff] }
 0x333   :  { %6888 = vst [vmem:[#allocation77_spill] sm:$0xff] %v5252_v59  ;;  %v5260_v49 = vadd.f32 %v1641_v47, %v1576_v28  ;;  %v1505_v28 = vadd.f32 %v1493_v58, %v1428_v7  ;;  %v6895_v47 = vld [vmem:[#allocation51_spill] sm:$0xff]  ;;  %v6912_v59 = vld [vmem:[#allocation37_spill] sm:$0xff] }
 0x334   :  { %2525 = vperm.xlu1 %3149, %v4986_v61   ;;  %v1614_v5 = vpop.permute.xlu0 %1613  ;;  %v1580_v61 = vadd.f32 %v1568_v41, %v1503_v37  ;;  %v1570_v25 = vmul.f32 %v5209_v2, %v6895_v47  ;;  %v6900_v37 = vmov 3   ;;  %v6904_v41 = vld [vmem:[#allocation19_spill] sm:$0xff]  ;;  %v6908_v47 = vld [vmem:[#allocation16_spill] sm:$0xff] }
 0x335   :  { %v1643_v16 = vmul.f32 %v5224_v56, %v1614_v5  ;;  %v6920_v2 = vld [vmem:[#allocation52_spill] sm:$0xff] }
 0x336   :  { %v5264_v0 = vpop.permute.xlu1 %2136  ;;  %v1582_v31 = vadd.f32 %v1570_v25, %v1505_v28  ;;  %v6907_v28 = vld [vmem:[#allocation108_spill] sm:$0xff] }
 0x337   :  { %6892 = vst [vmem:[#allocation101_spill] sm:$0xff] %v5264_v0  ;;  %v5270_v38 = vadd.f32 %v1643_v16, %v1578_v39 }
 0x338   :  { %2533 = vperm.xlu1 %3149, %v5002_v9   ;;  %v1622_v55 = vpop.permute.xlu0 %1621 }
 0x339   :  { %v1645_v14 = vmul.f32 %v5224_v56, %v1622_v55  ;;  %v6905_v55 = vld [vmem:[#allocation268_spill] sm:$0xff] }
 0x33a   :  { %v154_v25 = vmul.f32 %v6905_v55, %v6908_v47 }
 0x33b   :  { %v5276_v53 = vadd.f32 %v1645_v14, %v1580_v61  ;;  %v5278_v48 = vpop.permute.xlu1 %2173  ;;  %v155_v61 = vmul.f32 %v6905_v55, %v6904_v41  ;;  %v6906_v14 = vld [vmem:[#allocation5_spill] sm:$0xff]  ;;  %v232_v41 = vmul.f32 %v4788_v44, %v6912_v59 }
 0x33c   :  { %6896 = vst [vmem:[#allocation135_spill] sm:$0xff] %v5278_v48  ;;  %2541 = vperm.xlu1 %3149, %v5018_v11   ;;  %v1630_v60 = vpop.permute.xlu0 %1629  ;;  %v6916_v48 = vld [vmem:[#allocation28_spill] sm:$0xff] }
 0x33d   :  { %v1647_v5 = vmul.f32 %v5224_v56, %v1630_v60 }
 0x33f   :  { %v5282_v39 = vadd.f32 %v1647_v5, %v1582_v31  ;;  %v5284_v9 = vpop.permute.xlu1 %2181  ;;  %v6910_v31 = vld [vmem:[#allocation7_spill] sm:$0xff] }
 0x340   :  { %6897 = vst [vmem:[#allocation136_spill] sm:$0xff] %v5284_v9  ;;  %2549 = vperm.xlu1 %3149, %v5034_v33   ;;  %v5287_v7 = vpop.permute.xlu0 %1917  ;;  %v92_v5 = vmul.f32 %v6907_v28, %v6910_v31  ;;  %v6915_v9 = vld [vmem:[#allocation25_spill] sm:$0xff] }
 0x341   :  { %6898 = vst [vmem:[#allocation134_spill] sm:$0xff] %v5287_v7  ;;  %v6921_v7 = vld [vmem:[#allocation15_spill] sm:$0xff] }
 0x343   :  { %v5289_v16 = vpop.permute.xlu1 %2185 }
 0x344   :  { %6899 = vst [vmem:[#allocation142_spill] sm:$0xff] %v5289_v16  ;;  %3150 = vset.pattern.permute.xlu1 %v6900_v37  ;;  %v5293_v43 = vpop.permute.xlu0 %1929  ;;  %v6913_v37 = vld [vmem:[#allocation9_spill] sm:$0xff]  ;;  %v6914_v16 = vld [vmem:[#allocation11_spill] sm:$0xff] }
 0x345   :  { %2586 = vperm.xlu1 %3150, %v5094_v17   ;;  %6901 = vst [vmem:[#allocation107_spill] sm:$0xff] %v5293_v43  ;;  %v89_v17 = vmul.f32 %v6907_v28, %v6906_v14  ;;  %v94_v14 = vmul.f32 %v6907_v28, %v6913_v37  ;;  %v96_v47 = vmul.f32 %v6907_v28, %v6914_v16 }
 0x346   :  { %v163_v37 = vmul.f32 %v6905_v55, %v6919_v62  ;;  %v309_v16 = vmul.f32 %v4800_v15, %v6920_v2 }
 0x347   :  { %v5295_v11 = vpop.permute.xlu1 %2193  ;;  %v5342_v12 = vadd.f32 %v154_v25, %v89_v17 }
 0x348   :  { %v5300_v50 = vpop.permute.xlu0 %1937 }
 0x349   :  { %2590 = vperm.xlu1 %3150, %v4949_v32   ;;  %v6909_v32 = vld [vmem:[#allocation2_spill] sm:$0xff] }
 0x34a   :  { %v90_v60 = vmul.f32 %v6907_v28, %v6909_v32  ;;  %v161_v32 = vmul.f32 %v6905_v55, %v6916_v48  ;;  %v6922_v48 = vld [vmem:[#allocation18_spill] sm:$0xff] }
 0x34b   :  { %v5298_v58 = vpop.permute.xlu1 %2201  ;;  %v5346_v34 = vmul.f32 %v4816_v8, %v6922_v48  ;;  %v6928_v48 = vld [vmem:[#allocation30_spill] sm:$0xff] }
 0x34c   :  { %6902 = vst [vmem:[#allocation103_spill] sm:$0xff] %v5298_v58  ;;  %v5328_v43 = vpop.permute.xlu0 %1945  ;;  %v167_v59 = vadd.f32 %v155_v61, %v90_v60  ;;  %v6925_v61 = vld [vmem:[#allocation69_spill] sm:$0xff]  ;;  %v6926_v60 = vld [vmem:[#allocation27_spill] sm:$0xff]  ;;  %v6999_v58 = vld [vmem:[#allocation166_spill] sm:$0xff] }
 0x34d   :  { %2598 = vperm.xlu1 %3150, %v5136_v42   ;;  %v6911_v42 = vld [vmem:[#allocation22_spill] sm:$0xff]  ;;  %v410_v17 = vmul.f32 %v4816_v8, %v6925_v61 }
 0x34e   :  { %v157_v0 = vmul.f32 %v6905_v55, %v6911_v42  ;;  %v6918_v42 = vld [vmem:[#allocation13_spill] sm:$0xff] }
 0x34f   :  { %v5303_v33 = vpop.permute.xlu1 %2209  ;;  %v98_v56 = vmul.f32 %v6907_v28, %v6918_v42  ;;  %v5350_v28 = vmul.f32 %v4816_v8, %v6923_v27  ;;  %v5365_v42 = vmul.f32 %v4816_v8, %v6926_v60  ;;  %v5367_v27 = vadd.f32 %v161_v32, %v96_v47  ;;  %v6935_v32 = vld [vmem:[#allocation38_spill] sm:$0xff] }
 0x350   :  { %6903 = vst [vmem:[#allocation138_spill] sm:$0xff] %v5303_v33  ;;  %v5353_v62 = vadd.f32 %v157_v0, %v92_v5  ;;  %v6929_v5 = vld [vmem:[#allocation33_spill] sm:$0xff]  ;;  %v5389_v61 = vmul.f32 %v4903_v40, %v6935_v32  ;;  %v6939_v60 = vld [vmem:[#allocation42_spill] sm:$0xff] }
 0x351   :  { %2606 = vperm.xlu1 %3150, %v5157_v1   ;;  %v159_v1 = vmul.f32 %v6905_v55, %v6915_v9  ;;  %v5340_v9 = vmul.f32 %v4816_v8, %v6921_v7  ;;  %v6924_v55 = vld [vmem:[#allocation24_spill] sm:$0xff]  ;;  %v244_v7 = vadd.f32 %v232_v41, %v167_v59  ;;  %6927 = vst [vmem:[#allocation137_spill] sm:$0xff] %v5365_v42  ;;  %v6970_v33 = vld [vmem:[#allocation70_spill] sm:$0xff] }
 0x352   :  { %v5357_v2 = vmul.f32 %v4816_v8, %v6924_v55  ;;  %v5373_v0 = vadd.f32 %v163_v37, %v98_v56  ;;  %v5377_v41 = vmul.f32 %v4903_v40, %v6929_v5  ;;  %v6931_v55 = vld [vmem:[#allocation84_spill] sm:$0xff]  ;;  %6936 = vst [vmem:[#allocation141_spill] sm:$0xff] %v5389_v61 }
 0x353   :  { %v5330_v31 = vpop.permute.xlu1 %2217  ;;  %v5361_v25 = vadd.f32 %v159_v1, %v94_v14  ;;  %v321_v59 = vadd.f32 %v309_v16, %v244_v7  ;;  %v487_v14 = vmul.f32 %v4844_v54, %v6931_v55  ;;  %v6933_v8 = vld [vmem:[#allocation36_spill] sm:$0xff]  ;;  %v5397_v16 = vmul.f32 %v5040_v63, %v6939_v60  ;;  %v5399_v7 = vpop.permute.xlu0 %1953  ;;  %v6943_v55 = vld [vmem:[#allocation46_spill] sm:$0xff] }
 0x354   :  { %6917 = vst [vmem:[#allocation144_spill] sm:$0xff] %v5330_v31  ;;  %6930 = vst [vmem:[#allocation105_spill] sm:$0xff] %v5377_v41  ;;  %v5385_v47 = vmul.f32 %v4903_v40, %v6933_v8  ;;  %v6937_v56 = vld [vmem:[#allocation40_spill] sm:$0xff]  ;;  %v5408_v8 = vmul.f32 %v5040_v63, %v6943_v55  ;;  %v6962_v31 = vld [vmem:[#allocation61_spill] sm:$0xff] }
 0x355   :  { %2614 = vperm.xlu1 %3150, %v5183_v36   ;;  %v5371_v36 = vmul.f32 %v4903_v40, %v6928_v48  ;;  %v5393_v37 = vmul.f32 %v4903_v40, %v6937_v56  ;;  %6940 = vst [vmem:[#allocation143_spill] sm:$0xff] %v5397_v16  ;;  %v6941_v48 = vld [vmem:[#allocation44_spill] sm:$0xff]  ;;  %v422_v32 = vadd.f32 %v410_v17, %v321_v59  ;;  %v6948_v16 = vld [vmem:[#allocation49_spill] sm:$0xff]  ;;  %v6953_v17 = vld [vmem:[#allocation54_spill] sm:$0xff] }
 0x356   :  { %6934 = vst [vmem:[#allocation146_spill] sm:$0xff] %v5385_v47  ;;  %v5404_v5 = vmul.f32 %v5040_v63, %v6941_v48  ;;  %6944 = vst [vmem:[#allocation152_spill] sm:$0xff] %v5408_v8  ;;  %v5418_v61 = vmul.f32 %v4800_v15, %v6948_v16  ;;  %v5430_v59 = vmul.f32 %v4800_v15, %v6953_v17  ;;  %v5439_v16 = vld [vmem:[%s6406_s1 + $0x14] ss:$0 sm:$0xff]  ;;  %v6959_v17 = vld [vmem:[#allocation58_spill] sm:$0xff] }
 0x357   :  { %6938 = vst [vmem:[#allocation148_spill] sm:$0xff] %v5393_v37  ;;  %v6946_v37 = vld [vmem:[#allocation48_spill] sm:$0xff]  ;;  %v5451_v18 = vmul.f32 %v5172_v10, %v6959_v17  ;;  %v6993_v41 = vld [vmem:[#allocation93_spill] sm:$0xff] }
 0x358   :  { %v5381_v1 = vpop.permute.xlu1 %2254  ;;  %6942 = vst [vmem:[#allocation150_spill] sm:$0xff] %v5404_v5  ;;  %v5414_v60 = vmul.f32 %v5040_v63, %v6946_v37  ;;  %v6951_v5 = vld [vmem:[#allocation53_spill] sm:$0xff]  ;;  %v6965_v17 = vld [vmem:[#allocation64_spill] sm:$0xff] }
 0x359   :  { %6932 = vst [vmem:[#allocation139_spill] sm:$0xff] %v5381_v1  ;;  %2622 = vperm.xlu1 %3150, %v5203_v19   ;;  %v6945_v1 = vld [vmem:[#allocation97_spill] sm:$0xff]  ;;  %v6949_v19 = vld [vmem:[#allocation50_spill] sm:$0xff]  ;;  %v5426_v55 = vmul.f32 %v5172_v10, %v6951_v5  ;;  %6960 = vst [vmem:[#allocation161_spill] sm:$0xff] %v5451_v18 }
 0x35a   :  { %v564_v56 = vmul.f32 %v4858_v3, %v6945_v1  ;;  %6947 = vst [vmem:[#allocation154_spill] sm:$0xff] %v5414_v60  ;;  %v5422_v48 = vmul.f32 %v5040_v63, %v6949_v19  ;;  %v6954_v1 = vld [vmem:[#allocation55_spill] sm:$0xff]  ;;  %v499_v60 = vadd.f32 %v487_v14, %v422_v32  ;;  %v6956_v19 = vld [vmem:[#allocation112_spill] sm:$0xff]  ;;  %v6958_v5 = vld [vmem:[#allocation57_spill] sm:$0xff]  ;;  %v5459_v14 = vmul.f32 %v5172_v10, %v6962_v31 }
 0x35b   :  { %6952 = vst [vmem:[#allocation157_spill] sm:$0xff] %v5426_v55  ;;  %v5434_v37 = vmul.f32 %v5172_v10, %v6954_v1  ;;  %v5447_v55 = vmul.f32 %v4800_v15, %v6958_v5  ;;  %v6961_v1 = vld [vmem:[#allocation60_spill] sm:$0xff]  ;;  %v5464_v32 = vld [vmem:[%s6406_s1 + $0x18] ss:$0 sm:$0xff]  ;;  %v6967_v18 = vld [vmem:[#allocation131_spill] sm:$0xff] }
 0x35c   :  { %6950 = vst [vmem:[#allocation156_spill] sm:$0xff] %v5422_v48  ;;  %v641_v48 = vmul.f32 %v4872_v45, %v6956_v19  ;;  %v5443_v8 = vpop.permute.xlu1 %2258  ;;  %6963 = vst [vmem:[#allocation229_spill] sm:$0xff] %v5459_v14  ;;  %v6964_v19 = vld [vmem:[#allocation63_spill] sm:$0xff]  ;;  %v742_v31 = vmul.f32 %v4903_v40, %v6967_v18  ;;  %v5499_v40 = vld [vmem:[%s6405_s0 + $0x22] sm:$0x3f] }
 0x35d   :  { %6955 = vst [vmem:[#allocation159_spill] sm:$0xff] %v5434_v37  ;;  %6957 = vst [vmem:[#allocation160_spill] sm:$0xff] %v5443_v8  ;;  %v5455_v37 = vmul.f32 %v4800_v15, %v6961_v1  ;;  %3151 = vset.pattern.permute.xlu1 %v6529_v57  ;;  %v5469_v5 = vmul.f32 %v4800_v15, %v6964_v19  ;;  %v5473_v8 = vmul.f32 %v5172_v10, %v6965_v17  ;;  %v6968_v14 = vld [vmem:[#allocation67_spill] sm:$0xff]  ;;  %v6972_v15 = vld [vmem:[#allocation72_spill] sm:$0xff] }
 0x35e   :  { %v576_v1 = vadd.f32 %v564_v56, %v499_v60  ;;  %2672 = vperm.xlu1 %3151, %v5055_v29   ;;  %v5480_v47 = vmul.f32 %v5439_v16, %v6968_v14  ;;  %v5484_v57 = vmul.f32 %v5439_v16, %v6970_v33  ;;  %v5488_v19 = vmul.f32 %v5439_v16, %v6972_v15  ;;  %v6974_v17 = vld [vmem:[#allocation74_spill] sm:$0xff]  ;;  %v5494_v60 = vpop.permute.xlu0 %1961  ;;  %v6977_v18 = vld [vmem:[#allocation76_spill] sm:$0xff]  ;;  %v6985_v29 = vld [vmem:[#allocation81_spill] sm:$0xff] }
 0x35f   :  { %6966 = vst [vmem:[#allocation162_spill] sm:$0xff] %v5473_v8  ;;  %v5492_v56 = vmul.f32 %v5439_v16, %v6974_v17  ;;  %6976 = vst [vmem:[#allocation235_spill] sm:$0xff] %v5499_v40  ;;  %v5503_v14 = vmul.f32 %v5439_v16, %v6977_v18  ;;  %v6979_v33 = vld [vmem:[#allocation78_spill] sm:$0xff]  ;;  %v6983_v8 = vld [vmem:[#allocation80_spill] sm:$0xff]  ;;  %v5519_v10 = vmul.f32 %v5464_v32, %v6985_v29 }
 0x360   :  { %6969 = vst [vmem:[#allocation23_spill] sm:$0xff] %v5480_v47  ;;  %6971 = vst [vmem:[#allocation233_spill] sm:$0xff] %v5484_v57  ;;  %v5507_v57 = vmul.f32 %v5464_v32, %v6979_v33  ;;  %v653_v15 = vadd.f32 %v641_v48, %v576_v1  ;;  %v5515_v47 = vmul.f32 %v5464_v32, %v6983_v8  ;;  %v6987_v18 = vld [vmem:[#allocation82_spill] sm:$0xff]  ;;  %v6988_v33 = vld [vmem:[#allocation204_spill] sm:$0xff] }
 0x361   :  { %6973 = vst [vmem:[#allocation163_spill] sm:$0xff] %v5488_v19  ;;  %6975 = vst [vmem:[#allocation29_spill] sm:$0xff] %v5492_v56  ;;  %v6981_v19 = vld [vmem:[#allocation147_spill] sm:$0xff]  ;;  %v5511_v56 = vpop.permute.xlu1 %2266  ;;  %v231_v48 = vmul.f32 %v4788_v44, %v6988_v33  ;;  %v5544_v33 = vmul.f32 %v4844_v54, %v6993_v41 }
 0x362   :  { %6978 = vst [vmem:[#allocation165_spill] sm:$0xff] %v5503_v14  ;;  %6980 = vst [vmem:[#allocation35_spill] sm:$0xff] %v5507_v57  ;;  %v819_v17 = vmul.f32 %v4924_v13, %v6981_v19  ;;  %v5523_v14 = vmul.f32 %v4844_v54, %v6987_v18  ;;  %v6989_v1 = vld [vmem:[#allocation87_spill] sm:$0xff]  ;;  %v754_v8 = vadd.f32 %v742_v31, %v653_v15  ;;  %2682 = vperm.xlu1 %3151, %v5499_v40   ;;  %v6997_v15 = vld [vmem:[#allocation118_spill] sm:$0xff] }
 0x363   :  { %6982 = vst [vmem:[#allocation237_spill] sm:$0xff] %v5511_v56  ;;  %6984 = vst [vmem:[#allocation167_spill] sm:$0xff] %v5515_v47  ;;  %v5529_v19 = vmul.f32 %v4844_v54, %v6989_v1  ;;  %v6990_v56 = vld [vmem:[#allocation89_spill] sm:$0xff]  ;;  %v6991_v47 = vld [vmem:[#allocation158_spill] sm:$0xff] }
 0x364   :  { %6986 = vst [vmem:[#allocation239_spill] sm:$0xff] %v5519_v10  ;;  %v5533_v57 = vmul.f32 %v4844_v54, %v6990_v56  ;;  %v896_v29 = vmul.f32 %v4944_v46, %v6991_v47  ;;  %v6992_v10 = vld [vmem:[#allocation91_spill] sm:$0xff]  ;;  %6994 = vst [vmem:[#allocation51_spill] sm:$0xff] %v5544_v33  ;;  %v6995_v1 = vld [vmem:[#allocation109_spill] sm:$0xff]  ;;  %v5556_v47 = vmul.f32 %v4872_v45, %v6997_v15  ;;  %v5580_v15 = vpop.permute.xlu0 %2250 }
 0x365   :  { %v5540_v18 = vmul.f32 %v4844_v54, %v6992_v10  ;;  %v5548_v42 = vmul.f32 %v4872_v45, %v6995_v1  ;;  %v6996_v56 = vld [vmem:[#allocation115_spill] sm:$0xff]  ;;  %v831_v40 = vadd.f32 %v819_v17, %v754_v8  ;;  %v973_v10 = vmul.f32 %v4977_v35, %v6999_v58  ;;  %v5562_v41 = vpop.permute.xlu1 %2274  ;;  %v7002_v33 = vld [vmem:[#allocation121_spill] sm:$0xff]  ;;  %v7004_v46 = vld [vmem:[#allocation124_spill] sm:$0xff]  ;;  %7007 = vst [vmem:[#allocation16_spill] sm:$0xff] %v5580_v15 }
 0x366   :  { %v5552_v31 = vmul.f32 %v4872_v45, %v6996_v56  ;;  %6998 = vst [vmem:[#allocation19_spill] sm:$0xff] %v5556_v47  ;;  %v1742_v54 = vmul.f32 %v5439_v16, %v7000_v26  ;;  %7001 = vst [vmem:[#allocation268_spill] sm:$0xff] %v5562_v41  ;;  %v5566_v1 = vmul.f32 %v4872_v45, %v7002_v33  ;;  %v5575_v17 = vld [vmem:[%s6406_s1 + $0x15] ss:$0 sm:$0xff]  ;;  %v7006_v8 = vld [vmem:[#allocation206_spill] sm:$0xff]  ;;  %2687 = vperm.xlu1 %3151, %v5081_v6  }
 0x367   :  { %v5570_v56 = vmul.f32 %v4872_v45, %v7004_v46  ;;  %v243_v58 = vadd.f32 %v231_v48, %v5342_v12  ;;  %v234_v26 = vmul.f32 %v4788_v44, %v7006_v8  ;;  %v7008_v41 = vld [vmem:[#allocation145_spill] sm:$0xff]  ;;  %v908_v46 = vadd.f32 %v896_v29, %v831_v40  ;;  %v7012_v47 = vld [vmem:[#allocation151_spill] sm:$0xff] }
 0x368   :  { %7003 = vst [vmem:[#allocation5_spill] sm:$0xff] %v5566_v1  ;;  %v5584_v33 = vmul.f32 %v4924_v13, %v7008_v41  ;;  %v7010_v1 = vld [vmem:[#allocation149_spill] sm:$0xff]  ;;  %v5594_v12 = vmul.f32 %v4924_v13, %v7012_v47  ;;  %v7016_v15 = vld [vmem:[#allocation155_spill] sm:$0xff] }
 0x369   :  { %7005 = vst [vmem:[#allocation108_spill] sm:$0xff] %v5570_v56  ;;  %v5588_v45 = vmul.f32 %v4924_v13, %v7010_v1  ;;  %v1754_v56 = vadd.f32 %v1742_v54, %v5260_v49  ;;  %v7014_v48 = vld [vmem:[#allocation153_spill] sm:$0xff]  ;;  %v5602_v41 = vmul.f32 %v4924_v13, %v7016_v15  ;;  %v985_v40 = vadd.f32 %v973_v10, %v908_v46  ;;  %v7019_v49 = vld [vmem:[#allocation168_spill] sm:$0xff]  ;;  %v7022_v54 = vld [vmem:[#allocation251_spill] sm:$0xff] }
 0x36a   :  { %7009 = vst [vmem:[#allocation2_spill] sm:$0xff] %v5584_v33  ;;  %7013 = vst [vmem:[#allocation22_spill] sm:$0xff] %v5594_v12  ;;  %v5598_v8 = vmul.f32 %v4924_v13, %v7014_v48  ;;  %v7018_v33 = vld [vmem:[#allocation164_spill] sm:$0xff]  ;;  %v5610_v6 = vmul.f32 %v4977_v35, %v7019_v49  ;;  %v7021_v29 = vld [vmem:[#allocation173_spill] sm:$0xff]  ;;  %v1744_v48 = vmul.f32 %v5439_v16, %v7022_v54  ;;  %2697 = vperm.xlu1 %3151, %v5108_v23  }
 0x36b   :  { %7011 = vst [vmem:[#allocation7_spill] sm:$0xff] %v5588_v45  ;;  %7017 = vst [vmem:[#allocation9_spill] sm:$0xff] %v5602_v41  ;;  %v5606_v1 = vmul.f32 %v4977_v35, %v7018_v33  ;;  %v1819_v47 = vmul.f32 %v5575_v17, %v7021_v29  ;;  %v7024_v12 = vld [vmem:[#allocation169_spill] sm:$0xff]  ;;  %v320_v15 = vadd.f32 %v5418_v61, %v243_v58  ;;  %v7026_v33 = vld [vmem:[#allocation208_spill] sm:$0xff] }
 0x36c   :  { %7015 = vst [vmem:[#allocation37_spill] sm:$0xff] %v5598_v8  ;;  %7020 = vst [vmem:[#allocation11_spill] sm:$0xff] %v5610_v6  ;;  %v5616_v8 = vpop.permute.xlu1 %2282  ;;  %v5620_v13 = vmul.f32 %v5575_v17, %v7024_v12  ;;  %v246_v10 = vadd.f32 %v234_v26, %v5353_v62  ;;  %v236_v46 = vmul.f32 %v4788_v44, %v7026_v33  ;;  %v7027_v49 = vld [vmem:[#allocation170_spill] sm:$0xff]  ;;  %v7029_v29 = vld [vmem:[#allocation171_spill] sm:$0xff] }
 0x36d   :  { %7023 = vst [vmem:[#allocation25_spill] sm:$0xff] %v5616_v8  ;;  %v5628_v41 = vmul.f32 %v4977_v35, %v7027_v49  ;;  %v5632_v54 = vmul.f32 %v5575_v17, %v7029_v29  ;;  %v1756_v8 = vadd.f32 %v1744_v48, %v5270_v38  ;;  %v1831_v6 = vadd.f32 %v1819_v47, %v1754_v56  ;;  %v7031_v12 = vld [vmem:[#allocation172_spill] sm:$0xff]  ;;  %v7033_v62 = vld [vmem:[#allocation174_spill] sm:$0xff]  ;;  %v7035_v26 = vld [vmem:[#allocation177_spill] sm:$0xff]  ;;  %v5658_v56 = vpop.permute.xlu0 %2262 }
 0x36e   :  { %7025 = vst [vmem:[#allocation28_spill] sm:$0xff] %v5620_v13  ;;  %v5638_v61 = vmul.f32 %v4977_v35, %v7031_v12  ;;  %v5642_v58 = vmul.f32 %v4977_v35, %v7033_v62  ;;  %v1075_v33 = vmul.f32 %v5040_v63, %v7035_v26  ;;  %v7036_v49 = vld [vmem:[#allocation210_spill] sm:$0xff]  ;;  %v5651_v38 = vld [vmem:[%s6406_s1 + $0x16] ss:$0 sm:$0xff]  ;;  %v5656_v23 = vld [vmem:[%s6406_s1 + $0x17] ss:$0 sm:$0xff]  ;;  %2707 = vperm.xlu1 %3151, %v5124_v21  }
 0x36f   :  { %7028 = vst [vmem:[#allocation13_spill] sm:$0xff] %v5628_v41  ;;  %7030 = vst [vmem:[#allocation31_spill] sm:$0xff] %v5632_v54  ;;  %v238_v29 = vmul.f32 %v4788_v44, %v7036_v49  ;;  %v7038_v35 = vld [vmem:[#allocation175_spill] sm:$0xff]  ;;  %v5665_v63 = vld [vmem:[%s6406_s1 + $0x19] ss:$0 sm:$0xff]  ;;  %v1973_v26 = vmul.f32 %v5656_v23, %v5300_v50  ;;  %v248_v54 = vadd.f32 %v236_v46, %v5361_v25 }
 0x370   :  { %7032 = vst [vmem:[#allocation52_spill] sm:$0xff] %v5638_v61  ;;  %7034 = vst [vmem:[#allocation15_spill] sm:$0xff] %v5642_v58  ;;  %v1821_v47 = vmul.f32 %v5575_v17, %v7038_v35  ;;  %v7039_v44 = vld [vmem:[#allocation253_spill] sm:$0xff]  ;;  %v7040_v12 = vld [vmem:[#allocation111_spill] sm:$0xff]  ;;  %v5673_v49 = vpop.permute.xlu1 %2290  ;;  %v323_v35 = vadd.f32 %v5430_v59, %v246_v10  ;;  %v421_v61 = vadd.f32 %v5340_v9, %v320_v15 }
 0x371   :  { %7037 = vst [vmem:[#allocation18_spill] sm:$0xff] %v5658_v56  ;;  %v1746_v48 = vmul.f32 %v5439_v16, %v7039_v44  ;;  %v1896_v62 = vmul.f32 %v5651_v38, %v7040_v12  ;;  %7041 = vst [vmem:[#allocation21_spill] sm:$0xff] %v5673_v49  ;;  %v7042_v56 = vld [vmem:[#allocation176_spill] sm:$0xff]  ;;  %v7043_v41 = vld [vmem:[#allocation178_spill] sm:$0xff]  ;;  %v5684_v50 = vadd.f32 %v1075_v33, %v985_v40 }
 0x372   :  { %v1823_v58 = vmul.f32 %v5575_v17, %v7042_v56  ;;  %v1825_v44 = vmul.f32 %v5575_v17, %v7043_v41  ;;  %v1833_v45 = vadd.f32 %v1821_v47, %v1756_v8  ;;  %v7044_v49 = vld [vmem:[#allocation179_spill] sm:$0xff]  ;;  %v250_v59 = vadd.f32 %v238_v29, %v5367_v27  ;;  %v7045_v25 = vld [vmem:[#allocation214_spill] sm:$0xff]  ;;  %v7047_v10 = vld [vmem:[#allocation4_spill] sm:$0xff]  ;;  %v2271_v29 = vpop.permute.xlu0 %2270  ;;  %2717 = vperm.xlu1 %3151, %v5145_v20  }
 0x373   :  { %v1758_v13 = vadd.f32 %v1746_v48, %v5276_v53  ;;  %v1908_v12 = vadd.f32 %v1896_v62, %v1831_v6  ;;  %v5688_v56 = vmul.f32 %v5665_v63, %v7044_v49  ;;  %v563_v9 = vmul.f32 %v4858_v3, %v7045_v25  ;;  %v7046_v15 = vld [vmem:[#allocation255_spill] sm:$0xff]  ;;  %v7048_v40 = vld [vmem:[#allocation180_spill] sm:$0xff]  ;;  %v7049_v49 = vld [vmem:[#allocation181_spill] sm:$0xff] }
 0x374   :  { %v1748_v41 = vmul.f32 %v5439_v16, %v7046_v15  ;;  %v1898_v53 = vmul.f32 %v5651_v38, %v7047_v10  ;;  %v1975_v21 = vmul.f32 %v5656_v23, %v5328_v43  ;;  %v5701_v6 = vmul.f32 %v5665_v63, %v7048_v40  ;;  %v5706_v47 = vpop.permute.xlu1 %2340  ;;  %v7053_v25 = vld [vmem:[#allocation183_spill] sm:$0xff] }
 0x375   :  { %v1985_v8 = vadd.f32 %v1973_v26, %v1908_v12  ;;  %v325_v46 = vadd.f32 %v5447_v55, %v248_v54  ;;  %v498_v27 = vadd.f32 %v5523_v14, %v421_v61  ;;  %v424_v33 = vadd.f32 %v5346_v34, %v323_v35  ;;  %v3197_v34 = vld [vmem:[%s6406_s1 + $0x2] ss:$0 sm:$0xff]  ;;  %v7050_v14 = vld [vmem:[#allocation212_spill] sm:$0xff] }
 0x376   :  { %v2075_v48 = vmul.f32 %v5464_v32, %v5103_v30  ;;  %v1760_v62 = vadd.f32 %v1748_v41, %v5282_v39  ;;  %v1910_v26 = vadd.f32 %v1898_v53, %v1833_v45  ;;  %v1835_v43 = vadd.f32 %v1823_v58, %v1758_v13  ;;  %v7051_v35 = vld [vmem:[#allocation34_spill] sm:$0xff]  ;;  %2727 = vperm.xlu1 %3151, %v5166_v24  }
 0x377   :  { %v2152_v12 = vmul.f32 %v5665_v63, %v7049_v49  ;;  %v327_v55 = vadd.f32 %v5455_v37, %v250_v59  ;;  %v240_v54 = vmul.f32 %v3197_v34, %v7050_v14  ;;  %v575_v61 = vadd.f32 %v563_v9, %v498_v27  ;;  %v7052_v13 = vld [vmem:[#allocation182_spill] sm:$0xff] }
 0x378   :  { %v1900_v30 = vmul.f32 %v5651_v38, %v7051_v35  ;;  %v2087_v39 = vadd.f32 %v2075_v48, %v1985_v8  ;;  %v1987_v45 = vadd.f32 %v1975_v21, %v1910_v26  ;;  %v1977_v20 = vmul.f32 %v5656_v23, %v5399_v7  ;;  %v7054_v59 = vld [vmem:[#allocation14_spill] sm:$0xff]  ;;  %v5730_v9 = vpop.permute.xlu1 %2350 }
 0x379   :  { %v2154_v58 = vmul.f32 %v5665_v63, %v7052_v13  ;;  %v2156_v37 = vmul.f32 %v5665_v63, %v7053_v25  ;;  %v566_v15 = vmul.f32 %v4858_v3, %v7054_v59  ;;  %v426_v41 = vadd.f32 %v5350_v28, %v325_v46  ;;  %v7055_v48 = vld [vmem:[#allocation114_spill] sm:$0xff]  ;;  %v2279_v46 = vpop.permute.xlu0 %2278  ;;  %v7061_v25 = vld [vmem:[#allocation43_spill] sm:$0xff] }
 0x37a   :  { %v501_v10 = vadd.f32 %v5529_v19, %v424_v33  ;;  %v2077_v53 = vmul.f32 %v5464_v32, %v5119_v52  ;;  %v1912_v8 = vadd.f32 %v1900_v30, %v1835_v43  ;;  %v1837_v7 = vadd.f32 %v1825_v44, %v1760_v62  ;;  %v7056_v33 = vld [vmem:[#allocation184_spill] sm:$0xff]  ;;  %v5753_v62 = vld [vmem:[%s6406_s1 + $0x1a] ss:$0 sm:$0xff]  ;;  %3153 = vset.pattern.permute.xlu1 %v6513_v51 }
 0x37b   :  { %v252_v21 = vadd.f32 %v240_v54, %v5373_v0  ;;  %v652_v40 = vadd.f32 %v5548_v42, %v575_v61  ;;  %v428_v27 = vadd.f32 %v5357_v2, %v327_v55  ;;  %v1902_v28 = vmul.f32 %v5651_v38, %v7055_v48  ;;  %v7057_v42 = vld [vmem:[#allocation110_spill] sm:$0xff]  ;;  %v7058_v61 = vld [vmem:[#allocation113_spill] sm:$0xff] }
 0x37c   :  { %v2089_v26 = vadd.f32 %v2077_v53, %v1987_v45  ;;  %v1989_v49 = vadd.f32 %v1977_v20, %v1912_v8  ;;  %v1979_v19 = vmul.f32 %v5656_v23, %v5494_v60  ;;  %v2164_v52 = vadd.f32 %v2152_v12, %v2087_v39  ;;  %v5758_v60 = vld [vmem:[%s6406_s1 + $0x1b] ss:$0 sm:$0xff]  ;;  %v5760_v43 = vpop.permute.xlu1 %2355  ;;  %v3198_v54 = vld [vmem:[%s6406_s1 + $0x6] ss:$0 sm:$0xff]  ;;  %v7060_v20 = vld [vmem:[#allocation123_spill] sm:$0xff] }
 0x37d   :  { %v5745_v44 = vmul.f32 %v5061_v4, %v7056_v33  ;;  %v578_v24 = vadd.f32 %v566_v15, %v501_v10  ;;  %v503_v0 = vadd.f32 %v5533_v57, %v426_v41  ;;  %v568_v2 = vmul.f32 %v4858_v3, %v7057_v42  ;;  %v2287_v15 = vpop.permute.xlu0 %2286  ;;  %v7062_v10 = vld [vmem:[#allocation103_spill] sm:$0xff] }
 0x37e   :  { %v2079_v12 = vmul.f32 %v5464_v32, %v5140_v22  ;;  %v2229_v57 = vmul.f32 %v5753_v62, %v5295_v11  ;;  %v1914_v55 = vadd.f32 %v1902_v28, %v1837_v7  ;;  %v2306_v3 = vmul.f32 %v5758_v60, %v2271_v29  ;;  %v5778_v11 = vld [vmem:[%s6405_s0 + $0x1a] sm:$0x3f]  ;;  %v7065_v28 = vld [vmem:[#allocation2_spill] sm:$0xff] }
 0x37f   :  { %v329_v34 = vadd.f32 %v5469_v5, %v252_v21  ;;  %v505_v14 = vadd.f32 %v5540_v18, %v428_v27  ;;  %v570_v35 = vmul.f32 %v3198_v54, %v7058_v61  ;;  %v753_v22 = vadd.f32 %v5371_v36, %v652_v40  ;;  %2764 = vperm.xlu1 %3153, %v5778_v11   ;;  %v5784_v18 = vld [vmem:[%s6406_s1 + $0x1c] ss:$0 sm:$0xff]  ;;  %v7059_v36 = vld [vmem:[#allocation116_spill] sm:$0xff] }
 0x380   :  { %v2091_v51 = vadd.f32 %v2079_v12, %v1989_v49  ;;  %v1991_v29 = vadd.f32 %v1979_v19, %v1914_v55  ;;  %v2241_v5 = vadd.f32 %v2229_v57, %v2164_v52  ;;  %v2166_v30 = vadd.f32 %v2154_v58, %v2089_v26  ;;  %v2366_v41 = vpop.permute.xlu1 %2365  ;;  %v7063_v21 = vld [vmem:[#allocation185_spill] sm:$0xff]  ;;  %v7066_v49 = vld [vmem:[#allocation235_spill] sm:$0xff] }
 0x381   :  { %v655_v39 = vadd.f32 %v5552_v31, %v578_v24  ;;  %v580_v45 = vadd.f32 %v568_v2, %v503_v0  ;;  %v895_v13 = vmul.f32 %v7060_v20, %v7059_v36  ;;  %v2081_v59 = vmul.f32 %v5464_v32, %v7061_v25  ;;  %v7064_v27 = vld [vmem:[#allocation137_spill] sm:$0xff]  ;;  %v7067_v0 = vld [vmem:[#allocation19_spill] sm:$0xff]  ;;  %v7068_v2 = vld [vmem:[#allocation20_spill] sm:$0xff] }
 0x382   :  { %v2231_v53 = vmul.f32 %v5753_v62, %v7062_v10  ;;  %v2318_v58 = vadd.f32 %v2306_v3, %v2241_v5  ;;  %v2308_v8 = vmul.f32 %v5758_v60, %v2279_v46  ;;  %v2407_v7 = vmul.f32 %v5784_v18, %v2366_v41  ;;  %v5803_v19 = vld [vmem:[%s6406_s1 + $0x1d] ss:$0 sm:$0xff]  ;;  %v7071_v5 = vld [vmem:[#allocation186_spill] sm:$0xff]  ;;  %v5826_v25 = vld [vmem:[%s6405_s0 + $0x32] sm:$0x3f] }
 0x383   :  { %v2158_v31 = vmul.f32 %v5665_v63, %v7063_v21  ;;  %v582_v40 = vadd.f32 %v570_v35, %v505_v14  ;;  %v430_v48 = vadd.f32 %v7064_v27, %v329_v34  ;;  %v830_v26 = vadd.f32 %v7065_v28, %v753_v22  ;;  %2768 = vperm.xlu1 %3153, %v7066_v49   ;;  %v7069_v55 = vld [vmem:[#allocation105_spill] sm:$0xff]  ;;  %v7070_v14 = vld [vmem:[#allocation138_spill] sm:$0xff]  ;;  %v7078_v28 = vld [vmem:[#allocation144_spill] sm:$0xff] }
 0x384   :  { %v2093_v52 = vadd.f32 %v2081_v59, %v1991_v29  ;;  %v2243_v33 = vadd.f32 %v2231_v53, %v2166_v30  ;;  %v2168_v46 = vadd.f32 %v2156_v37, %v2091_v51  ;;  %v5805_v24 = vadd.f32 %v2407_v7, %v2318_v58  ;;  %v2376_v34 = vpop.permute.xlu1 %2375  ;;  %v7072_v51 = vld [vmem:[#allocation187_spill] sm:$0xff]  ;;  %v7074_v36 = vld [vmem:[#allocation26_spill] sm:$0xff]  ;;  %v7075_v59 = vld [vmem:[#allocation5_spill] sm:$0xff] }
 0x385   :  { %v657_v42 = vadd.f32 %v7067_v0, %v580_v45  ;;  %v572_v12 = vmul.f32 %v3198_v54, %v7068_v2  ;;  %v907_v57 = vadd.f32 %v895_v13, %v830_v26  ;;  %v756_v3 = vadd.f32 %v7069_v55, %v655_v39  ;;  %v7073_v54 = vld [vmem:[#allocation51_spill] sm:$0xff]  ;;  %v2295_v13 = vpop.permute.xlu0 %2294  ;;  %v5849_v55 = vld [vmem:[%s6405_s0 + $0x52] sm:$0x3f] }
 0x386   :  { %v2233_v61 = vmul.f32 %v5753_v62, %v7070_v14  ;;  %v2320_v35 = vadd.f32 %v2308_v8, %v2243_v33  ;;  %v2310_v22 = vmul.f32 %v5758_v60, %v2287_v15  ;;  %v2409_v29 = vmul.f32 %v5784_v18, %v2376_v34  ;;  %v7076_v7 = vld [vmem:[#allocation7_spill] sm:$0xff]  ;;  %7082 = vst [vmem:[#allocation24_spill] sm:$0xff] %v5849_v55 }
 0x387   :  { %v1152_v37 = vmul.f32 %v5061_v4, %v7071_v5  ;;  %v5818_v30 = vmul.f32 %v5803_v19, %v7072_v51  ;;  %v507_v45 = vadd.f32 %v7073_v54, %v430_v48  ;;  %v898_v39 = vmul.f32 %v7060_v20, %v7074_v36  ;;  %2776 = vperm.xlu1 %3153, %v5826_v25   ;;  %v7077_v20 = vld [vmem:[#allocation146_spill] sm:$0xff]  ;;  %v7089_v36 = vld [vmem:[#allocation143_spill] sm:$0xff] }
 0x388   :  { %v659_v15 = vadd.f32 %v7075_v59, %v582_v40  ;;  %v2245_v41 = vadd.f32 %v2233_v61, %v2168_v46  ;;  %v2170_v10 = vadd.f32 %v2158_v31, %v2093_v52  ;;  %v5830_v53 = vadd.f32 %v2409_v29, %v2320_v35  ;;  %v2386_v48 = vpop.permute.xlu1 %2385  ;;  %v7079_v52 = vld [vmem:[#allocation198_spill] sm:$0xff]  ;;  %v7090_v59 = vld [vmem:[#allocation216_spill] sm:$0xff] }
 0x389   :  { %v584_v58 = vadd.f32 %v572_v12, %v507_v45  ;;  %v984_v8 = vadd.f32 %v5606_v1, %v907_v57  ;;  %v833_v21 = vadd.f32 %v7076_v7, %v756_v3  ;;  %v758_v27 = vadd.f32 %v7077_v20, %v657_v42  ;;  %v7080_v46 = vld [vmem:[#allocation126_spill] sm:$0xff]  ;;  %v3201_v1 = vld [vmem:[%s6406_s1 + $0xa] ss:$0 sm:$0xff]  ;;  %v7081_v42 = vld [vmem:[#allocation32_spill] sm:$0xff] }
 0x38a   :  { %v2235_v26 = vmul.f32 %v5753_v62, %v7078_v28  ;;  %v2322_v33 = vadd.f32 %v2310_v22, %v2245_v41  ;;  %v2312_v0 = vmul.f32 %v5758_v60, %v2295_v13  ;;  %v2411_v40 = vmul.f32 %v5784_v18, %v2386_v48  ;;  %v7083_v3 = vld [vmem:[#allocation141_spill] sm:$0xff]  ;;  %v7085_v22 = vld [vmem:[#allocation207_spill] sm:$0xff]  ;;  %v7086_v29 = vld [vmem:[#allocation10_spill] sm:$0xff] }
 0x38b   :  { %v1164_v31 = vadd.f32 %v1152_v37, %v5684_v50  ;;  %v1229_v2 = vmul.f32 %v7080_v46, %v7079_v52  ;;  %v910_v12 = vadd.f32 %v898_v39, %v833_v21  ;;  %v900_v57 = vmul.f32 %v3201_v1, %v7081_v42  ;;  %2784 = vperm.xlu1 %3153, %v5849_v55   ;;  %v7084_v50 = vld [vmem:[#allocation246_spill] sm:$0xff]  ;;  %v7087_v37 = vld [vmem:[#allocation108_spill] sm:$0xff]  ;;  %v7128_v55 = vld [vmem:[#allocation247_spill] sm:$0xff] }
 0x38c   :  { %v760_v34 = vadd.f32 %v7083_v3, %v659_v15  ;;  %v1737_v14 = vmul.f32 %v5439_v16, %v7084_v50  ;;  %v2247_v61 = vadd.f32 %v2235_v26, %v2170_v10  ;;  %v5855_v35 = vadd.f32 %v2411_v40, %v2322_v33  ;;  %v7088_v54 = vld [vmem:[#allocation22_spill] sm:$0xff]  ;;  %v2396_v13 = vpop.permute.xlu1 %2395  ;;  %v7091_v7 = vld [vmem:[#allocation132_spill] sm:$0xff]  ;;  %v7093_v26 = vld [vmem:[#allocation11_spill] sm:$0xff] }
 0x38d   :  { %v1306_v5 = vmul.f32 %v7086_v29, %v7085_v22  ;;  %v661_v51 = vadd.f32 %v7087_v37, %v584_v58  ;;  %v835_v45 = vadd.f32 %v7088_v54, %v758_v27  ;;  %v1086_v39 = vadd.f32 %v7089_v36, %v984_v8  ;;  %v7092_v10 = vld [vmem:[#allocation188_spill] sm:$0xff]  ;;  %v5871_v58 = vld [vmem:[%s6405_s0 + $0x62] sm:$0x3f]  ;;  %v7102_v22 = vld [vmem:[#allocation73_spill] sm:$0xff] }
 0x38e   :  { %v902_v41 = vmul.f32 %v3201_v1, %v7090_v59  ;;  %v1749_v15 = vadd.f32 %v1737_v14, %v7091_v7  ;;  %v2324_v21 = vadd.f32 %v2312_v0, %v2247_v61  ;;  %v2413_v20 = vmul.f32 %v5784_v18, %v2396_v13  ;;  %7094 = vst [vmem:[#allocation69_spill] sm:$0xff] %v5871_v58  ;;  %v7095_v8 = vld [vmem:[#allocation190_spill] sm:$0xff]  ;;  %v7096_v0 = vld [vmem:[#allocation37_spill] sm:$0xff]  ;;  %v7097_v42 = vld [vmem:[#allocation220_spill] sm:$0xff] }
 0x38f   :  { %v1154_v48 = vmul.f32 %v5061_v4, %v7092_v10  ;;  %v1241_v28 = vadd.f32 %v1229_v2, %v1164_v31  ;;  %v987_v33 = vadd.f32 %v7093_v26, %v910_v12  ;;  %v912_v40 = vadd.f32 %v900_v57, %v835_v45  ;;  %2792 = vperm.xlu1 %3153, %v5871_v58   ;;  %v7099_v31 = vld [vmem:[#allocation192_spill] sm:$0xff]  ;;  %v7100_v12 = vld [vmem:[#allocation194_spill] sm:$0xff]  ;;  %v7101_v61 = vld [vmem:[#allocation17_spill] sm:$0xff] }
 0x390   :  { %v1156_v27 = vmul.f32 %v5061_v4, %v7095_v8  ;;  %v837_v52 = vadd.f32 %v7096_v0, %v760_v34  ;;  %v1228_v3 = vmul.f32 %v7080_v46, %v7097_v42  ;;  %v5879_v50 = vadd.f32 %v2413_v20, %v2324_v21  ;;  %v7103_v45 = vld [vmem:[#allocation148_spill] sm:$0xff]  ;;  %v5894_v7 = vpop.permute.xlu1 %2432  ;;  %v7105_v21 = vld [vmem:[#allocation13_spill] sm:$0xff]  ;;  %v7106_v10 = vld [vmem:[#allocation219_spill] sm:$0xff] }
 0x391   :  { %v5883_v2 = vmul.f32 %v5061_v4, %v7099_v31  ;;  %v5887_v57 = vmul.f32 %v5061_v4, %v7100_v12  ;;  %v1318_v14 = vadd.f32 %v1306_v5, %v1241_v28  ;;  %v1407_v37 = vmul.f32 %v7102_v22, %v7101_v61  ;;  %v7104_v13 = vld [vmem:[#allocation28_spill] sm:$0xff]  ;;  %v7107_v26 = vld [vmem:[#allocation95_spill] sm:$0xff]  ;;  %v7108_v4 = vld [vmem:[#allocation150_spill] sm:$0xff] }
 0x392   :  { %7098 = vst [vmem:[#allocation27_spill] sm:$0xff] %v5879_v50  ;;  %v914_v54 = vadd.f32 %v902_v41, %v837_v52  ;;  %v762_v34 = vadd.f32 %v7103_v45, %v661_v51  ;;  %v1163_v36 = vadd.f32 %v5745_v44, %v1086_v39  ;;  %v1826_v59 = vadd.f32 %v7104_v13, %v1749_v15  ;;  %v7109_v5 = vld [vmem:[#allocation133_spill] sm:$0xff]  ;;  %v5905_v51 = vld [vmem:[%s6405_s0 + $0x72] sm:$0x3f]  ;;  %v7111_v44 = vld [vmem:[#allocation218_spill] sm:$0xff] }
 0x393   :  { %v989_v20 = vadd.f32 %v7105_v21, %v912_v40  ;;  %v1484_v8 = vmul.f32 %v7107_v26, %v7106_v10  ;;  %v1089_v0 = vadd.f32 %v7108_v4, %v987_v33  ;;  %v1740_v28 = vmul.f32 %v5439_v16, %v7109_v5  ;;  %7110 = vst [vmem:[#allocation30_spill] sm:$0xff] %v5905_v51  ;;  %v7112_v15 = vld [vmem:[#allocation267_spill] sm:$0xff]  ;;  %v7113_v52 = vld [vmem:[#allocation134_spill] sm:$0xff]  ;;  %v7114_v33 = vld [vmem:[#allocation205_spill] sm:$0xff] }
 0x394   :  { %2800 = vperm.xlu1 %3153, %v5905_v51   ;;  %v904_v39 = vmul.f32 %v3201_v1, %v7111_v44  ;;  %v1240_v41 = vadd.f32 %v1228_v3, %v1163_v36  ;;  %v1891_v40 = vmul.f32 %v5651_v38, %v7112_v15  ;;  %v1968_v42 = vmul.f32 %v5656_v23, %v7113_v52  ;;  %v7115_v61 = vld [vmem:[#allocation231_spill] sm:$0xff]  ;;  %v7116_v22 = vld [vmem:[#allocation45_spill] sm:$0xff]  ;;  %v7117_v13 = vld [vmem:[#allocation140_spill] sm:$0xff]  ;;  %v5922_v15 = vpop.permute.xlu1 %2436 }
 0x395   :  { %v1305_v31 = vmul.f32 %v7086_v29, %v7114_v33  ;;  %v1419_v12 = vadd.f32 %v1407_v37, %v1318_v14  ;;  %v1561_v45 = vmul.f32 %v7116_v22, %v7115_v61  ;;  %v1752_v21 = vadd.f32 %v1740_v28, %v7117_v13  ;;  %v7118_v10 = vld [vmem:[#allocation52_spill] sm:$0xff]  ;;  %v7119_v5 = vld [vmem:[#allocation9_spill] sm:$0xff]  ;;  %v7120_v3 = vld [vmem:[#allocation222_spill] sm:$0xff] }
 0x396   :  { %v991_v4 = vadd.f32 %v7118_v10, %v914_v54  ;;  %v839_v1 = vadd.f32 %v7119_v5, %v762_v34  ;;  %v1231_v36 = vmul.f32 %v7080_v46, %v7120_v3  ;;  %v1903_v44 = vadd.f32 %v1891_v40, %v1826_v59  ;;  %v7121_v52 = vld [vmem:[#allocation209_spill] sm:$0xff]  ;;  %v7122_v37 = vld [vmem:[#allocation243_spill] sm:$0xff]  ;;  %v7125_v13 = vld [vmem:[#allocation152_spill] sm:$0xff] }
 0x397   :  { %v1308_v51 = vmul.f32 %v7086_v29, %v7121_v52  ;;  %v1496_v33 = vadd.f32 %v1484_v8, %v1419_v12  ;;  %v1166_v14 = vadd.f32 %v1154_v48, %v1089_v0  ;;  %v7123_v58 = vld [vmem:[#allocation75_spill] sm:$0xff]  ;;  %v7124_v50 = vmov 2   ;;  %v7130_v52 = vld [vmem:[#allocation224_spill] sm:$0xff] }
 0x398   :  { %v1638_v61 = vmul.f32 %v7123_v58, %v7122_v37  ;;  %3155 = vset.pattern.permute.xlu1 %v7124_v50  ;;  %v916_v28 = vadd.f32 %v904_v39, %v839_v1  ;;  %v1317_v54 = vadd.f32 %v1305_v31, %v1240_v41  ;;  %v1091_v34 = vadd.f32 %v7125_v13, %v989_v20  ;;  %v7126_v5 = vld [vmem:[#allocation71_spill] sm:$0xff]  ;;  %v7131_v39 = vld [vmem:[#allocation154_spill] sm:$0xff]  ;;  %v7132_v31 = vld [vmem:[#allocation8_spill] sm:$0xff] }
 0x399   :  { %v1980_v10 = vadd.f32 %v1968_v42, %v1903_v44  ;;  %2837 = vperm.xlu1 %3155, %v7126_v5   ;;  %v7127_v59 = vld [vmem:[#allocation211_spill] sm:$0xff]  ;;  %v1573_v3 = vadd.f32 %v1561_v45, %v1496_v33  ;;  %v1739_v8 = vmul.f32 %v5439_v16, %v7128_v55  ;;  %v1243_v12 = vadd.f32 %v1231_v36, %v1166_v14  ;;  %v5941_v42 = vpop.permute.xlu1 %2444  ;;  %v7137_v37 = vld [vmem:[#allocation157_spill] sm:$0xff] }
 0x39a   :  { %v1310_v40 = vmul.f32 %v7086_v29, %v7127_v59  ;;  %v7129_v48 = vld [vmem:[#allocation31_spill] sm:$0xff]  ;;  %v1233_v50 = vmul.f32 %v7080_v46, %v7130_v52  ;;  %v1093_v41 = vadd.f32 %v7131_v39, %v991_v4  ;;  %v2070_v20 = vmul.f32 %v5464_v32, %v7132_v31  ;;  %v7138_v5 = vld [vmem:[#allocation213_spill] sm:$0xff] }
 0x39b   :  { %v1829_v0 = vadd.f32 %v7129_v48, %v1752_v21  ;;  %v1650_v1 = vadd.f32 %v1638_v61, %v1573_v3  ;;  %v7133_v44 = vld [vmem:[#allocation259_spill] sm:$0xff]  ;;  %v1168_v46 = vadd.f32 %v1156_v27, %v1091_v34  ;;  %v1418_v4 = vadd.f32 %v7137_v37, %v1317_v54  ;;  %v7139_v3 = vld [vmem:[#allocation269_spill] sm:$0xff] }
 0x39c   :  { %v1816_v45 = vmul.f32 %v5575_v17, %v7133_v44  ;;  %v7134_v33 = vld [vmem:[#allocation3_spill] sm:$0xff]  ;;  %v2082_v13 = vadd.f32 %v2070_v20, %v1980_v10  ;;  %v1312_v61 = vmul.f32 %v7086_v29, %v7138_v5  ;;  %v1893_v48 = vmul.f32 %v5651_v38, %v7139_v3  ;;  %v7141_v44 = vld [vmem:[#allocation217_spill] sm:$0xff] }
 0x39d   :  { %v1894_v16 = vmul.f32 %v5651_v38, %v7134_v33  ;;  %v7135_v55 = vld [vmem:[#allocation107_spill] sm:$0xff]  ;;  %2845 = vperm.xlu1 %3155, %v7066_v49   ;;  %v1751_v59 = vadd.f32 %v1739_v8, %v1650_v1  ;;  %v1483_v27 = vmul.f32 %v7107_v26, %v7141_v44  ;;  %v1245_v54 = vadd.f32 %v1233_v50, %v1168_v46  ;;  %v5962_v34 = vpop.permute.xlu1 %2452  ;;  %v7147_v46 = vld [vmem:[#allocation120_spill] sm:$0xff]  ;;  %v7151_v44 = vld [vmem:[#allocation242_spill] sm:$0xff] }
 0x39e   :  { %v1971_v21 = vmul.f32 %v5656_v23, %v7135_v55  ;;  %v7136_v36 = vld [vmem:[#allocation15_spill] sm:$0xff]  ;;  %v1170_v10 = vadd.f32 %v5883_v2, %v1093_v41  ;;  %v7144_v55 = vld [vmem:[#allocation156_spill] sm:$0xff]  ;;  %v2073_v5 = vmul.f32 %v5464_v32, %v7147_v46 }
 0x39f   :  { %v993_v14 = vadd.f32 %v7136_v36, %v916_v28  ;;  %v1906_v52 = vadd.f32 %v1894_v16, %v1829_v0  ;;  %v7140_v39 = vld [vmem:[#allocation215_spill] sm:$0xff]  ;;  %v1320_v28 = vadd.f32 %v1308_v51, %v1243_v12  ;;  %v1828_v20 = vadd.f32 %v1816_v45, %v1751_v59  ;;  %v7145_v12 = vld [vmem:[#allocation230_spill] sm:$0xff] }
 0x3a0   :  { %v5958_v31 = vmul.f32 %v7086_v29, %v7140_v39  ;;  %v7142_v33 = vld [vmem:[#allocation39_spill] sm:$0xff]  ;;  %v7143_v29 = vld [vmem:[#allocation226_spill] sm:$0xff]  ;;  %v1495_v37 = vadd.f32 %v1483_v27, %v1418_v4  ;;  %v2159_v51 = vadd.f32 %v5688_v56, %v2082_v13  ;;  %v1560_v50 = vmul.f32 %v7116_v22, %v7145_v12  ;;  %v7150_v13 = vld [vmem:[#allocation16_spill] sm:$0xff] }
 0x3a1   :  { %v1970_v8 = vmul.f32 %v5656_v23, %v7142_v33  ;;  %v1983_v1 = vadd.f32 %v1971_v21, %v1906_v52  ;;  %v3205_v0 = vld [vmem:[%s6406_s1 + $0xe] ss:$0 sm:$0xff]  ;;  %v1095_v36 = vadd.f32 %v7144_v55, %v993_v14  ;;  %v1905_v41 = vadd.f32 %v1893_v48, %v1828_v20  ;;  %v5987_v39 = vpop.permute.xlu1 %2460  ;;  %v3207_v12 = vld [vmem:[%s6405_s0 + $0x3a] sm:$0x3f] }
 0x3a2   :  { %v1235_v16 = vmul.f32 %v3205_v0, %v7143_v29  ;;  %v3206_v2 = vld [vmem:[%s6405_s0 + $0x2a] sm:$0x3f]  ;;  %v1322_v59 = vadd.f32 %v1310_v40, %v1245_v54  ;;  %v2301_v52 = vmul.f32 %v5758_v60, %v7150_v13  ;;  %v1637_v48 = vmul.f32 %v7123_v58, %v7151_v44  ;;  %v7153_v40 = vld [vmem:[#allocation228_spill] sm:$0xff] }
 0x3a3   :  { %2849 = vperm.xlu1 %3155, %v3206_v2   ;;  %v7146_v45 = vld [vmem:[#allocation47_spill] sm:$0xff]  ;;  %v1982_v27 = vadd.f32 %v1970_v8, %v1905_v41  ;;  %v2085_v29 = vadd.f32 %v2073_v5, %v1983_v1  ;;  %v1237_v54 = vmul.f32 %v3205_v0, %v7153_v40  ;;  %v2402_v2 = vmul.f32 %v5784_v18, %v5706_v47  ;;  %v7158_v44 = vld [vmem:[#allocation160_spill] sm:$0xff] }
 0x3a4   :  { %v2072_v21 = vmul.f32 %v5464_v32, %v7146_v45  ;;  %v7148_v14 = vld [vmem:[#allocation159_spill] sm:$0xff]  ;;  %v1247_v55 = vadd.f32 %v1235_v16, %v1170_v10  ;;  %v7154_v45 = vld [vmem:[#allocation221_spill] sm:$0xff]  ;;  %v1572_v8 = vadd.f32 %v1560_v50, %v1495_v37  ;;  %v1172_v16 = vadd.f32 %v5887_v57, %v1095_v36 }
 0x3a5   :  { %v1421_v4 = vadd.f32 %v7148_v14, %v1320_v28  ;;  %v7149_v3 = vld [vmem:[#allocation135_spill] sm:$0xff]  ;;  %v1486_v46 = vmul.f32 %v7107_v26, %v7154_v45  ;;  %v7155_v14 = vld [vmem:[#allocation136_spill] sm:$0xff]  ;;  %v2162_v37 = vadd.f32 %v5701_v6, %v2085_v29  ;;  %v3208_v57 = vld [vmem:[%s6405_s0 + $0x5a] sm:$0x3f] }
 0x3a6   :  { %v2224_v56 = vmul.f32 %v5753_v62, %v7149_v3  ;;  %v7152_v20 = vld [vmem:[#allocation79_spill] sm:$0xff]  ;;  %v2084_v41 = vadd.f32 %v2072_v21, %v1982_v27  ;;  %v2226_v1 = vmul.f32 %v5753_v62, %v7155_v14  ;;  %v6007_v3 = vpop.permute.xlu1 %2468  ;;  %v1324_v50 = vadd.f32 %v1312_v61, %v1247_v55  ;;  %v7162_v61 = vld [vmem:[#allocation234_spill] sm:$0xff]  ;;  %v6032_v45 = vld [vmem:[%s6406_s1 + $0x1e] ss:$0 sm:$0xff] }
 0x3a7   :  { %v2149_v33 = vmul.f32 %v5665_v63, %v7152_v20  ;;  %2857 = vperm.xlu1 %3155, %v3207_v12   ;;  %v7156_v10 = vld [vmem:[#allocation223_spill] sm:$0xff]  ;;  %v2303_v20 = vmul.f32 %v5758_v60, %v7158_v44  ;;  %v1249_v21 = vadd.f32 %v1237_v54, %v1172_v16  ;;  %v1498_v27 = vadd.f32 %v1486_v46, %v1421_v4  ;;  %v7163_v29 = vld [vmem:[#allocation18_spill] sm:$0xff] }
 0x3a8   :  { %v2236_v28 = vadd.f32 %v2224_v56, %v2159_v51  ;;  %v1488_v0 = vmul.f32 %v7107_v26, %v7156_v10  ;;  %v7157_v51 = vld [vmem:[#allocation161_spill] sm:$0xff]  ;;  %v1649_v56 = vadd.f32 %v1637_v48, %v1572_v8  ;;  %v7159_v26 = vld [vmem:[#allocation232_spill] sm:$0xff]  ;;  %v1565_v4 = vmul.f32 %v7116_v22, %v7162_v61  ;;  %v7165_v46 = vld [vmem:[#allocation23_spill] sm:$0xff] }
 0x3a9   :  { %v1423_v47 = vadd.f32 %v7157_v51, %v1322_v59  ;;  %v2161_v13 = vadd.f32 %v2149_v33, %v2084_v41  ;;  %v1563_v36 = vmul.f32 %v7116_v22, %v7159_v26  ;;  %v7160_v59 = vld [vmem:[#allocation257_spill] sm:$0xff]  ;;  %v7161_v33 = vld [vmem:[#allocation142_spill] sm:$0xff]  ;;  %v2304_v55 = vmul.f32 %v5758_v60, %v7163_v29  ;;  %v3209_v16 = vld [vmem:[%s6405_s0 + $0x6a] sm:$0x3f] }
 0x3aa   :  { %v2313_v5 = vadd.f32 %v2301_v52, %v2236_v28  ;;  %v1815_v52 = vmul.f32 %v5575_v17, %v7160_v59  ;;  %v2227_v28 = vmul.f32 %v5753_v62, %v7161_v33  ;;  %v2404_v54 = vmul.f32 %v5784_v18, %v5730_v9  ;;  %v3212_v29 = vld [vmem:[%s6406_s1 + $0x12] ss:$0 sm:$0xff] }
 0x3ab   :  { %2865 = vperm.xlu1 %3155, %v3208_v57   ;;  %v2238_v48 = vadd.f32 %v2226_v1, %v2161_v13  ;;  %v1500_v6 = vadd.f32 %v1488_v0, %v1423_v47  ;;  %v1750_v8 = vadd.f32 %v7165_v46, %v1649_v56  ;;  %v2506_v1 = vpop.permute.xlu1 %2505  ;;  %v2405_v22 = vmul.f32 %v5784_v18, %v5760_v43  ;;  %v7167_v43 = vld [vmem:[#allocation244_spill] sm:$0xff]  ;;  %v7169_v57 = vld [vmem:[#allocation229_spill] sm:$0xff] }
 0x3ac   :  { %v2414_v40 = vadd.f32 %v2402_v2, %v2313_v5  ;;  %v7164_v2 = vld [vmem:[#allocation119_spill] sm:$0xff]  ;;  %v2239_v14 = vadd.f32 %v2227_v28, %v2162_v37  ;;  %v2481_v10 = vmul.f32 %v5803_v19, %v5922_v15  ;;  %v2556_v0 = vmul.f32 %v6032_v45, %v2506_v1  ;;  %v7166_v5 = vld [vmem:[#allocation240_spill] sm:$0xff]  ;;  %v7168_v37 = vld [vmem:[#allocation189_spill] sm:$0xff] }
 0x3ad   :  { %v1640_v12 = vmul.f32 %v7123_v58, %v7164_v2  ;;  %v2315_v41 = vadd.f32 %v2303_v20, %v2238_v48  ;;  %v1326_v51 = vadd.f32 %v5958_v31, %v1249_v21  ;;  %v1575_v47 = vadd.f32 %v1563_v36, %v1498_v27  ;;  %v7170_v48 = vld [vmem:[#allocation6_spill] sm:$0xff]  ;;  %v3211_v28 = vld [vmem:[%s6406_s1 + $0x11] ss:$0 sm:$0xff] }
 0x3ae   :  { %v2491_v9 = vadd.f32 %v5818_v30, %v2414_v40  ;;  %v1892_v56 = vmul.f32 %v5651_v38, %v7166_v5  ;;  %v1827_v13 = vadd.f32 %v1815_v52, %v1750_v8  ;;  %v1642_v44 = vmul.f32 %v7123_v58, %v7167_v43  ;;  %v3210_v58 = vld [vmem:[%s6405_s0 + $0x7a] sm:$0x3f]  ;;  %v7175_v8 = vld [vmem:[#allocation162_spill] sm:$0xff] }
 0x3af   :  { %2873 = vperm.xlu1 %3155, %v3209_v16   ;;  %v2316_v15 = vadd.f32 %v2304_v55, %v2239_v14  ;;  %v2416_v20 = vadd.f32 %v2404_v54, %v2315_v41  ;;  %v2482_v40 = vmul.f32 %v5803_v19, %v7168_v37  ;;  %v1425_v26 = vadd.f32 %v7169_v57, %v1324_v50  ;;  %v2514_v21 = vpop.permute.xlu1 %2513  ;;  %v7171_v50 = vld [vmem:[#allocation225_spill] sm:$0xff]  ;;  %v7181_v57 = vld [vmem:[#allocation191_spill] sm:$0xff] }
 0x3b0   :  { %v6049_v30 = vadd.f32 %v2556_v0, %v2491_v9  ;;  %v1652_v59 = vadd.f32 %v1640_v12, %v1575_v47  ;;  %v1969_v31 = vmul.f32 %v5656_v23, %v7170_v48  ;;  %v1577_v27 = vadd.f32 %v1565_v4, %v1500_v6  ;;  %v7172_v6 = vld [vmem:[#allocation236_spill] sm:$0xff]  ;;  %v7173_v55 = vld [vmem:[#allocation261_spill] sm:$0xff]  ;;  %v7174_v12 = vld [vmem:[#allocation227_spill] sm:$0xff] }
 0x3b1   :  { %v2417_v36 = vadd.f32 %v2405_v22, %v2316_v15  ;;  %v2493_v52 = vadd.f32 %v2481_v10, %v2416_v20  ;;  %v2558_v33 = vmul.f32 %v6032_v45, %v2514_v21  ;;  %v1490_v61 = vmul.f32 %v3211_v28, %v7171_v50  ;;  %v3213_v10 = vld [vmem:[%s6406_s1 + $0x13] ss:$0 sm:$0xff]  ;;  %v7176_v9 = vld [vmem:[#allocation122_spill] sm:$0xff]  ;;  %v7177_v16 = vld [vmem:[#allocation233_spill] sm:$0xff] }
 0x3b2   :  { %v1567_v4 = vmul.f32 %v3212_v29, %v7172_v6  ;;  %v1818_v54 = vmul.f32 %v5575_v17, %v7173_v55  ;;  %v1904_v2 = vadd.f32 %v1892_v56, %v1827_v13  ;;  %v1492_v46 = vmul.f32 %v3211_v28, %v7174_v12  ;;  %v7178_v15 = vld [vmem:[#allocation238_spill] sm:$0xff]  ;;  %v7179_v13 = vld [vmem:[#allocation263_spill] sm:$0xff] }
 0x3b3   :  { %2881 = vperm.xlu1 %3155, %v3210_v58   ;;  %v1427_v41 = vadd.f32 %v7175_v8, %v1326_v51  ;;  %v1654_v14 = vadd.f32 %v1642_v44, %v1577_v27  ;;  %v6072_v1 = vadd.f32 %v2558_v33, %v2493_v52  ;;  %v1502_v22 = vadd.f32 %v1490_v61, %v1425_v26  ;;  %v2518_v43 = vpop.permute.xlu1 %2517  ;;  %v7182_v27 = vld [vmem:[#allocation129_spill] sm:$0xff]  ;;  %v7184_v58 = vld [vmem:[#allocation163_spill] sm:$0xff] }
 0x3b4   :  { %v1644_v0 = vmul.f32 %v3213_v10, %v7176_v9  ;;  %v1753_v47 = vadd.f32 %v7177_v16, %v1652_v59  ;;  %v1981_v5 = vadd.f32 %v1969_v31, %v1904_v2  ;;  %v1569_v56 = vmul.f32 %v3212_v29, %v7178_v15  ;;  %v7183_v52 = vld [vmem:[#allocation245_spill] sm:$0xff]  ;;  %v7186_v29 = vld [vmem:[#allocation66_spill] sm:$0xff] }
 0x3b5   :  { %v1820_v20 = vmul.f32 %v5575_v17, %v7179_v13  ;;  %v2494_v51 = vadd.f32 %v2482_v40, %v2417_v36  ;;  %v2559_v44 = vmul.f32 %v6032_v45, %v2518_v43  ;;  %v7180_v37 = vmov 3   ;;  %v7185_v36 = vld [vmem:[#allocation241_spill] sm:$0xff] }
 0x3b6   :  { %v2484_v26 = vmul.f32 %v5803_v19, %v7181_v57  ;;  %v1579_v48 = vadd.f32 %v1567_v4, %v1502_v22  ;;  %v1830_v21 = vadd.f32 %v1818_v54, %v1753_v47  ;;  %v2148_v59 = vmul.f32 %v5665_v63, %v7182_v27  ;;  %v7187_v4 = vld [vmem:[#allocation35_spill] sm:$0xff]  ;;  %v7188_v8 = vld [vmem:[#allocation193_spill] sm:$0xff] }
 0x3b7   :  { %3157 = vset.pattern.permute.xlu1 %v7180_v37  ;;  %v1504_v31 = vadd.f32 %v1492_v46, %v1427_v41  ;;  %v1646_v33 = vmul.f32 %v3213_v10, %v7183_v52  ;;  %v1755_v28 = vadd.f32 %v7184_v58, %v1654_v14  ;;  %v6091_v40 = vadd.f32 %v2559_v44, %v2494_v51  ;;  %v2526_v54 = vpop.permute.xlu1 %2525  ;;  %v7189_v14 = vld [vmem:[#allocation265_spill] sm:$0xff]  ;;  %v7194_v44 = vld [vmem:[#allocation139_spill] sm:$0xff] }
 0x3b8   :  { %2918 = vperm.xlu1 %3157, %v5778_v11   ;;  %v1895_v50 = vmul.f32 %v5651_v38, %v7185_v36  ;;  %v1656_v61 = vadd.f32 %v1644_v0, %v1579_v48  ;;  %v1972_v6 = vmul.f32 %v5656_v23, %v7186_v29  ;;  %v2083_v55 = vadd.f32 %v7187_v4, %v1981_v5  ;;  %v7190_v0 = vld [vmem:[#allocation56_spill] sm:$0xff]  ;;  %v7192_v15 = vld [vmem:[#allocation65_spill] sm:$0xff]  ;;  %v7198_v36 = vld [vmem:[#allocation195_spill] sm:$0xff] }
 0x3b9   :  { %v1581_v2 = vadd.f32 %v1569_v56, %v1504_v31  ;;  %v1832_v12 = vadd.f32 %v1820_v20, %v1755_v28  ;;  %v2496_v11 = vadd.f32 %v2484_v26, %v5805_v24  ;;  %v2561_v46 = vmul.f32 %v6032_v45, %v2526_v54  ;;  %v7191_v5 = vld [vmem:[#allocation12_spill] sm:$0xff]  ;;  %v7193_v13 = vld [vmem:[#allocation29_spill] sm:$0xff] }
 0x3ba   :  { %v2486_v41 = vmul.f32 %v5803_v19, %v7188_v8  ;;  %v1822_v22 = vmul.f32 %v5575_v17, %v7189_v14  ;;  %v1907_v10 = vadd.f32 %v1895_v50, %v1830_v21  ;;  %v2160_v9 = vadd.f32 %v2148_v59, %v2083_v55  ;;  %v7196_v59 = vld [vmem:[#allocation88_spill] sm:$0xff]  ;;  %v7201_v55 = vld [vmem:[#allocation117_spill] sm:$0xff] }
 0x3bb   :  { %v1897_v16 = vmul.f32 %v5651_v38, %v7190_v0  ;;  %v1658_v47 = vadd.f32 %v1646_v33, %v1581_v2  ;;  %v1974_v43 = vmul.f32 %v5656_v23, %v7191_v5  ;;  %v6109_v24 = vadd.f32 %v2561_v46, %v2496_v11  ;;  %v2534_v57 = vpop.permute.xlu1 %2533  ;;  %v7197_v33 = vld [vmem:[#allocation99_spill] sm:$0xff]  ;;  %v7205_v5 = vld [vmem:[#allocation24_spill] sm:$0xff] }
 0x3bc   :  { %2922 = vperm.xlu1 %3157, %v7066_v49   ;;  %v2225_v56 = vmul.f32 %v5753_v62, %v7192_v15  ;;  %v1757_v20 = vadd.f32 %v7193_v13, %v1656_v61  ;;  %v1984_v51 = vadd.f32 %v1972_v6, %v1907_v10  ;;  %v2302_v37 = vmul.f32 %v5758_v60, %v7194_v44  ;;  %v7195_v49 = vld [vmem:[#allocation266_spill] sm:$0xff]  ;;  %v7199_v61 = vld [vmem:[#allocation165_spill] sm:$0xff]  ;;  %v7202_v2 = vld [vmem:[#allocation167_spill] sm:$0xff] }
 0x3bd   :  { %v1824_v26 = vmul.f32 %v5575_v17, %v7195_v49  ;;  %v1909_v48 = vadd.f32 %v1897_v16, %v1832_v12  ;;  %v2498_v21 = vadd.f32 %v2486_v41, %v5830_v53  ;;  %v2563_v27 = vmul.f32 %v6032_v45, %v2534_v57  ;;  %v7200_v53 = vld [vmem:[#allocation59_spill] sm:$0xff]  ;;  %v7204_v10 = vld [vmem:[#allocation196_spill] sm:$0xff]  ;;  %v7210_v49 = vld [vmem:[#allocation237_spill] sm:$0xff] }
 0x3be   :  { %v2403_v31 = vmul.f32 %v5784_v18, %v7196_v59  ;;  %v1834_v52 = vadd.f32 %v1822_v22, %v1757_v20  ;;  %v2151_v58 = vmul.f32 %v5665_v63, %v7197_v33  ;;  %v2237_v28 = vadd.f32 %v2225_v56, %v2160_v9  ;;  %v7207_v56 = vld [vmem:[#allocation41_spill] sm:$0xff]  ;;  %v7208_v20 = vld [vmem:[#allocation239_spill] sm:$0xff]  ;;  %v7209_v44 = vld [vmem:[#allocation68_spill] sm:$0xff] }
 0x3bf   :  { %v2488_v50 = vmul.f32 %v5803_v19, %v7198_v36  ;;  %v1759_v17 = vadd.f32 %v7199_v61, %v1658_v47  ;;  %v1986_v29 = vadd.f32 %v1974_v43, %v1909_v48  ;;  %v6128_v6 = vadd.f32 %v2563_v27, %v2498_v21  ;;  %v2542_v46 = vpop.permute.xlu1 %2541  ;;  %v7206_v43 = vld [vmem:[#allocation62_spill] sm:$0xff]  ;;  %v7211_v59 = vld [vmem:[#allocation27_spill] sm:$0xff]  ;;  %v7214_v61 = vld [vmem:[#allocation69_spill] sm:$0xff] }
 0x3c0   :  { %2930 = vperm.xlu1 %3157, %v5826_v25   ;;  %v1899_v4 = vmul.f32 %v5651_v38, %v7200_v53  ;;  %v1976_v54 = vmul.f32 %v5656_v23, %v7201_v55  ;;  %v2086_v12 = vadd.f32 %v7202_v2, %v1984_v51  ;;  %v2314_v11 = vadd.f32 %v2302_v37, %v2237_v28  ;;  %v7203_v25 = vld [vmem:[#allocation128_spill] sm:$0xff] }
 0x3c1   :  { %v1836_v8 = vadd.f32 %v1824_v26, %v1759_v17  ;;  %v2153_v41 = vmul.f32 %v5665_v63, %v7203_v25  ;;  %v2500_v14 = vadd.f32 %v2488_v50, %v5855_v35  ;;  %v2565_v22 = vmul.f32 %v6032_v45, %v2542_v46  ;;  %v7215_v17 = vld [vmem:[#allocation125_spill] sm:$0xff]  ;;  %v7218_v46 = vld [vmem:[#allocation86_spill] sm:$0xff] }
 0x3c2   :  { %v2490_v9 = vmul.f32 %v5803_v19, %v7204_v10  ;;  %v1911_v0 = vadd.f32 %v1899_v4, %v1834_v52  ;;  %v2163_v16 = vadd.f32 %v2151_v58, %v2086_v12  ;;  %v2480_v47 = vmul.f32 %v5803_v19, %v5894_v7  ;;  %v7213_v58 = vld [vmem:[#allocation77_spill] sm:$0xff]  ;;  %v7217_v12 = vld [vmem:[#allocation268_spill] sm:$0xff]  ;;  %v7219_v25 = vld [vmem:[#allocation90_spill] sm:$0xff] }
 0x3c3   :  { %v1901_v15 = vmul.f32 %v5651_v38, %v7206_v43  ;;  %v1978_v13 = vmul.f32 %v5656_v23, %v7207_v56  ;;  %v2088_v35 = vadd.f32 %v7208_v20, %v1986_v29  ;;  %v6149_v51 = vadd.f32 %v2565_v22, %v2500_v14  ;;  %v2550_v48 = vpop.permute.xlu1 %2549  ;;  %v7212_v23 = vld [vmem:[#allocation83_spill] sm:$0xff]  ;;  %v7216_v4 = vld [vmem:[#allocation85_spill] sm:$0xff]  ;;  %v7221_v43 = vld [vmem:[#allocation30_spill] sm:$0xff] }
 0x3c4   :  { %2938 = vperm.xlu1 %3157, %v7205_v5   ;;  %v2228_v37 = vmul.f32 %v5753_v62, %v7209_v44  ;;  %v1988_v57 = vadd.f32 %v1976_v54, %v1911_v0  ;;  %v2305_v26 = vmul.f32 %v5758_v60, %v7210_v49  ;;  %v2415_v7 = vadd.f32 %v2403_v31, %v2314_v11  ;;  %v7220_v14 = vld [vmem:[#allocation101_spill] sm:$0xff] }
 0x3c5   :  { %v1913_v21 = vadd.f32 %v1901_v15, %v1836_v8  ;;  %v2165_v27 = vadd.f32 %v2153_v41, %v2088_v35  ;;  %v2502_v38 = vadd.f32 %v2490_v9, %v7211_v59  ;;  %v2567_v52 = vmul.f32 %v6032_v45, %v2550_v48  ;;  %v6179_v9 = vld [vmem:[%s6406_s1 + $0x1f] ss:$0 sm:$0xff]  ;;  %v7222_v15 = vld [vmem:[#allocation127_spill] sm:$0xff]  ;;  %v7225_v59 = vld [vmem:[#allocation130_spill] sm:$0xff] }
 0x3c6   :  { %v2078_v33 = vmul.f32 %v5464_v32, %v7212_v23  ;;  %v2155_v28 = vmul.f32 %v5665_v63, %v7213_v58  ;;  %v2240_v36 = vadd.f32 %v2228_v37, %v2163_v16  ;;  %v2492_v50 = vadd.f32 %v2480_v47, %v2415_v7  ;;  %v7223_v20 = vld [vmem:[#allocation25_spill] sm:$0xff] }
 0x3c7   :  { %v2230_v31 = vmul.f32 %v5753_v62, %v7215_v17  ;;  %v1990_v29 = vadd.f32 %v1978_v13, %v1913_v21  ;;  %v6164_v53 = vadd.f32 %v2567_v52, %v2502_v38  ;;  %v2557_v55 = vmul.f32 %v6032_v45, %v7216_v4  ;;  %v2587_v0 = vpop.permute.xlu1 %2586  ;;  %v7226_v52 = vld [vmem:[#allocation248_spill] sm:$0xff]  ;;  %v7227_v58 = vld [vmem:[#allocation21_spill] sm:$0xff] }
 0x3c8   :  { %2946 = vperm.xlu1 %3157, %v7214_v61   ;;  %v2090_v54 = vadd.f32 %v2078_v33, %v1988_v57  ;;  %v2317_v2 = vadd.f32 %v2305_v26, %v2240_v36  ;;  %v2307_v11 = vmul.f32 %v5758_v60, %v7217_v12  ;;  %v2080_v8 = vmul.f32 %v5464_v32, %v7218_v46  ;;  %v7224_v57 = vld [vmem:[#allocation92_spill] sm:$0xff]  ;;  %v7228_v61 = vld [vmem:[#allocation94_spill] sm:$0xff] }
 0x3c9   :  { %v2406_v41 = vmul.f32 %v5784_v18, %v7219_v25  ;;  %v2157_v22 = vmul.f32 %v5665_v63, %v7220_v14  ;;  %v2242_v10 = vadd.f32 %v2230_v31, %v2165_v27  ;;  %v2483_v47 = vmul.f32 %v5803_v19, %v5941_v42 }
 0x3ca   :  { %v2167_v16 = vadd.f32 %v2155_v28, %v2090_v54  ;;  %v2569_v5 = vadd.f32 %v2557_v55, %v2492_v50  ;;  %v2634_v32 = vmul.f32 %v6179_v9, %v2587_v0  ;;  %v2232_v56 = vmul.f32 %v5753_v62, %v7222_v15  ;;  %v7229_v54 = vld [vmem:[#allocation250_spill] sm:$0xff] }
 0x3cb   :  { %v2092_v63 = vadd.f32 %v2080_v8, %v1990_v29  ;;  %v2319_v13 = vadd.f32 %v2307_v11, %v2242_v10  ;;  %v2309_v35 = vmul.f32 %v5758_v60, %v7223_v20  ;;  %v2418_v44 = vadd.f32 %v2406_v41, %v2317_v2  ;;  %v2591_v26 = vpop.permute.xlu1 %2590 }
 0x3cc   :  { %2954 = vperm.xlu1 %3157, %v7221_v43   ;;  %v6189_v37 = vadd.f32 %v2634_v32, %v2569_v5  ;;  %v2408_v49 = vmul.f32 %v5784_v18, %v7224_v57  ;;  %v2244_v7 = vadd.f32 %v2232_v56, %v2167_v16  ;;  %v2485_v21 = vmul.f32 %v5803_v19, %v5962_v34 }
 0x3cd   :  { %v2169_v42 = vadd.f32 %v2157_v22, %v2092_v63  ;;  %v2495_v48 = vadd.f32 %v2483_v47, %v2418_v44  ;;  %v2635_v27 = vmul.f32 %v6179_v9, %v2591_v26  ;;  %v2234_v38 = vmul.f32 %v5753_v62, %v7225_v59  ;;  %v7231_v22 = vld [vmem:[#allocation252_spill] sm:$0xff] }
 0x3ce   :  { %v2560_v23 = vmul.f32 %v6032_v45, %v7226_v52  ;;  %v2321_v33 = vadd.f32 %v2309_v35, %v2244_v7  ;;  %v2311_v28 = vmul.f32 %v5758_v60, %v7227_v58  ;;  %v2420_v36 = vadd.f32 %v2408_v49, %v2319_v13  ;;  %v6232_v35 = vld [vmem:[%s6406_s1 + $0x20] ss:$0 sm:$0xff] }
 0x3cf   :  { %v2647_v50 = vadd.f32 %v2635_v27, %v6072_v1  ;;  %v2410_v17 = vmul.f32 %v5784_v18, %v7228_v61  ;;  %v2246_v31 = vadd.f32 %v2234_v38, %v2169_v42  ;;  %v2599_v34 = vpop.permute.xlu1 %2598  ;;  %v2487_v4 = vmul.f32 %v5803_v19, %v5987_v39  ;;  %v7230_v1 = vld [vmem:[#allocation96_spill] sm:$0xff]  ;;  %v2583_v42 = vpop.permute.xlu0 %2582 }
 0x3d0   :  { %v2497_v29 = vadd.f32 %v2485_v21, %v2420_v36  ;;  %v2572_v62 = vadd.f32 %v2560_v23, %v2495_v48  ;;  %v2637_v55 = vmul.f32 %v6179_v9, %v2599_v34  ;;  %v2562_v2 = vmul.f32 %v6032_v45, %v7229_v54 }
 0x3d1   :  { %v2323_v12 = vadd.f32 %v2311_v28, %v2246_v31  ;;  %v2422_v60 = vadd.f32 %v2410_v17, %v2321_v33  ;;  %v2412_v46 = vmul.f32 %v5784_v18, %v7230_v1  ;;  %v2489_v41 = vmul.f32 %v5803_v19, %v6007_v3  ;;  %v7232_v18 = vld [vmem:[#allocation254_spill] sm:$0xff] }
 0x3d2   :  { %v6210_v11 = vadd.f32 %v2637_v55, %v2572_v62  ;;  %v2574_v14 = vadd.f32 %v2562_v2, %v2497_v29  ;;  %v2564_v10 = vmul.f32 %v6032_v45, %v7231_v22  ;;  %v2566_v15 = vmul.f32 %v6032_v45, %v7232_v18  ;;  %v7233_v55 = vld [vmem:[#allocation197_spill] sm:$0xff]  ;;  %v6264_v2 = vld [vmem:[%s6406_s1 + $0x22] ss:$0 sm:$0xff] }
 0x3d3   :  { %v2607_v8 = vpop.permute.xlu1 %2606  ;;  %v2499_v25 = vadd.f32 %v2487_v4, %v2422_v60  ;;  %v2424_v0 = vadd.f32 %v2412_v46, %v2323_v12  ;;  %v2595_v48 = vpop.permute.xlu0 %2594  ;;  %v2633_v61 = vmul.f32 %v6179_v9, %v2583_v42  ;;  %v6257_v4 = vld [vmem:[%s6406_s1 + $0x21] ss:$0 sm:$0xff] }
 0x3d4   :  { %v2639_v39 = vmul.f32 %v6179_v9, %v2607_v8  ;;  %v2811_v54 = vmul.f32 %v6257_v4, %v7233_v55  ;;  %v2636_v1 = vmul.f32 %v6179_v9, %v2595_v48 }
 0x3d5   :  { %v2501_v5 = vadd.f32 %v2489_v41, %v2424_v0  ;;  %v2576_v32 = vadd.f32 %v2564_v10, %v2499_v25  ;;  %v2645_v34 = vadd.f32 %v2633_v61, %v6049_v30  ;;  %v6269_v30 = vld [vmem:[%s6406_s1 + $0x23] ss:$0 sm:$0xff] }
 0x3d6   :  { %v6219_v16 = vadd.f32 %v2639_v39, %v2574_v14  ;;  %v2648_v14 = vadd.f32 %v2636_v1, %v6091_v40 }
 0x3d7   :  { %v2615_v47 = vpop.permute.xlu1 %2614  ;;  %v2578_v3 = vadd.f32 %v2566_v15, %v2501_v5  ;;  %v2603_v27 = vpop.permute.xlu0 %2602 }
 0x3d8   :  { %v2641_v43 = vmul.f32 %v6179_v9, %v2615_v47  ;;  %v2638_v10 = vmul.f32 %v6179_v9, %v2603_v27 }
 0x3da   :  { %v6224_v56 = vadd.f32 %v2641_v43, %v2576_v32  ;;  %v7234_v43 = vld [vmem:[#allocation199_spill] sm:$0xff]  ;;  %v2650_v15 = vadd.f32 %v2638_v10, %v6109_v24 }
 0x3db   :  { %v2623_v19 = vpop.permute.xlu1 %2622  ;;  %v2611_v52 = vpop.permute.xlu0 %2610  ;;  %v2814_v18 = vmul.f32 %v6257_v4, %v7234_v43 }
 0x3dc   :  { %v2643_v63 = vmul.f32 %v6179_v9, %v2623_v19  ;;  %v2640_v40 = vmul.f32 %v6179_v9, %v2611_v52 }
 0x3de   :  { %v6227_v13 = vadd.f32 %v2643_v63, %v2578_v3 }
 0x3df   :  { %v2673_v20 = vpop.permute.xlu1 %2672  ;;  %v2619_v33 = vpop.permute.xlu0 %2618 }
 0x3e0   :  { %v2734_v17 = vmul.f32 %v6232_v35, %v2673_v20  ;;  %v2642_v48 = vmul.f32 %v6179_v9, %v2619_v33 }
 0x3e2   :  { %v2746_v62 = vadd.f32 %v2734_v17, %v2645_v34 }
 0x3e3   :  { %v2683_v44 = vpop.permute.xlu1 %2682  ;;  %v2627_v36 = vpop.permute.xlu0 %2626 }
 0x3e4   :  { %v2736_v57 = vmul.f32 %v6232_v35, %v2683_v44  ;;  %v2823_v8 = vadd.f32 %v2811_v54, %v2746_v62  ;;  %v7236_v62 = vld [vmem:[#allocation201_spill] sm:$0xff]  ;;  %v2654_v54 = vadd.f32 %v2642_v48, %v6149_v51 }
 0x3e6   :  { %v6235_v49 = vadd.f32 %v2736_v57, %v2647_v50  ;;  %v2652_v57 = vadd.f32 %v2640_v40, %v6128_v6  ;;  %v2818_v6 = vmul.f32 %v6257_v4, %v7236_v62 }
 0x3e7   :  { %v2688_v45 = vpop.permute.xlu1 %2687  ;;  %v2915_v31 = vpop.permute.xlu0 %2914 }
 0x3e8   :  { %v2737_v46 = vmul.f32 %v6232_v35, %v2688_v45  ;;  %v2965_v41 = vmul.f32 %v6269_v30, %v2915_v31  ;;  %v7235_v45 = vld [vmem:[#allocation200_spill] sm:$0xff] }
 0x3e9   :  { %v2816_v42 = vmul.f32 %v6257_v4, %v7235_v45 }
 0x3ea   :  { %v2749_v0 = vadd.f32 %v2737_v46, %v2648_v14  ;;  %v7237_v14 = vld [vmem:[#allocation202_spill] sm:$0xff] }
 0x3eb   :  { %v2698_v26 = vpop.permute.xlu1 %2697  ;;  %v2927_v12 = vpop.permute.xlu0 %2926  ;;  %v2820_v51 = vmul.f32 %v6257_v4, %v7237_v14 }
 0x3ec   :  { %v2739_v47 = vmul.f32 %v6232_v35, %v2698_v26  ;;  %v2826_v20 = vadd.f32 %v2814_v18, %v2749_v0  ;;  %v2968_v24 = vmul.f32 %v6269_v30, %v2927_v12  ;;  %v2644_v12 = vmul.f32 %v6179_v9, %v2627_v36 }
 0x3ee   :  { %v2751_v63 = vadd.f32 %v2739_v47, %v2650_v15  ;;  %v2656_v10 = vadd.f32 %v2644_v12, %v6164_v53  ;;  %v7239_v15 = vld [vmem:[#allocation203_spill] sm:$0xff] }
 0x3ef   :  { %v2708_v7 = vpop.permute.xlu1 %2707  ;;  %v2935_v32 = vpop.permute.xlu0 %2934  ;;  %v2822_v53 = vmul.f32 %v6257_v4, %v7239_v15 }
 0x3f0   :  { %v2741_v19 = vmul.f32 %v6232_v35, %v2708_v7  ;;  %v2828_v31 = vadd.f32 %v2816_v42, %v2751_v63  ;;  %v2970_v55 = vmul.f32 %v6269_v30, %v2935_v32  ;;  %v7238_v32 = vld [vmem:[#allocation98_spill] sm:$0xff] }
 0x3f1   :  { %v2735_v43 = vmul.f32 %v6232_v35, %v7238_v32 }
 0x3f2   :  { %v2753_v61 = vadd.f32 %v2741_v19, %v2652_v57 }
 0x3f3   :  { %v2718_v21 = vpop.permute.xlu1 %2717  ;;  %v2943_v27 = vpop.permute.xlu0 %2942  ;;  %v2747_v63 = vadd.f32 %v2735_v43, %v6189_v37 }
 0x3f4   :  { %v2743_v7 = vmul.f32 %v6232_v35, %v2718_v21 }
 0x3f6   :  { %v2755_v1 = vadd.f32 %v2743_v7, %v2654_v54  ;;  %v7242_v54 = vld [vmem:[#allocation102_spill] sm:$0xff] }
 0x3f7   :  { %v6237_v59 = vpop.permute.xlu1 %2727 }
 0x3f8   :  { %v2745_v46 = vmul.f32 %v6232_v35, %v6237_v59  ;;  %v2832_v47 = vadd.f32 %v2820_v51, %v2755_v1 }
 0x3fa   :  { %v2757_v0 = vadd.f32 %v2745_v46, %v2656_v10  ;;  %v7245_v10 = vld [vmem:[#allocation260_spill] sm:$0xff] }
 0x3fc   :  { %v2834_v57 = vadd.f32 %v2822_v53, %v2757_v0  ;;  %v7246_v0 = vld [vmem:[#allocation106_spill] sm:$0xff] }
 0x3fe   :  { %v6239_v38 = vpop.permute.xlu1 %2764 }
 0x3ff   :  { %v2812_v18 = vmul.f32 %v6257_v4, %v6239_v38 }
 0x401   :  { %v2824_v38 = vadd.f32 %v2812_v18, %v2747_v63  ;;  %v7247_v18 = vld [vmem:[#allocation262_spill] sm:$0xff] }
 0x402   :  { %v6241_v23 = vpop.permute.xlu1 %2768 }
 0x403   :  { %v2813_v37 = vmul.f32 %v6257_v4, %v6241_v23 }
 0x405   :  { %v2825_v23 = vadd.f32 %v2813_v37, %v6235_v49  ;;  %v7243_v49 = vld [vmem:[#allocation258_spill] sm:$0xff] }
 0x406   :  { %v6243_v58 = vpop.permute.xlu1 %2776 }
 0x40a   :  { %v6245_v28 = vpop.permute.xlu1 %2784 }
 0x40e   :  { %v6247_v50 = vpop.permute.xlu1 %2792 }
 0x413   :  { %v6252_v29 = vpop.permute.xlu1 %2800 }
 0x418   :  { %v2838_v60 = vpop.permute.xlu1 %2837 }
 0x419   :  { %v2888_v25 = vmul.f32 %v6264_v2, %v2838_v60  ;;  %v2830_v60 = vadd.f32 %v2818_v6, %v2753_v61 }
 0x41b   :  { %v2900_v39 = vadd.f32 %v2888_v25, %v2823_v8 }
 0x41c   :  { %v6276_v22 = vpop.permute.xlu1 %2845 }
 0x41d   :  { %v2977_v5 = vadd.f32 %v2965_v41, %v2900_v39  ;;  %v2951_v41 = vpop.permute.xlu0 %2950  ;;  %v2972_v39 = vmul.f32 %v6269_v30, %v2943_v27  ;;  %v7241_v27 = vld [vmem:[#allocation100_spill] sm:$0xff] }
 0x41e   :  { %v2974_v40 = vmul.f32 %v6269_v30, %v2951_v41  ;;  %v2738_v61 = vmul.f32 %v6232_v35, %v7241_v27 }
 0x41f   :  { %2990 = vst.msk [vmem:[%s6407_s2] sm:$0x3f] %vm2989_vm0, %v2977_v5 }
 0x420   :  { %v2750_v6 = vadd.f32 %v2738_v61, %v6210_v11  ;;  %v2892_v11 = vmul.f32 %v6264_v2, %v7243_v49 }
 0x422   :  { %v2850_v3 = vpop.permute.xlu1 %2849 }
 0x423   :  { %v2891_v44 = vmul.f32 %v6264_v2, %v2850_v3  ;;  %v2959_v3 = vpop.permute.xlu0 %2958 }
 0x424   :  { %v2976_v42 = vmul.f32 %v6269_v30, %v2959_v3 }
 0x425   :  { %v2903_v26 = vadd.f32 %v2891_v44, %v2826_v20 }
 0x426   :  { %v2858_v52 = vpop.permute.xlu1 %2857 }
 0x427   :  { %v2980_v17 = vadd.f32 %v2968_v24, %v2903_v26  ;;  %v2893_v34 = vmul.f32 %v6264_v2, %v2858_v52  ;;  %v7240_v26 = vld [vmem:[#allocation256_spill] sm:$0xff] }
 0x428   :  { %v2889_v48 = vmul.f32 %v6264_v2, %v7240_v26 }
 0x429   :  { %2993 = vst.msk [vmem:[%s6407_s2 + $0x18] sm:$0x3f] %vm2989_vm0, %v2980_v17  ;;  %v2905_v33 = vadd.f32 %v2893_v34, %v2828_v31  ;;  %v2815_v17 = vmul.f32 %v6257_v4, %v6243_v58  ;;  %v2890_v31 = vmul.f32 %v6264_v2, %v6276_v22  ;;  %v2817_v22 = vmul.f32 %v6257_v4, %v6245_v28 }
 0x42a   :  { %v2866_v21 = vpop.permute.xlu1 %2865  ;;  %v2901_v34 = vadd.f32 %v2889_v48, %v2824_v38  ;;  %v2819_v28 = vmul.f32 %v6257_v4, %v6247_v50  ;;  %v2821_v50 = vmul.f32 %v6257_v4, %v6252_v29 }
 0x42b   :  { %v2982_v8 = vadd.f32 %v2970_v55, %v2905_v33  ;;  %v2895_v25 = vmul.f32 %v6264_v2, %v2866_v21  ;;  %v2740_v33 = vmul.f32 %v6232_v35, %v7242_v54  ;;  %v2827_v12 = vadd.f32 %v2815_v17, %v2750_v6 }
 0x42c   :  { %v2902_v21 = vadd.f32 %v2890_v31, %v2825_v23 }
 0x42d   :  { %2995 = vst.msk [vmem:[%s6407_s2 + $0x28] sm:$0x3f] %vm2989_vm0, %v2982_v8  ;;  %v2907_v9 = vadd.f32 %v2895_v25, %v2830_v60  ;;  %v2752_v1 = vadd.f32 %v2740_v33, %v6219_v16  ;;  %v7244_v8 = vld [vmem:[#allocation104_spill] sm:$0xff]  ;;  %v2904_v51 = vadd.f32 %v2892_v11, %v2827_v12  ;;  %v2894_v16 = vmul.f32 %v6264_v2, %v7245_v10 }
 0x42e   :  { %v2874_v36 = vpop.permute.xlu1 %2873  ;;  %v2742_v25 = vmul.f32 %v6232_v35, %v7244_v8 }
 0x42f   :  { %v2984_v59 = vadd.f32 %v2972_v39, %v2907_v9  ;;  %v2897_v5 = vmul.f32 %v6264_v2, %v2874_v36  ;;  %v2829_v14 = vadd.f32 %v2817_v22, %v2752_v1 }
 0x430   :  { %v2754_v9 = vadd.f32 %v2742_v25, %v6224_v56  ;;  %v2896_v56 = vmul.f32 %v6264_v2, %v7247_v18 }
 0x431   :  { %2997 = vst.msk [vmem:[%s6407_s2 + $0x38] sm:$0x3f] %vm2989_vm0, %v2984_v59  ;;  %v2909_v19 = vadd.f32 %v2897_v5, %v2832_v47  ;;  %v2744_v59 = vmul.f32 %v6232_v35, %v7246_v0  ;;  %v2906_v32 = vadd.f32 %v2894_v16, %v2829_v14 }
 0x432   :  { %v2882_v20 = vpop.permute.xlu1 %2881  ;;  %v2831_v5 = vadd.f32 %v2819_v28, %v2754_v9 }
 0x433   :  { %v2986_v44 = vadd.f32 %v2974_v40, %v2909_v19  ;;  %v2899_v45 = vmul.f32 %v6264_v2, %v2882_v20  ;;  %v2756_v15 = vadd.f32 %v2744_v59, %v6227_v13  ;;  %v7248_v19 = vld [vmem:[#allocation264_spill] sm:$0xff] }
 0x434   :  { %v2908_v29 = vadd.f32 %v2896_v56, %v2831_v5  ;;  %v2898_v3 = vmul.f32 %v6264_v2, %v7248_v19 }
 0x435   :  { %2999 = vst.msk [vmem:[%s6407_s2 + $0x48] sm:$0x3f] %vm2989_vm0, %v2986_v44  ;;  %v2911_v24 = vadd.f32 %v2899_v45, %v2834_v57  ;;  %v2833_v40 = vadd.f32 %v2821_v50, %v2756_v15 }
 0x437   :  { %v2988_v52 = vadd.f32 %v2976_v42, %v2911_v24  ;;  %v2919_v7 = vpop.permute.xlu1 %2918  ;;  %v2910_v13 = vadd.f32 %v2898_v3, %v2833_v40 }
 0x438   :  { %v2966_v62 = vmul.f32 %v6269_v30, %v2919_v7 }
 0x439   :  { %3001 = vst.msk [vmem:[%s6407_s2 + $0x58] sm:$0x3f] %vm2989_vm0, %v2988_v52 }
 0x43a   :  { %v2978_v55 = vadd.f32 %v2966_v62, %v2901_v34 }
 0x43b   :  { %v2923_v58 = vpop.permute.xlu1 %2922 }
 0x43c   :  { %2991 = vst.msk [vmem:[%s6407_s2 + $0x8] sm:$0x3f] %vm2989_vm0, %v2978_v55  ;;  %v2967_v60 = vmul.f32 %v6269_v30, %v2923_v58 }
 0x43e   :  { %v2979_v46 = vadd.f32 %v2967_v60, %v2902_v21 }
 0x43f   :  { %v2931_v41 = vpop.permute.xlu1 %2930 }
 0x440   :  { %2992 = vst.msk [vmem:[%s6407_s2 + $0x10] sm:$0x3f] %vm2989_vm0, %v2979_v46  ;;  %v2969_v39 = vmul.f32 %v6269_v30, %v2931_v41 }
 0x442   :  { %v2981_v36 = vadd.f32 %v2969_v39, %v2904_v51 }
 0x443   :  { %v2939_v47 = vpop.permute.xlu1 %2938 }
 0x444   :  { %2994 = vst.msk [vmem:[%s6407_s2 + $0x20] sm:$0x3f] %vm2989_vm0, %v2981_v36  ;;  %v2971_v43 = vmul.f32 %v6269_v30, %v2939_v47 }
 0x446   :  { %v2983_v53 = vadd.f32 %v2971_v43, %v2906_v32 }
 0x447   :  { %v2947_v35 = vpop.permute.xlu1 %2946 }
 0x448   :  { %2996 = vst.msk [vmem:[%s6407_s2 + $0x30] sm:$0x3f] %vm2989_vm0, %v2983_v53  ;;  %v2973_v4 = vmul.f32 %v6269_v30, %v2947_v35 }
 0x44a   :  { %v2985_v63 = vadd.f32 %v2973_v4, %v2908_v29 }
 0x44b   :  { %v2955_v20 = vpop.permute.xlu1 %2954 }
 0x44c   :  { %2998 = vst.msk [vmem:[%s6407_s2 + $0x40] sm:$0x3f] %vm2989_vm0, %v2985_v63  ;;  %v2975_v44 = vmul.f32 %v6269_v30, %v2955_v20 }
 0x44e   :  { %v2987_v57 = vadd.f32 %v2975_v44, %v2910_v13 }
 0x450   :  { %3000 = vst.msk [vmem:[%s6407_s2 + $0x50] sm:$0x3f] %vm2989_vm0, %v2987_v57 }

</bundles_post_ra>
